<compile_context>
chip_gen: v5e
topology: v5e:2x2
jax: 0.10.0
libtpu: 0.0.40
codegen_flags: <defaults>
</compile_context>

<pallas_src>
import functools

import jax
import jax.numpy as jnp
from jax.experimental import pallas as pl
from jax.experimental.pallas import tpu as pltpu

_VMEM_LIMIT = 48 * 1024 * 1024  # safe on v5e/v6e (128 MiB) and v7x (64 MiB physical)


def _relu6(x):
    return jnp.clip(x, 0.0, 6.0)


def fold_bn(gamma, beta, mean, var, eps):
    scale = gamma / jnp.sqrt(var + eps)
    bias = beta - mean * scale
    return scale.reshape(1, -1), bias.reshape(1, -1)


# ----------------------------------------------------------------------------
# kernel 1: fused expand(1x1)+BN+ReLU6 -> depthwise kxk(stride s)+BN+ReLU6
#           + global-average-pool side output.  One grid step per image.
# ----------------------------------------------------------------------------
def _fused_expand_dw_kernel(*refs, k, s, H, W, Hout, Wout, pad, has_expand):
    if has_expand:
        (x_ref, we_ref, s0_ref, b0_ref, wd_ref, s1_ref, b1_ref,
         y_ref, pool_ref, xpad_ref) = refs
    else:
        (x_ref, wd_ref, s1_ref, b1_ref, y_ref, pool_ref, xpad_ref) = refs

    C = y_ref.shape[-1]
    x4 = x_ref[...]                                    # (1, H, W, Cin) f32

    if has_expand:
        cin = x4.shape[-1]
        x2 = x4.reshape(H * W, cin).astype(jnp.bfloat16)
        z = jnp.dot(x2, we_ref[...], preferred_element_type=jnp.float32)
        z = _relu6(z * s0_ref[...] + b0_ref[...])
        z4 = z.reshape(1, H, W, C)
    else:
        z4 = x4

    # Zero-padded expanded activation lives only in VMEM (no HBM jnp.pad copy).
    xpad_ref[...] = jnp.zeros(xpad_ref.shape, jnp.float32)
    xpad_ref[:, pad:pad + H, pad:pad + W, :] = z4

    xp = xpad_ref[...]                                 # (1, Hp, Wp, C)
    wd = wd_ref[...]                                   # (k, k, C) f32
    acc = jnp.zeros((1, Hout, Wout, C), jnp.float32)
    for kh in range(k):
        for kw in range(k):
            patch = xp[:, kh:kh + s * Hout:s, kw:kw + s * Wout:s, :]
            acc = acc + patch * wd[kh, kw]

    y = _relu6(acc * s1_ref[...] + b1_ref[...])        # (1, Hout, Wout, C) f32
    y_ref[...] = y

    pooled = jnp.sum(y.reshape(Hout * Wout, C), axis=0, keepdims=True)
    pool_ref[...] = (pooled * (1.0 / float(Hout * Wout))).reshape(1, 1, C)


def fused_expand_dw(x_nhwc, w_exp_bf16, scale0, bias0, w_dw, scale1, bias1,
                    *, k, s, has_expand):
    N, H, W, Cin = x_nhwc.shape
    C = w_dw.shape[-1]
    pad = (k - 1) // 2
    Hp, Wp = H + 2 * pad, W + 2 * pad
    Hout = (H + 2 * pad - k) // s + 1
    Wout = (W + 2 * pad - k) // s + 1

    kern = functools.partial(_fused_expand_dw_kernel, k=k, s=s, H=H, W=W,
                             Hout=Hout, Wout=Wout, pad=pad,
                             has_expand=has_expand)

    in_specs = [pl.BlockSpec((1, H, W, Cin), lambda n: (n, 0, 0, 0))]
    args = [x_nhwc]
    if has_expand:
        in_specs += [pl.BlockSpec(w_exp_bf16.shape, lambda n: (0, 0)),
                     pl.BlockSpec(scale0.shape, lambda n: (0, 0)),
                     pl.BlockSpec(bias0.shape, lambda n: (0, 0))]
        args += [w_exp_bf16, scale0, bias0]
    in_specs += [pl.BlockSpec(w_dw.shape, lambda n: (0, 0, 0)),
                 pl.BlockSpec(scale1.shape, lambda n: (0, 0)),
                 pl.BlockSpec(bias1.shape, lambda n: (0, 0))]
    args += [w_dw, scale1, bias1]

    y, pooled = pl.pallas_call(
        kern,
        grid=(N,),
        in_specs=in_specs,
        out_specs=(pl.BlockSpec((1, Hout, Wout, C), lambda n: (n, 0, 0, 0)),
                   pl.BlockSpec((1, 1, C), lambda n: (n, 0, 0))),
        out_shape=(jax.ShapeDtypeStruct((N, Hout, Wout, C), jnp.float32),
                   jax.ShapeDtypeStruct((N, 1, C), jnp.float32)),
        scratch_shapes=[pltpu.VMEM((1, Hp, Wp, C), jnp.float32)],
        compiler_params=pltpu.CompilerParams(
            dimension_semantics=("parallel",),
            vmem_limit_bytes=_VMEM_LIMIT),
    )(*args)
    return y, pooled


# ----------------------------------------------------------------------------
# kernel 2: tiny SE gate MLP on the pooled (N, C) tensor
# ----------------------------------------------------------------------------
def _se_gate_kernel(p_ref, wr_ref, br_ref, we_ref, be_ref, g_ref):
    p = p_ref[...]                                                   # (N, C)
    z = jnp.dot(p, wr_ref[...], preferred_element_type=jnp.float32) + br_ref[...]
    z = _relu6(z)
    z = jnp.dot(z, we_ref[...], preferred_element_type=jnp.float32) + be_ref[...]
    g_ref[...] = jax.nn.sigmoid(z)


def se_gate(pooled, wr, br, we, be):
    N, C = pooled.shape
    return pl.pallas_call(
        _se_gate_kernel,
        grid=(1,),
        in_specs=[pl.BlockSpec(pooled.shape, lambda i: (0, 0)),
                  pl.BlockSpec(wr.shape, lambda i: (0, 0)),
                  pl.BlockSpec(br.shape, lambda i: (0, 0)),
                  pl.BlockSpec(we.shape, lambda i: (0, 0)),
                  pl.BlockSpec(be.shape, lambda i: (0, 0))],
        out_specs=pl.BlockSpec((N, C), lambda i: (0, 0)),
        out_shape=jax.ShapeDtypeStruct((N, C), jnp.float32),
    )(pooled, wr, br, we, be)


# ----------------------------------------------------------------------------
# kernel 3: project 1x1 conv + BN, with SE gate multiply and residual add fused
#           Tiled over (batch, row-blocks); weights/scale/bias stay resident.
# ----------------------------------------------------------------------------
def _project_kernel(*refs, use_gate, use_skip):
    x_ref, w_ref, s_ref, b_ref = refs[:4]
    i = 4
    gate_ref = None
    idn_ref = None
    if use_gate:
        gate_ref = refs[i]
        i += 1
    if use_skip:
        idn_ref = refs[i]
        i += 1
    o_ref = refs[i]

    tr, cin = x_ref.shape[1], x_ref.shape[2]
    x = x_ref[...].reshape(tr, cin)                    # (TR, C) f32
    if use_gate:
        x = x * gate_ref[...].reshape(1, cin)          # per-(image, channel) SE gate
    y = jnp.dot(x.astype(jnp.bfloat16), w_ref[...],
                preferred_element_type=jnp.float32)
    y = y * s_ref[...] + b_ref[...]
    if use_skip:
        y = y + idn_ref[...].reshape(tr, y.shape[-1])
    o_ref[...] = y.reshape(o_ref.shape)


def _row_tile(hw):
    # full rows if small, else 512-row blocks (8-aligned, fits VMEM on v7x too)
    return hw if hw <= 512 else 512


def project_conv_bn(x3d, w_bf16, scale, bias, gate=None, identity3d=None):
    N, HW, C = x3d.shape
    Cout = w_bf16.shape[1]
    tr = _row_tile(HW)
    nr = pl.cdiv(HW, tr)

    in_specs = [pl.BlockSpec((1, tr, C), lambda n, r: (n, r, 0)),
                pl.BlockSpec(w_bf16.shape, lambda n, r: (0, 0)),
                pl.BlockSpec(scale.shape, lambda n, r: (0, 0)),
                pl.BlockSpec(bias.shape, lambda n, r: (0, 0))]
    args = [x3d, w_bf16, scale, bias]
    if gate is not None:
        in_specs.append(pl.BlockSpec((1, 1, C), lambda n, r: (n, 0, 0)))
        args.append(gate)
    if identity3d is not None:
        in_specs.append(pl.BlockSpec((1, tr, Cout), lambda n, r: (n, r, 0)))
        args.append(identity3d)

    kern = functools.partial(_project_kernel, use_gate=gate is not None,
                             use_skip=identity3d is not None)
    return pl.pallas_call(
        kern,
        grid=(N, nr),
        in_specs=in_specs,
        out_specs=pl.BlockSpec((1, tr, Cout), lambda n, r: (n, r, 0)),
        out_shape=jax.ShapeDtypeStruct((N, HW, Cout), jnp.float32),
        compiler_params=pltpu.CompilerParams(
            dimension_semantics=("parallel", "parallel"),
            vmem_limit_bytes=_VMEM_LIMIT),
    )(*args)


# ----------------------------------------------------------------------------
# MBConvBlock wrapper (parameter folding + glue in plain JAX)
# ----------------------------------------------------------------------------
def init_mbconv_params(key, inp, final_oup, k, expand_ratio, se_ratio, has_se):
    oup = inp * expand_ratio
    keys = jax.random.split(key, 12)
    p = {}
    if expand_ratio != 1:
        p["w_expand"] = 0.1 * jax.random.normal(keys[0], (inp, oup), jnp.float32)
        p["bn0"] = dict(
            gamma=1.0 + 0.05 * jax.random.normal(keys[1], (oup,), jnp.float32),
            beta=0.05 * jax.random.normal(keys[2], (oup,), jnp.float32),
            mean=0.05 * jax.random.normal(keys[3], (oup,), jnp.float32),
            var=jnp.abs(1.0 + 0.05 * jax.random.normal(keys[4], (oup,), jnp.float32)),
        )
    p["w_dw"] = 0.1 * jax.random.normal(keys[5], (k, k, oup), jnp.float32)
    p["bn1"] = dict(
        gamma=1.0 + 0.05 * jax.random.normal(keys[6], (oup,), jnp.float32),
        beta=0.05 * jax.random.normal(keys[7], (oup,), jnp.float32),
        mean=0.05 * jax.random.normal(keys[8], (oup,), jnp.float32),
        var=jnp.abs(1.0 + 0.05 * jax.random.normal(keys[9], (oup,), jnp.float32)),
    )
    if has_se:
        cse = max(1, int(inp * se_ratio))
        kse = jax.random.split(keys[10], 4)
        p["w_se_reduce"] = 0.1 * jax.random.normal(kse[0], (oup, cse), jnp.float32)
        p["b_se_reduce"] = 0.05 * jax.random.normal(kse[1], (1, cse), jnp.float32)
        p["w_se_expand"] = 0.1 * jax.random.normal(kse[2], (cse, oup), jnp.float32)
        p["b_se_expand"] = 0.05 * jax.random.normal(kse[3], (1, oup), jnp.float32)
    kpr = jax.random.split(keys[11], 5)
    p["w_project"] = 0.1 * jax.random.normal(kpr[0], (oup, final_oup), jnp.float32)
    p["bn2"] = dict(
        gamma=1.0 + 0.05 * jax.random.normal(kpr[1], (final_oup,), jnp.float32),
        beta=0.05 * jax.random.normal(kpr[2], (final_oup,), jnp.float32),
        mean=0.05 * jax.random.normal(kpr[3], (final_oup,), jnp.float32),
        var=jnp.abs(1.0 + 0.05 * jax.random.normal(kpr[4], (final_oup,), jnp.float32)),
    )
    return p


def mbconv_forward(x_nchw, params, *, inp, final_oup, k, s, expand_ratio,
                   has_se, eps=1e-3):
    """Pallas implementation (inference). Input / output layout: NCHW."""
    x = jnp.transpose(x_nchw, (0, 2, 3, 1)).astype(jnp.float32)   # NHWC
    N, H, W, _ = x.shape
    identity = x
    has_expand = expand_ratio != 1

    if has_expand:
        scale0, bias0 = fold_bn(**params["bn0"], eps=eps)
        w_exp = params["w_expand"].astype(jnp.bfloat16)
    else:
        scale0 = bias0 = w_exp = None
    scale1, bias1 = fold_bn(**params["bn1"], eps=eps)

    # fused expand + depthwise + BN/ReLU6 + global-average-pool side output
    y, pooled = fused_expand_dw(x, w_exp, scale0, bias0, params["w_dw"],
                                scale1, bias1, k=k, s=s, has_expand=has_expand)
    _, Hout, Wout, C = y.shape

    gate3 = None
    if has_se:
        gate = se_gate(pooled.reshape(N, C), params["w_se_reduce"],
                       params["b_se_reduce"], params["w_se_expand"],
                       params["b_se_expand"])
        gate3 = gate.reshape(N, 1, C)

    # project 1x1 conv + BN (+ SE gate, + residual) fused in one tiled kernel
    scale2, bias2 = fold_bn(**params["bn2"], eps=eps)
    use_skip = (s == 1) and (inp == final_oup)
    x3 = y.reshape(N, Hout * Wout, C)
    idn3 = identity.reshape(N, H * W, inp) if use_skip else None
    w_proj = params["w_project"].astype(jnp.bfloat16)
    out3 = project_conv_bn(x3, w_proj, scale2, bias2, gate=gate3, identity3d=idn3)

    out = out3.reshape(N, Hout, Wout, final_oup)
    return jnp.transpose(out, (0, 3, 1, 2))   # back to NCHW


# ----------------------------------------------------------------------------
# pure-JAX reference (same bf16 quantization points as the kernels)
# ----------------------------------------------------------------------------
def mbconv_reference(x_nchw, params, *, inp, final_oup, k, s, expand_ratio,
                     has_se, eps=1e-3):
    x = jnp.transpose(x_nchw, (0, 2, 3, 1)).astype(jnp.float32)
    N, H, W, _ = x.shape
    identity = x
    C = inp * expand_ratio

    if expand_ratio != 1:
        s0, b0 = fold_bn(**params["bn0"], eps=eps)
        x2 = x.reshape(N * H * W, inp)
        z = jnp.dot(x2.astype(jnp.bfloat16),
                    params["w_expand"].astype(jnp.bfloat16),
                    preferred_element_type=jnp.float32)
        z = _relu6(z * s0 + b0)
        x = z.reshape(N, H, W, C)

    pad = (k - 1) // 2
    xp = jnp.pad(x, ((0, 0), (pad, pad), (pad, pad), (0, 0)))
    Hout = (H + 2 * pad - k) // s + 1
    Wout = (W + 2 * pad - k) // s + 1
    acc = jnp.zeros((N, Hout, Wout, C), jnp.float32)
    for kh in range(k):
        for kw in range(k):
            patch = xp[:, kh:kh + s * Hout:s, kw:kw + s * Wout:s, :]
            acc = acc + patch * params["w_dw"][kh, kw]
    s1, b1 = fold_bn(**params["bn1"], eps=eps)
    x = _relu6(acc * s1.reshape(1, 1, 1, -1) + b1.reshape(1, 1, 1, -1))

    if has_se:
        pooled = jnp.mean(x, axis=(1, 2))
        z = _relu6(pooled @ params["w_se_reduce"] + params["b_se_reduce"])
        z = z @ params["w_se_expand"] + params["b_se_expand"]
        x = x * jax.nn.sigmoid(z)[:, None, None, :]

    s2, b2 = fold_bn(**params["bn2"], eps=eps)
    x2 = x.reshape(N * Hout * Wout, C)
    y = jnp.dot(x2.astype(jnp.bfloat16),
                params["w_project"].astype(jnp.bfloat16),
                preferred_element_type=jnp.float32)
    y = (y * s2 + b2).reshape(N, Hout, Wout, final_oup)
    if s == 1 and inp == final_oup:
        y = y + identity
    return jnp.transpose(y, (0, 3, 1, 2))


# ----------------------------------------------------------------------------
if __name__ == "__main__":
    # Block config: exercises expand, depthwise, SE and the residual skip.
    inp, final_oup, k, s, expand_ratio, se_ratio, has_se = 8, 8, 3, 1, 4, 0.25, True
    N, H, W = 2, 16, 16

    key = jax.random.PRNGKey(0)
    kx, kp = jax.random.split(key)
    x = jax.random.normal(kx, (N, inp, H, W), jnp.float32)   # NCHW input

    params = init_mbconv_params(kp, inp, final_oup, k, expand_ratio, se_ratio, has_se)

    out = mbconv_forward(x, params, inp=inp, final_oup=final_oup, k=k, s=s,
                         expand_ratio=expand_ratio, has_se=has_se)
    out = jax.block_until_ready(out)

    ref = mbconv_reference(x, params, inp=inp, final_oup=final_oup, k=k, s=s,
                           expand_ratio=expand_ratio, has_se=has_se)
    ref = jax.block_until_ready(ref)

    assert out.shape == (N, final_oup, H, W), out.shape
    # bf16 MXU inputs (identical quantization points in kernel and reference);
    # tolerance covers f32 accumulation-order / pooling-order noise only.
    if not jnp.allclose(out, ref, atol=5e-3, rtol=5e-3):
        max_err = float(jnp.max(jnp.abs(out - ref)))
        raise AssertionError(f"Pallas MBConvBlock mismatch vs reference, max abs err={max_err}")

    print("KERNEL_OK")
</pallas_src>

<mosaic_0001>
module attributes {stable_mosaic.version = 11 : i64} {
  func.func @_fused_expand_dw_kernel(%arg0: i32, %arg1: memref<1x16x16x8xf32, #tpu.memory_space<vmem>>, %arg2: memref<8x32xbf16, #tpu.memory_space<vmem>>, %arg3: memref<1x32xf32, #tpu.memory_space<vmem>>, %arg4: memref<1x32xf32, #tpu.memory_space<vmem>>, %arg5: memref<3x3x32xf32, #tpu.memory_space<vmem>>, %arg6: memref<1x32xf32, #tpu.memory_space<vmem>>, %arg7: memref<1x32xf32, #tpu.memory_space<vmem>>, %arg8: memref<1x16x16x32xf32, #tpu.memory_space<vmem>>, %arg9: memref<1x1x32xf32, #tpu.memory_space<vmem>>, %arg10: memref<1x18x18x32xf32, #tpu.memory_space<vmem>>) attributes {dimension_semantics = [#tpu.dimension_semantics<parallel>], iteration_bounds = array<i64: 2>, scalar_prefetch = 0 : i64, scratch_operands = 1 : i64, tpu.core_type = #tpu.core_type<tc>, window_params = [{transform_indices = @transform_0, window_bounds = array<i64: 1, 16, 16, 8>}, {pipeline_mode = #tpu.pipeline_mode<synchronous>, transform_indices = @transform_1, window_bounds = array<i64: 8, 32>}, {pipeline_mode = #tpu.pipeline_mode<synchronous>, transform_indices = @transform_2, window_bounds = array<i64: 1, 32>}, {pipeline_mode = #tpu.pipeline_mode<synchronous>, transform_indices = @transform_3, window_bounds = array<i64: 1, 32>}, {pipeline_mode = #tpu.pipeline_mode<synchronous>, transform_indices = @transform_4, window_bounds = array<i64: 3, 3, 32>}, {pipeline_mode = #tpu.pipeline_mode<synchronous>, transform_indices = @transform_5, window_bounds = array<i64: 1, 32>}, {pipeline_mode = #tpu.pipeline_mode<synchronous>, transform_indices = @transform_6, window_bounds = array<i64: 1, 32>}, {transform_indices = @transform_7, window_bounds = array<i64: 1, 16, 16, 32>}, {transform_indices = @transform_8, window_bounds = array<i64: 1, 1, 32>}]} {
    %c0 = arith.constant 0 : index
    %c0_0 = arith.constant 0 : index
    %c0_1 = arith.constant 0 : index
    %c0_2 = arith.constant 0 : index
    %0 = vector.load %arg1[%c0, %c0_0, %c0_1, %c0_2] : memref<1x16x16x8xf32, #tpu.memory_space<vmem>>, vector<1x16x16x8xf32>
    %1 = vector.shape_cast %0 : vector<1x16x16x8xf32> to vector<256x8xf32>
    %2 = arith.truncf %1 : vector<256x8xf32> to vector<256x8xbf16>
    %c0_3 = arith.constant 0 : index
    %c0_4 = arith.constant 0 : index
    %3 = vector.load %arg2[%c0_3, %c0_4] : memref<8x32xbf16, #tpu.memory_space<vmem>>, vector<8x32xbf16>
    %cst = arith.constant dense<0.000000e+00> : vector<256x32xf32>
    %4 = tpu.matmul %2, %3, %cst {dimension_numbers = #tpu.dot_dimension_numbers<[1], [0], [0], [1], [0, 0, 1, 1], [], []>} : vector<256x8xbf16>, vector<8x32xbf16>, vector<256x32xf32> -> vector<256x32xf32>
    %c0_5 = arith.constant 0 : index
    %c0_6 = arith.constant 0 : index
    %5 = vector.load %arg3[%c0_5, %c0_6] : memref<1x32xf32, #tpu.memory_space<vmem>>, vector<1x32xf32>
    %6 = vector.broadcast %5 : vector<1x32xf32> to vector<256x32xf32>
    %7 = arith.mulf %4, %6 : vector<256x32xf32>
    %c0_7 = arith.constant 0 : index
    %c0_8 = arith.constant 0 : index
    %8 = vector.load %arg4[%c0_7, %c0_8] : memref<1x32xf32, #tpu.memory_space<vmem>>, vector<1x32xf32>
    %9 = vector.broadcast %8 : vector<1x32xf32> to vector<256x32xf32>
    %10 = arith.addf %7, %9 : vector<256x32xf32>
    %cst_9 = arith.constant 0.000000e+00 : f32
    %cst_10 = arith.constant 6.000000e+00 : f32
    %11 = vector.broadcast %cst_9 : f32 to vector<256x32xf32>
    %12 = arith.maximumf %11, %10 : vector<256x32xf32>
    %13 = vector.broadcast %cst_10 : f32 to vector<256x32xf32>
    %14 = arith.minimumf %13, %12 : vector<256x32xf32>
    %15 = vector.shape_cast %14 : vector<256x32xf32> to vector<1x16x16x32xf32>
    %cst_11 = arith.constant 0.000000e+00 : f32
    %16 = vector.broadcast %cst_11 : f32 to vector<1x18x18x32xf32>
    %c0_12 = arith.constant 0 : index
    %c0_13 = arith.constant 0 : index
    %c0_14 = arith.constant 0 : index
    %c0_15 = arith.constant 0 : index
    %17 = vector.load %arg10[%c0_12, %c0_13, %c0_14, %c0_15] : memref<1x18x18x32xf32, #tpu.memory_space<vmem>>, vector<1x18x18x32xf32>
    tpu.vector_store %arg10[%c0_12, %c0_13, %c0_14, %c0_15], %16 {strides = array<i32>} : memref<1x18x18x32xf32, #tpu.memory_space<vmem>>, vector<1x18x18x32xf32>,
    %c0_16 = arith.constant 0 : index
    %c1 = arith.constant 1 : index
    %c1_17 = arith.constant 1 : index
    %c0_18 = arith.constant 0 : index
    %18 = vector.load %arg10[%c0_16, %c1, %c1_17, %c0_18] : memref<1x18x18x32xf32, #tpu.memory_space<vmem>>, vector<1x16x16x32xf32>
    tpu.vector_store %arg10[%c0_16, %c1, %c1_17, %c0_18], %15 {strides = array<i32>} : memref<1x18x18x32xf32, #tpu.memory_space<vmem>>, vector<1x16x16x32xf32>,
    %c0_19 = arith.constant 0 : index
    %c0_20 = arith.constant 0 : index
    %c0_21 = arith.constant 0 : index
    %c0_22 = arith.constant 0 : index
    %19 = vector.load %arg10[%c0_19, %c0_20, %c0_21, %c0_22] : memref<1x18x18x32xf32, #tpu.memory_space<vmem>>, vector<1x18x18x32xf32>
    %c0_23 = arith.constant 0 : index
    %c0_24 = arith.constant 0 : index
    %c0_25 = arith.constant 0 : index
    %20 = vector.load %arg5[%c0_23, %c0_24, %c0_25] : memref<3x3x32xf32, #tpu.memory_space<vmem>>, vector<3x3x32xf32>
    %cst_26 = arith.constant 0.000000e+00 : f32
    %21 = vector.broadcast %cst_26 : f32 to vector<1x16x16x32xf32>
    %22 = vector.extract_strided_slice %19 {offsets = [0, 0, 0, 0], sizes = [1, 16, 16, 32], strides = [1, 1, 1, 1]} : vector<1x18x18x32xf32> to vector<1x16x16x32xf32>
    %23 = vector.extract_strided_slice %20 {offsets = [0, 0, 0], sizes = [1, 1, 32], strides = [1, 1, 1]} : vector<3x3x32xf32> to vector<1x1x32xf32>
    %24 = vector.shape_cast %23 : vector<1x1x32xf32> to vector<32xf32>
    %25 = vector.shape_cast %24 : vector<32xf32> to vector<1x1x1x32xf32>
    %26 = vector.broadcast %25 : vector<1x1x1x32xf32> to vector<1x16x16x32xf32>
    %27 = arith.mulf %22, %26 : vector<1x16x16x32xf32>
    %28 = arith.addf %21, %27 : vector<1x16x16x32xf32>
    %29 = vector.extract_strided_slice %19 {offsets = [0, 0, 1, 0], sizes = [1, 16, 16, 32], strides = [1, 1, 1, 1]} : vector<1x18x18x32xf32> to vector<1x16x16x32xf32>
    %30 = vector.extract_strided_slice %20 {offsets = [0, 1, 0], sizes = [1, 1, 32], strides = [1, 1, 1]} : vector<3x3x32xf32> to vector<1x1x32xf32>
    %31 = vector.shape_cast %30 : vector<1x1x32xf32> to vector<32xf32>
    %32 = vector.shape_cast %31 : vector<32xf32> to vector<1x1x1x32xf32>
    %33 = vector.broadcast %32 : vector<1x1x1x32xf32> to vector<1x16x16x32xf32>
    %34 = arith.mulf %29, %33 : vector<1x16x16x32xf32>
    %35 = arith.addf %28, %34 : vector<1x16x16x32xf32>
    %36 = vector.extract_strided_slice %19 {offsets = [0, 0, 2, 0], sizes = [1, 16, 16, 32], strides = [1, 1, 1, 1]} : vector<1x18x18x32xf32> to vector<1x16x16x32xf32>
    %37 = vector.extract_strided_slice %20 {offsets = [0, 2, 0], sizes = [1, 1, 32], strides = [1, 1, 1]} : vector<3x3x32xf32> to vector<1x1x32xf32>
    %38 = vector.shape_cast %37 : vector<1x1x32xf32> to vector<32xf32>
    %39 = vector.shape_cast %38 : vector<32xf32> to vector<1x1x1x32xf32>
    %40 = vector.broadcast %39 : vector<1x1x1x32xf32> to vector<1x16x16x32xf32>
    %41 = arith.mulf %36, %40 : vector<1x16x16x32xf32>
    %42 = arith.addf %35, %41 : vector<1x16x16x32xf32>
    %43 = vector.extract_strided_slice %19 {offsets = [0, 1, 0, 0], sizes = [1, 16, 16, 32], strides = [1, 1, 1, 1]} : vector<1x18x18x32xf32> to vector<1x16x16x32xf32>
    %44 = vector.extract_strided_slice %20 {offsets = [1, 0, 0], sizes = [1, 1, 32], strides = [1, 1, 1]} : vector<3x3x32xf32> to vector<1x1x32xf32>
    %45 = vector.shape_cast %44 : vector<1x1x32xf32> to vector<32xf32>
    %46 = vector.shape_cast %45 : vector<32xf32> to vector<1x1x1x32xf32>
    %47 = vector.broadcast %46 : vector<1x1x1x32xf32> to vector<1x16x16x32xf32>
    %48 = arith.mulf %43, %47 : vector<1x16x16x32xf32>
    %49 = arith.addf %42, %48 : vector<1x16x16x32xf32>
    %50 = vector.extract_strided_slice %19 {offsets = [0, 1, 1, 0], sizes = [1, 16, 16, 32], strides = [1, 1, 1, 1]} : vector<1x18x18x32xf32> to vector<1x16x16x32xf32>
    %51 = vector.extract_strided_slice %20 {offsets = [1, 1, 0], sizes = [1, 1, 32], strides = [1, 1, 1]} : vector<3x3x32xf32> to vector<1x1x32xf32>
    %52 = vector.shape_cast %51 : vector<1x1x32xf32> to vector<32xf32>
    %53 = vector.shape_cast %52 : vector<32xf32> to vector<1x1x1x32xf32>
    %54 = vector.broadcast %53 : vector<1x1x1x32xf32> to vector<1x16x16x32xf32>
    %55 = arith.mulf %50, %54 : vector<1x16x16x32xf32>
    %56 = arith.addf %49, %55 : vector<1x16x16x32xf32>
    %57 = vector.extract_strided_slice %19 {offsets = [0, 1, 2, 0], sizes = [1, 16, 16, 32], strides = [1, 1, 1, 1]} : vector<1x18x18x32xf32> to vector<1x16x16x32xf32>
    %58 = vector.extract_strided_slice %20 {offsets = [1, 2, 0], sizes = [1, 1, 32], strides = [1, 1, 1]} : vector<3x3x32xf32> to vector<1x1x32xf32>
    %59 = vector.shape_cast %58 : vector<1x1x32xf32> to vector<32xf32>
    %60 = vector.shape_cast %59 : vector<32xf32> to vector<1x1x1x32xf32>
    %61 = vector.broadcast %60 : vector<1x1x1x32xf32> to vector<1x16x16x32xf32>
    %62 = arith.mulf %57, %61 : vector<1x16x16x32xf32>
    %63 = arith.addf %56, %62 : vector<1x16x16x32xf32>
    %64 = vector.extract_strided_slice %19 {offsets = [0, 2, 0, 0], sizes = [1, 16, 16, 32], strides = [1, 1, 1, 1]} : vector<1x18x18x32xf32> to vector<1x16x16x32xf32>
    %65 = vector.extract_strided_slice %20 {offsets = [2, 0, 0], sizes = [1, 1, 32], strides = [1, 1, 1]} : vector<3x3x32xf32> to vector<1x1x32xf32>
    %66 = vector.shape_cast %65 : vector<1x1x32xf32> to vector<32xf32>
    %67 = vector.shape_cast %66 : vector<32xf32> to vector<1x1x1x32xf32>
    %68 = vector.broadcast %67 : vector<1x1x1x32xf32> to vector<1x16x16x32xf32>
    %69 = arith.mulf %64, %68 : vector<1x16x16x32xf32>
    %70 = arith.addf %63, %69 : vector<1x16x16x32xf32>
    %71 = vector.extract_strided_slice %19 {offsets = [0, 2, 1, 0], sizes = [1, 16, 16, 32], strides = [1, 1, 1, 1]} : vector<1x18x18x32xf32> to vector<1x16x16x32xf32>
    %72 = vector.extract_strided_slice %20 {offsets = [2, 1, 0], sizes = [1, 1, 32], strides = [1, 1, 1]} : vector<3x3x32xf32> to vector<1x1x32xf32>
    %73 = vector.shape_cast %72 : vector<1x1x32xf32> to vector<32xf32>
    %74 = vector.shape_cast %73 : vector<32xf32> to vector<1x1x1x32xf32>
    %75 = vector.broadcast %74 : vector<1x1x1x32xf32> to vector<1x16x16x32xf32>
    %76 = arith.mulf %71, %75 : vector<1x16x16x32xf32>
    %77 = arith.addf %70, %76 : vector<1x16x16x32xf32>
    %78 = vector.extract_strided_slice %19 {offsets = [0, 2, 2, 0], sizes = [1, 16, 16, 32], strides = [1, 1, 1, 1]} : vector<1x18x18x32xf32> to vector<1x16x16x32xf32>
    %79 = vector.extract_strided_slice %20 {offsets = [2, 2, 0], sizes = [1, 1, 32], strides = [1, 1, 1]} : vector<3x3x32xf32> to vector<1x1x32xf32>
    %80 = vector.shape_cast %79 : vector<1x1x32xf32> to vector<32xf32>
    %81 = vector.shape_cast %80 : vector<32xf32> to vector<1x1x1x32xf32>
    %82 = vector.broadcast %81 : vector<1x1x1x32xf32> to vector<1x16x16x32xf32>
    %83 = arith.mulf %78, %82 : vector<1x16x16x32xf32>
    %84 = arith.addf %77, %83 : vector<1x16x16x32xf32>
    %c0_27 = arith.constant 0 : index
    %c0_28 = arith.constant 0 : index
    %85 = vector.load %arg6[%c0_27, %c0_28] : memref<1x32xf32, #tpu.memory_space<vmem>>, vector<1x32xf32>
    %86 = vector.shape_cast %85 : vector<1x32xf32> to vector<1x1x1x32xf32>
    %87 = vector.broadcast %86 : vector<1x1x1x32xf32> to vector<1x16x16x32xf32>
    %88 = arith.mulf %84, %87 : vector<1x16x16x32xf32>
    %c0_29 = arith.constant 0 : index
    %c0_30 = arith.constant 0 : index
    %89 = vector.load %arg7[%c0_29, %c0_30] : memref<1x32xf32, #tpu.memory_space<vmem>>, vector<1x32xf32>
    %90 = vector.shape_cast %89 : vector<1x32xf32> to vector<1x1x1x32xf32>
    %91 = vector.broadcast %90 : vector<1x1x1x32xf32> to vector<1x16x16x32xf32>
    %92 = arith.addf %88, %91 : vector<1x16x16x32xf32>
    %cst_31 = arith.constant 0.000000e+00 : f32
    %cst_32 = arith.constant 6.000000e+00 : f32
    %93 = vector.broadcast %cst_31 : f32 to vector<1x16x16x32xf32>
    %94 = arith.maximumf %93, %92 : vector<1x16x16x32xf32>
    %95 = vector.broadcast %cst_32 : f32 to vector<1x16x16x32xf32>
    %96 = arith.minimumf %95, %94 : vector<1x16x16x32xf32>
    %c0_33 = arith.constant 0 : index
    %c0_34 = arith.constant 0 : index
    %c0_35 = arith.constant 0 : index
    %c0_36 = arith.constant 0 : index
    %97 = vector.load %arg8[%c0_33, %c0_34, %c0_35, %c0_36] : memref<1x16x16x32xf32, #tpu.memory_space<vmem>>, vector<1x16x16x32xf32>
    tpu.vector_store %arg8[%c0_33, %c0_34, %c0_35, %c0_36], %96 {strides = array<i32>} : memref<1x16x16x32xf32, #tpu.memory_space<vmem>>, vector<1x16x16x32xf32>,
    %98 = vector.shape_cast %96 : vector<1x16x16x32xf32> to vector<256x32xf32>
    %cst_37 = arith.constant dense<0.000000e+00> : vector<32xf32>
    %99 = vector.multi_reduction <add>, %98, %cst_37 [0] : vector<256x32xf32> to vector<32xf32>
    %100 = vector.shape_cast %99 : vector<32xf32> to vector<1x32xf32>
    %cst_38 = arith.constant 3.906250e-03 : f32
    %101 = vector.broadcast %cst_38 : f32 to vector<1x32xf32>
    %102 = arith.mulf %100, %101 : vector<1x32xf32>
    %103 = vector.shape_cast %102 : vector<1x32xf32> to vector<1x1x32xf32>
    %c0_39 = arith.constant 0 : index
    %c0_40 = arith.constant 0 : index
    %c0_41 = arith.constant 0 : index
    %104 = vector.load %arg9[%c0_39, %c0_40, %c0_41] : memref<1x1x32xf32, #tpu.memory_space<vmem>>, vector<1x1x32xf32>
    tpu.vector_store %arg9[%c0_39, %c0_40, %c0_41], %103 {strides = array<i32>} : memref<1x1x32xf32, #tpu.memory_space<vmem>>, vector<1x1x32xf32>,
    return
  }
  func.func @transform_0(%arg0: i32) -> (i32, i32, i32, i32) {
    %c0_i32 = arith.constant 0 : i32
    %c0_i32_0 = arith.constant 0 : i32
    %c0_i32_1 = arith.constant 0 : i32
    %c0_i32_2 = arith.constant 0 : i32
    return %arg0, %c0_i32, %c0_i32_0, %c0_i32_1 : i32, i32, i32, i32
  }
  func.func @transform_1(%arg0: i32) -> (i32, i32) {
    %c0_i32 = arith.constant 0 : i32
    %c0_i32_0 = arith.constant 0 : i32
    %c0_i32_1 = arith.constant 0 : i32
    return %c0_i32, %c0_i32_0 : i32, i32
  }
  func.func @transform_2(%arg0: i32) -> (i32, i32) {
    %c0_i32 = arith.constant 0 : i32
    %c0_i32_0 = arith.constant 0 : i32
    %c0_i32_1 = arith.constant 0 : i32
    return %c0_i32, %c0_i32_0 : i32, i32
  }
  func.func @transform_3(%arg0: i32) -> (i32, i32) {
    %c0_i32 = arith.constant 0 : i32
    %c0_i32_0 = arith.constant 0 : i32
    %c0_i32_1 = arith.constant 0 : i32
    return %c0_i32, %c0_i32_0 : i32, i32
  }
  func.func @transform_4(%arg0: i32) -> (i32, i32, i32) {
    %c0_i32 = arith.constant 0 : i32
    %c0_i32_0 = arith.constant 0 : i32
    %c0_i32_1 = arith.constant 0 : i32
    %c0_i32_2 = arith.constant 0 : i32
    return %c0_i32, %c0_i32_0, %c0_i32_1 : i32, i32, i32
  }
  func.func @transform_5(%arg0: i32) -> (i32, i32) {
    %c0_i32 = arith.constant 0 : i32
    %c0_i32_0 = arith.constant 0 : i32
    %c0_i32_1 = arith.constant 0 : i32
    return %c0_i32, %c0_i32_0 : i32, i32
  }
  func.func @transform_6(%arg0: i32) -> (i32, i32) {
    %c0_i32 = arith.constant 0 : i32
    %c0_i32_0 = arith.constant 0 : i32
    %c0_i32_1 = arith.constant 0 : i32
    return %c0_i32, %c0_i32_0 : i32, i32
  }
  func.func @transform_7(%arg0: i32) -> (i32, i32, i32, i32) {
    %c0_i32 = arith.constant 0 : i32
    %c0_i32_0 = arith.constant 0 : i32
    %c0_i32_1 = arith.constant 0 : i32
    %c0_i32_2 = arith.constant 0 : i32
    return %arg0, %c0_i32, %c0_i32_0, %c0_i32_1 : i32, i32, i32, i32
  }
  func.func @transform_8(%arg0: i32) -> (i32, i32, i32) {
    %c0_i32 = arith.constant 0 : i32
    %c0_i32_0 = arith.constant 0 : i32
    %c0_i32_1 = arith.constant 0 : i32
    return %arg0, %c0_i32, %c0_i32_0 : i32, i32, i32
  }
}

</mosaic_0001>

<bundles_post_ra>
// kernel: tpu_custom_call.1
= control target key start
LH: loop header
LB: loop body
LE: loop exit
PB: predicated region body
PF: predicated region fallthrough
CT: control target
= control target key end

     0   :  { %14 = vsyncpa [#allocation4], 0  ;;  %s5411_s0 = inlined_call_operand.vmem [shape: f32[2,16,16,8], index: 0, kind: input, shape index: {}]   ;;  %s5412_s1 = inlined_call_operand.vmem [shape: bf16[8,32], index: 1, kind: input, shape index: {}]   ;;  %s5413_s2 = inlined_call_operand.vmem [shape: f32[1,32], index: 2, kind: input, shape index: {}]   ;;  %s5414_s3 = inlined_call_operand.vmem [shape: f32[1,32], index: 3, kind: input, shape index: {}]   ;;  %s5415_s4 = inlined_call_operand.vmem [shape: f32[3,3,32], index: 4, kind: input, shape index: {}]   ;;  %s5416_s5 = inlined_call_operand.vmem [shape: f32[1,32], index: 5, kind: input, shape index: {}]   ;;  %s5417_s6 = inlined_call_operand.vmem [shape: f32[1,32], index: 6, kind: input, shape index: {}]   ;;  %s5418_s7 = inlined_call_operand.hbm [shape: f32[2,16,16,32], index: 7, kind: output, shape index: {0}]   ;;  %s5419_s8 = inlined_call_operand.hbm [shape: f32[2,1,32], index: 8, kind: output, shape index: {1}]  }
   0x1   :  { %16 = vsyncpa [#allocation4 + $0x1], 0 }
   0x2   :  { %17 = vsyncpa [#allocation6], 0 }
   0x3   :  { %19 = vsyncpa [#allocation6 + $0x1], 0  ;;  %s3033_s27 = smov 0   ;;  %s3035_s28 = smov 0  }
   0x4   :  { %s3037_s29 = smov 0   ;;  %s3039_s30 = smov 0  }
   0x5 LB: > { %s3054_s9 = sadd.s32 4294967295, %s2983_s30   ;;  %s2794_s10 = sadd.s32 4294967294, %s2983_s30   ;;  %s2983_s30 = sphi %s3039_s30, %s5674_s30   ;;  %s2979_s29 = sphi %s3037_s29, %s5673_s29   ;;  %s2975_s28 = sphi %s3035_s28, %s5672_s28   ;;  %s2971_s27 = sphi %s3033_s27, %s5671_s27  }
   0x6   : > { %s3058_s11 = sadd.s32 1, %s2983_s30   ;;  %s184_s12 = sadd.s32 1, %s2979_s29 }
   0x7   : > { %s181_s13 = ssub.s32 %s2983_s30, %s3058_s11  ;;  %p194_p0 = scmp.ne.s32.totalorder %s2979_s29, %s2975_s28 }
   0x8   : > { %p182_p1 = scmp.eq.s32.totalorder %s181_s13, 0  ;;  %p195_p2 = scmp.eq.s32.totalorder %s3054_s9, 1 }
   0x9   : > { %p200_p3 = scmp.ne.s32.totalorder %s2975_s28, %s2971_s27  ;;  %p201_p4 = scmp.eq.s32.totalorder %s2794_s10, 1 }
   0xa   : > { %s3069_s14 = scalar_select %p182_p1, %s2979_s29, %s184_s12  }
   0xb   : > { %p3071_p5 = por %p195_p2, %p194_p0  ;;  %p3075_p6 = por %p201_p4, %p200_p3 }
   0xc   : > { %p2797_p7 = scmp.ge.s32.totalorder %s2983_s30, 1  ;;  %p271_p8 = scmp.lt.s32.totalorder %s2983_s30, 3 }
   0xe   : > { %p272_p9 = pnand %p2797_p7, %p271_p8 }
  0x10   : > { %275 = sbr.rel (%p272_p9) target bundleno = 588 (0x24c), region = 48 }
  0x15   : > { %v363_v0 = vld [vmem:[%s5412_s1] sm:$0xf]  ;;  %vm413_vm0 = vcmask 1043456   ;;  %p309_p10 = scmp.lt.s32.totalorder %s3054_s9, 1  ;;  %vm364_vm1 = vcmask 64512   ;;  %vm642_vm2 = vcmask 261120  }
  0x16   : > { %v415_v1 = vsel %vm413_vm0, %v363_v0, 0  ;;  %v2985_v50 = vmov 0.0   ;;  %v3194_v51 = vld [vmem:[%s5413_s2] ss:$0 sm:$0xff]  ;;  %vm645_vm3 = vcmask 254976   ;;  %vm950_vm4 = vcmask 1046528  }
  0x17   : > { %424 = vmatpush.bf16.msra.mxu0 %v415_v1  ;;  %2824 = vmatpush.bf16.msra.mxu1 %v415_v1  ;;  %s310_s19 = scalar_select %p309_p10, %s3054_s9, 1  ;;  %643 = vst.msk [vmem:[#allocation2] sm:$0xff] %vm642_vm2, %v2985_v50  ;;  %v3203_v52 = vld [vmem:[%s5414_s3] ss:$0 sm:$0xff]  ;;  %vm1192_vm5 = vcmask 1045504  }
  0x18   : > { %2825 = vmatpush.bf16.msra.mxu2 %v415_v1  ;;  %2826 = vmatpush.bf16.msra.mxu3 %v415_v1  ;;  %644 = vst.msk [vmem:[#allocation2 + $0x8] sm:$0xff] %vm642_vm2, %v2985_v50  ;;  %s3642_s25 = sand.u32 1, %s2975_s28   ;;  %s2823_s18 = sshll.u32 %s3054_s9, 8 }
  0x19   : > { %s2822_s20 = sshll.u32 %s310_s19, 8  ;;  %647 = vst.msk [vmem:[#allocation2 + $0x18] sm:$0xff] %vm642_vm2, %v2985_v50  ;;  %s2798_s26 = sshll.u32 %s3642_s25, 8 }
  0x1a   : > { %s3089_s23 = scalar_lea.vmem %s5411_s0, %s2822_s20  ;;  %648 = vst.msk [vmem:[#allocation2 + $0x20] sm:$0xff] %vm642_vm2, %v2985_v50  ;;  %s3734_s10 = scalar_lea.vmem [#allocation3], %s2798_s26 }
  0x1b   : > { %v315_v2 = vld [vmem:[%s3089_s23] sm:$0xff]  ;;  %v316_v3 = vld [vmem:[%s3089_s23 + $0x8] sm:$0xff]  ;;  %v317_v14 = vld [vmem:[%s3089_s23 + $0x10] sm:$0xff]  ;;  %650 = vst.msk [vmem:[#allocation2 + $0x30] sm:$0xff] %vm642_vm2, %v2985_v50  ;;  %s2688_s24 = sshll.u32 %s3734_s10, 4  ;;  %s2672_s12 = scalar_lea.sflag [#allocation4], %s3642_s25  ;;  %s2689_s24 = int_to_ptr.vmem [resolvable:$true] %s2688_s24 }
  0x1c   : > { %v323_v4 = vld [vmem:[%s3089_s23 + $0x40] sm:$0xff]  ;;  %v347_v5 = vpack.c.bf16 %v316_v3, %v315_v2  ;;  %v324_v6 = vld [vmem:[%s3089_s23 + $0x48] sm:$0xff]  ;;  %v318_v15 = vld [vmem:[%s3089_s23 + $0x18] sm:$0xff]  ;;  %651 = vst.msk [vmem:[#allocation2 + $0x38] sm:$0xff] %vm642_vm2, %v2985_v50  ;;  %s2909_s20 = scalar_lea.hbm %s5418_s7, 512 }
  0x1d   : > { %v331_v7 = vld [vmem:[%s3089_s23 + $0x80] sm:$0xff]  ;;  %v332_v8 = vld [vmem:[%s3089_s23 + $0x88] sm:$0xff]  ;;  %v351_v9 = vpack.c.bf16 %v324_v6, %v323_v4  ;;  %v325_v16 = vld [vmem:[%s3089_s23 + $0x50] sm:$0xff]  ;;  %v348_v22 = vpack.c.bf16 %v318_v15, %v317_v14  ;;  %653 = vst.msk [vmem:[#allocation2 + $0x48] sm:$0xff] %vm642_vm2, %v2985_v50 }
  0x1e   : > { %v355_v10 = vpack.c.bf16 %v332_v8, %v331_v7  ;;  %v339_v11 = vld [vmem:[%s3089_s23 + $0xc0] sm:$0xff]  ;;  %v340_v12 = vld [vmem:[%s3089_s23 + $0xc8] sm:$0xff]  ;;  %2801 = vmatmul.msk.bf16.vlgmr.msra.gmra.mxu0 %vm364_vm1, %v347_v5  ;;  %v326_v17 = vld [vmem:[%s3089_s23 + $0x58] sm:$0xff]  ;;  %654 = vst.msk [vmem:[#allocation2 + $0x50] sm:$0xff] %vm642_vm2, %v2985_v50 }
  0x1f   : > { %v359_v13 = vpack.c.bf16 %v340_v12, %v339_v11  ;;  %2805 = vmatmul.msk.bf16.vlgmr.msra.gmra.mxu1 %vm364_vm1, %v351_v9  ;;  %v333_v18 = vld [vmem:[%s3089_s23 + $0x90] sm:$0xff]  ;;  %v334_v19 = vld [vmem:[%s3089_s23 + $0x98] sm:$0xff]  ;;  %v352_v23 = vpack.c.bf16 %v326_v17, %v325_v16  ;;  %v319_v26 = vld [vmem:[%s3089_s23 + $0x20] sm:$0xff]  ;;  %656 = vst.msk [vmem:[#allocation2 + $0x60] sm:$0xff] %vm642_vm2, %v2985_v50 }
  0x20   : > { %2809 = vmatmul.msk.bf16.vlgmr.msra.gmra.mxu2 %vm364_vm1, %v355_v10  ;;  %v341_v20 = vld [vmem:[%s3089_s23 + $0xd0] sm:$0xff]  ;;  %v342_v21 = vld [vmem:[%s3089_s23 + $0xd8] sm:$0xff]  ;;  %v356_v24 = vpack.c.bf16 %v334_v19, %v333_v18  ;;  %v320_v27 = vld [vmem:[%s3089_s23 + $0x28] sm:$0xff]  ;;  %657 = vst.msk [vmem:[#allocation2 + $0x68] sm:$0xff] %vm642_vm2, %v2985_v50 }
  0x21   : > { %2813 = vmatmul.msk.bf16.vlgmr.msra.gmra.mxu3 %vm364_vm1, %v359_v13  ;;  %v360_v25 = vpack.c.bf16 %v342_v21, %v341_v20  ;;  %v327_v28 = vld [vmem:[%s3089_s23 + $0x60] sm:$0xff]  ;;  %v328_v29 = vld [vmem:[%s3089_s23 + $0x68] sm:$0xff]  ;;  %v349_v34 = vpack.c.bf16 %v320_v27, %v319_v26  ;;  %v321_v38 = vld [vmem:[%s3089_s23 + $0x30] sm:$0xff]  ;;  %659 = vst.msk [vmem:[#allocation2 + $0x78] sm:$0xff] %vm642_vm2, %v2985_v50 }
  0x22   : > { %v335_v30 = vld [vmem:[%s3089_s23 + $0xa0] sm:$0xff]  ;;  %v336_v31 = vld [vmem:[%s3089_s23 + $0xa8] sm:$0xff]  ;;  %v353_v35 = vpack.c.bf16 %v328_v29, %v327_v28  ;;  %v322_v39 = vld [vmem:[%s3089_s23 + $0x38] sm:$0xff]  ;;  %660 = vst.msk [vmem:[#allocation2 + $0x80] sm:$0xff] %vm642_vm2, %v2985_v50 }
  0x23   : > { %v343_v32 = vld [vmem:[%s3089_s23 + $0xe0] sm:$0xff]  ;;  %v344_v33 = vld [vmem:[%s3089_s23 + $0xe8] sm:$0xff]  ;;  %v357_v36 = vpack.c.bf16 %v336_v31, %v335_v30  ;;  %v329_v40 = vld [vmem:[%s3089_s23 + $0x70] sm:$0xff]  ;;  %v350_v46 = vpack.c.bf16 %v322_v39, %v321_v38  ;;  %662 = vst.msk [vmem:[#allocation2 + $0x90] sm:$0xff] %vm642_vm2, %v2985_v50 }
  0x24   : > { %v361_v37 = vpack.c.bf16 %v344_v33, %v343_v32  ;;  %v330_v41 = vld [vmem:[%s3089_s23 + $0x78] sm:$0xff]  ;;  %v337_v42 = vld [vmem:[%s3089_s23 + $0xb0] sm:$0xff]  ;;  %663 = vst.msk [vmem:[#allocation2 + $0x98] sm:$0xff] %vm642_vm2, %v2985_v50  ;;  %v785_v14 = vld [vmem:[%s5415_s4] sm:$0x7] }
  0x25   : > { %v338_v43 = vld [vmem:[%s3089_s23 + $0xb8] sm:$0xff]  ;;  %v345_v44 = vld [vmem:[%s3089_s23 + $0xf0] sm:$0xff]  ;;  %v354_v47 = vpack.c.bf16 %v330_v41, %v329_v40  ;;  %665 = vst.msk [vmem:[#allocation2 + $0xa8] sm:$0xff] %vm642_vm2, %v2985_v50  ;;  %v3266_v16 = vperm.slane %v785_v14, 1  ;;  %v3269_v17 = vperm.slane %v785_v14, 2  ;;  %v731_v31 = vld [vmem:[#allocation2] sm:$0xff] }
  0x26   : > { %v346_v45 = vld [vmem:[%s3089_s23 + $0xf8] sm:$0xff]  ;;  %v358_v48 = vpack.c.bf16 %v338_v43, %v337_v42  ;;  %666 = vst.msk [vmem:[#allocation2 + $0xb0] sm:$0xff] %vm642_vm2, %v2985_v50  ;;  %v732_v32 = vld [vmem:[#allocation2 + $0x8] sm:$0xff]  ;;  %s2687_s23 = scalar_lea.hbm %s5418_s7, %s2823_s18 }
  0x27   : > { %v362_v49 = vpack.c.bf16 %v346_v45, %v345_v44  ;;  %668 = vst.msk [vmem:[#allocation2 + $0xc0] sm:$0xff] %vm642_vm2, %v2985_v50  ;;  %v854_v43 = vmul.f32 %v3266_v16, %v731_v31  ;;  %v3309_v44 = vmul.f32 %v3266_v16, %v732_v32  ;;  %s2690_s26 = sshll.u32 %s2687_s23, 4  ;;  %s2691_s26 = int_to_ptr.hbm [resolvable:$true] %s2690_s26 }
  0x28   : > { %669 = vst.msk [vmem:[#allocation2 + $0xc8] sm:$0xff] %vm642_vm2, %v2985_v50  ;;  %s2903_s13 = sshra.s32 %s2691_s26, 4  ;;  %s2904_s13 = int_to_ptr.hbm [resolvable:$true] %s2903_s13 }
  0x29   : > { %671 = vst.msk [vmem:[#allocation2 + $0xd8] sm:$0xff] %vm642_vm2, %v2985_v50  ;;  %s2905_s17 = scalar_lea.hbm %s2904_s13, 256  ;;  %p2910_p0 = scmp.lt.s32.totalorder %s2904_s13, %s5418_s7 }
  0x2a   : > { %672 = vst.msk [vmem:[#allocation2 + $0xe0] sm:$0xff] %vm642_vm2, %v2985_v50  ;;  %p2906_p11 = scmp.ne.s32.totalorder %s2904_s13, %s2905_s17  ;;  %p2911_p1 = scmp.lt.s32.totalorder %s2909_s20, %s2905_s17 }
  0x2b   : > { %674 = vst.msk [vmem:[#allocation2 + $0xf0] sm:$0xff] %vm642_vm2, %v2985_v50 }
  0x2c   : > { %675 = vst.msk [vmem:[#allocation2 + $0xf8] sm:$0xff] %vm642_vm2, %v2985_v50  ;;  %p2907_p12 = pnand %p2906_p11, %p3071_p5  ;;  %p2912_p2 = por %p2911_p1, %p2910_p0 }
  0x2d   : > { %677 = vst.msk [vmem:[#allocation2 + $0x108] sm:$0xff] %vm642_vm2, %v2985_v50 }
  0x2e   : > { %2802 = vmatmul.msk.bf16.gmra.mxu0 %vm364_vm1, %v348_v22  ;;  %678 = vst.msk [vmem:[#allocation2 + $0x110] sm:$0xff] %vm642_vm2, %v2985_v50  ;;  %v3285_v22 = vperm.slane %v785_v14, 0  ;;  %p2908_p13 = pneg %p2907_p12 }
  0x2f   : > { %2806 = vmatmul.msk.bf16.gmra.mxu1 %vm364_vm1, %v352_v23  ;;  %680 = vst.msk [vmem:[#allocation2 + $0x120] sm:$0xff] %vm642_vm2, %v2985_v50 }
  0x30   : > { %2810 = vmatmul.msk.bf16.gmra.mxu2 %vm364_vm1, %v356_v24  ;;  %681 = vst.msk [vmem:[#allocation2 + $0x128] sm:$0xff] %vm642_vm2, %v2985_v50  ;;  %p2913_p3 = pnand %p2912_p2, %p2908_p13 }
  0x31   : > { %2814 = vmatmul.msk.bf16.gmra.mxu3 %vm364_vm1, %v360_v25  ;;  %683 = vst.msk [vmem:[#allocation2 + $0x138] sm:$0xff] %vm642_vm2, %v2985_v50 }
  0x32   : > { %684 = vst.msk [vmem:[#allocation2 + $0x140] sm:$0xff] %vm642_vm2, %v2985_v50 }
  0x33   : > { %686 = vst.msk [vmem:[#allocation2 + $0x150] sm:$0xff] %vm642_vm2, %v2985_v50 }
  0x34   : > { %687 = vst.msk [vmem:[#allocation2 + $0x158] sm:$0xff] %vm642_vm2, %v2985_v50 }
  0x35   : > { %689 = vst.msk [vmem:[#allocation2 + $0x168] sm:$0xff] %vm642_vm2, %v2985_v50 }
  0x36   : > { %690 = vst.msk [vmem:[#allocation2 + $0x170] sm:$0xff] %vm642_vm2, %v2985_v50 }
  0x37   : > { %692 = vst.msk [vmem:[#allocation2 + $0x180] sm:$0xff] %vm642_vm2, %v2985_v50 }
  0x38   : > { %693 = vst.msk [vmem:[#allocation2 + $0x188] sm:$0xff] %vm642_vm2, %v2985_v50 }
  0x39   : > { %695 = vst.msk [vmem:[#allocation2 + $0x198] sm:$0xff] %vm642_vm2, %v2985_v50 }
  0x3a   : > { %696 = vst.msk [vmem:[#allocation2 + $0x1a0] sm:$0xff] %vm642_vm2, %v2985_v50 }
  0x3b   : > { %646 = vst.msk [vmem:[#allocation2 + $0x10] sm:$0x3] %vm645_vm3, %v2985_v50 }
  0x3c   : > { %649 = vst.msk [vmem:[#allocation2 + $0x28] sm:$0x3] %vm645_vm3, %v2985_v50 }
  0x3d   : > { %652 = vst.msk [vmem:[#allocation2 + $0x40] sm:$0x3] %vm645_vm3, %v2985_v50 }
  0x3e   : > { %2803 = vmatmul.msk.bf16.gmra.mxu0 %vm364_vm1, %v349_v34  ;;  %655 = vst.msk [vmem:[#allocation2 + $0x58] sm:$0x3] %vm645_vm3, %v2985_v50 }
  0x3f   : > { %2807 = vmatmul.msk.bf16.gmra.mxu1 %vm364_vm1, %v353_v35  ;;  %658 = vst.msk [vmem:[#allocation2 + $0x70] sm:$0x3] %vm645_vm3, %v2985_v50 }
  0x40   : > { %2811 = vmatmul.msk.bf16.gmra.mxu2 %vm364_vm1, %v357_v36  ;;  %661 = vst.msk [vmem:[#allocation2 + $0x88] sm:$0x3] %vm645_vm3, %v2985_v50 }
  0x41   : > { %2815 = vmatmul.msk.bf16.gmra.mxu3 %vm364_vm1, %v361_v37  ;;  %664 = vst.msk [vmem:[#allocation2 + $0xa0] sm:$0x3] %vm645_vm3, %v2985_v50 }
  0x42   : > { %667 = vst.msk [vmem:[#allocation2 + $0xb8] sm:$0x3] %vm645_vm3, %v2985_v50 }
  0x43   : > { %670 = vst.msk [vmem:[#allocation2 + $0xd0] sm:$0x3] %vm645_vm3, %v2985_v50 }
  0x44   : > { %673 = vst.msk [vmem:[#allocation2 + $0xe8] sm:$0x3] %vm645_vm3, %v2985_v50 }
  0x45   : > { %676 = vst.msk [vmem:[#allocation2 + $0x100] sm:$0x3] %vm645_vm3, %v2985_v50 }
  0x46   : > { %679 = vst.msk [vmem:[#allocation2 + $0x118] sm:$0x3] %vm645_vm3, %v2985_v50 }
  0x47   : > { %682 = vst.msk [vmem:[#allocation2 + $0x130] sm:$0x3] %vm645_vm3, %v2985_v50 }
  0x48   : > { %685 = vst.msk [vmem:[#allocation2 + $0x148] sm:$0x3] %vm645_vm3, %v2985_v50 }
  0x49   : > { %688 = vst.msk [vmem:[#allocation2 + $0x160] sm:$0x3] %vm645_vm3, %v2985_v50 }
  0x4a   : > { %691 = vst.msk [vmem:[#allocation2 + $0x178] sm:$0x3] %vm645_vm3, %v2985_v50 }
  0x4b   : > { %694 = vst.msk [vmem:[#allocation2 + $0x190] sm:$0x3] %vm645_vm3, %v2985_v50 }
  0x4c   : > { %697 = vst.msk [vmem:[#allocation2 + $0x1a8] sm:$0x3] %vm645_vm3, %v2985_v50 }
  0x4e   : > { %2804 = vmatmul.msk.bf16.gmra.mxu0 %vm364_vm1, %v350_v46 }
  0x4f   : > { %2808 = vmatmul.msk.bf16.gmra.mxu1 %vm364_vm1, %v354_v47 }
  0x50   : > { %2812 = vmatmul.msk.bf16.gmra.mxu2 %vm364_vm1, %v358_v48  ;;  %v1096_v48 = vmul.f32 %v3269_v17, %v731_v31 }
  0x51   : > { %2816 = vmatmul.msk.bf16.gmra.mxu3 %vm364_vm1, %v362_v49 }
  0x9b   : > { %v426_v53 = vpop.f32.mrf.mxu0 }
  0x9c   : > { %v510_v54 = vmul.f32 %v3194_v51, %v426_v53  ;;  %v446_v55 = vpop.f32.mrf.mxu1  ;;  %v951_v53 = vrot.slane %v854_v43, 1 }
  0x9d   : > { %v518_v56 = vmul.f32 %v3194_v51, %v446_v55  ;;  %v3318_v55 = vmul.f32 %v3269_v17, %v732_v32 }
  0x9e   : > { %v546_v57 = vadd.f32 %v3203_v52, %v510_v54  ;;  %v952_v54 = vrot.slane %v3309_v44, 1 }
  0x9f   : > { %v554_v58 = vadd.f32 %v3203_v52, %v518_v56 }
  0xa0   : > { %v578_v59 = vmax.f32 %v546_v57, 0.0  ;;  %v789_v57 = vmul.f32 %v3285_v22, %v731_v31  ;;  %v790_v31 = vmul.f32 %v3285_v22, %v732_v32 }
  0xa1   : > { %v586_v60 = vmax.f32 %v554_v58, 0.0  ;;  %v1193_v58 = vrot.slane %v1096_v48, 2 }
  0xa2   : > { %v610_v61 = vmin.f32 %v578_v59, 6.0  ;;  %v953_v59 = vsel %vm950_vm4, %v951_v53, %v952_v54 }
  0xa3   : > { %v466_v62 = vpop.f32.mrf.mxu2  ;;  %v618_v63 = vmin.f32 %v586_v60, 6.0  ;;  %v428_v1 = vpop.f32.mrf.mxu0  ;;  %v1194_v60 = vrot.slane %v3318_v55, 2 }
  0xa4   : > { %v526_v0 = vmul.f32 %v3194_v51, %v466_v62  ;;  %699 = vst.msk [vmem:[#allocation2 + $0x19] sm:$0xff] %vm642_vm2, %v610_v61  ;;  %v511_v2 = vmul.f32 %v3194_v51, %v428_v1  ;;  %v448_v3 = vpop.f32.mrf.mxu1  ;;  %v486_v14 = vpop.f32.mrf.mxu3 }
  0xa5   : > { %707 = vst.msk [vmem:[#allocation2 + $0x79] sm:$0xff] %vm642_vm2, %v618_v63  ;;  %v519_v5 = vmul.f32 %v3194_v51, %v448_v3  ;;  %v786_v63 = vld [vmem:[%s5415_s4 + $0x4] sm:$0x7]  ;;  %v1195_v1 = vsel %vm1192_vm5, %v1193_v58, %v1194_v60 }
  0xa6   : > { %v562_v4 = vadd.f32 %v3203_v52, %v526_v0  ;;  %v547_v6 = vadd.f32 %v3203_v52, %v511_v2  ;;  %v1063_v0 = vadd.f32 %v953_v59, %v789_v57  ;;  %v733_v2 = vld [vmem:[#allocation2 + $0x10] sm:$0x3] }
  0xa7   : > { %v555_v8 = vadd.f32 %v3203_v52, %v519_v5  ;;  %v3335_v5 = vperm.slane %v786_v63, 0 }
  0xa8   : > { %v594_v7 = vmax.f32 %v562_v4, 0.0  ;;  %v579_v9 = vmax.f32 %v547_v6, 0.0 }
  0xa9   : > { %v587_v12 = vmax.f32 %v555_v8, 0.0 }
  0xaa   : > { %v626_v10 = vmin.f32 %v594_v7, 6.0  ;;  %v611_v11 = vmin.f32 %v579_v9, 6.0  ;;  %v3338_v9 = vperm.slane %v786_v63, 1 }
  0xab   : > { %v619_v13 = vmin.f32 %v587_v12, 6.0  ;;  %v3262_v15 = vld [vmem:[#allocation2 + $0x18] sm:$0xff]  ;;  %v468_v47 = vpop.f32.mrf.mxu2  ;;  %v431_v49 = vpop.f32.mrf.mxu0 }
  0xac   : > { %715 = vst.msk [vmem:[#allocation2 + $0xd9] sm:$0xff] %vm642_vm2, %v626_v10  ;;  %v857_v20 = vmul.f32 %v3266_v16, %v3262_v15  ;;  %v1099_v21 = vmul.f32 %v3269_v17, %v3262_v15  ;;  %v791_v27 = vmul.f32 %v3285_v22, %v3262_v15  ;;  %v451_v50 = vpop.f32.mrf.mxu1  ;;  %v527_v56 = vmul.f32 %v3194_v51, %v468_v47 }
  0xad   : > { %700 = vst.msk [vmem:[#allocation2 + $0x21] sm:$0xff] %vm642_vm2, %v611_v11  ;;  %v512_v62 = vmul.f32 %v3194_v51, %v431_v49  ;;  %v520_v6 = vmul.f32 %v3194_v51, %v451_v50  ;;  %v3340_v10 = vperm.slane %v786_v63, 2  ;;  %v787_v11 = vld [vmem:[%s5415_s4 + $0x8] sm:$0x7]  ;;  %v1338_v32 = vmul.f32 %v3335_v5, %v3262_v15 }
  0xae   : > { %708 = vst.msk [vmem:[#allocation2 + $0x81] sm:$0xff] %vm642_vm2, %v619_v13  ;;  %v956_v28 = vrot.slane %v857_v20, 1  ;;  %v1198_v33 = vrot.slane %v1099_v21, 2  ;;  %v563_v61 = vadd.f32 %v3203_v52, %v527_v56  ;;  %v1305_v20 = vadd.f32 %v1195_v1, %v1063_v0 }
  0xaf   : > { %v548_v4 = vadd.f32 %v3203_v52, %v512_v62  ;;  %v856_v21 = vmul.f32 %v3266_v16, %v733_v2  ;;  %v3367_v50 = vmul.f32 %v3338_v9, %v3262_v15  ;;  %v3371_v53 = vmul.f32 %v3340_v10, %v3262_v15 }
  0xb0   : > { %v595_v3 = vmax.f32 %v563_v61, 0.0  ;;  %v3383_v0 = vperm.slane %v787_v11, 0 }
  0xb1   : > { %v580_v13 = vmax.f32 %v548_v4, 0.0  ;;  %v1499_v44 = vrot.slane %v3367_v50, 1 }
  0xb2   : > { %v627_v12 = vmin.f32 %v595_v3, 6.0 }
  0xb3   : > { %v433_v7 = vpop.f32.mrf.mxu0 }
  0xb4   : > { %v3271_v18 = vld [vmem:[#allocation2 + $0x20] sm:$0xff]  ;;  %v3273_v19 = vld [vmem:[#allocation2 + $0x28] sm:$0x3]  ;;  %v453_v8 = vpop.f32.mrf.mxu1  ;;  %716 = vst.msk [vmem:[#allocation2 + $0xe1] sm:$0xff] %vm642_vm2, %v627_v12 }
  0xb5   : > { %v858_v23 = vmul.f32 %v3266_v16, %v3271_v18  ;;  %v859_v24 = vmul.f32 %v3266_v16, %v3273_v19  ;;  %v1100_v25 = vmul.f32 %v3269_v17, %v3271_v18  ;;  %v1101_v26 = vmul.f32 %v3269_v17, %v3273_v19  ;;  %v3407_v12 = vld [vmem:[#allocation2 + $0x88] sm:$0x3] }
  0xb6   : > { %v792_v34 = vmul.f32 %v3285_v22, %v3271_v18 }
  0xb7   : > { %v957_v29 = vrot.slane %v858_v23, 1  ;;  %v959_v30 = vrot.slane %v859_v24, 1  ;;  %v1199_v35 = vrot.slane %v1100_v25, 2  ;;  %v1201_v36 = vrot.slane %v1101_v26, 2  ;;  %v471_v25 = vpop.f32.mrf.mxu2 }
  0xb8   : > { %v556_v23 = vadd.f32 %v3203_v52, %v520_v6  ;;  %v534_v24 = vmul.f32 %v3194_v51, %v486_v14  ;;  %v612_v26 = vmin.f32 %v580_v13, 6.0 }
  0xb9   : > { %v958_v37 = vsel %vm950_vm4, %v956_v28, %v957_v29  ;;  %v960_v38 = vsel %vm950_vm4, %v957_v29, %v959_v30  ;;  %v1200_v41 = vsel %vm1192_vm5, %v1198_v33, %v1199_v35  ;;  %v1202_v42 = vsel %vm1192_vm5, %v1199_v35, %v1201_v36  ;;  %v746_v35 = vld [vmem:[#allocation2 + $0x78] sm:$0xff] }
  0xba   : > { %v1065_v39 = vadd.f32 %v958_v37, %v791_v27  ;;  %v1066_v40 = vadd.f32 %v960_v38, %v792_v34  ;;  %v528_v27 = vmul.f32 %v3194_v51, %v471_v25  ;;  %v513_v28 = vmul.f32 %v3194_v51, %v433_v7  ;;  %701 = vst.msk [vmem:[#allocation2 + $0x31] sm:$0xff] %vm642_vm2, %v612_v26  ;;  %v3398_v7 = vld [vmem:[#allocation2 + $0x80] sm:$0xff] }
  0xbb   : > { %v521_v29 = vmul.f32 %v3194_v51, %v453_v8  ;;  %v3352_v30 = vperm.slane %v787_v11, 1  ;;  %v588_v33 = vmax.f32 %v556_v23, 0.0  ;;  %v570_v34 = vadd.f32 %v3203_v52, %v534_v24 }
  0xbc   : > { %v3311_v45 = vadd.f32 %v1200_v41, %v1065_v39  ;;  %v3313_v46 = vadd.f32 %v1202_v42, %v1066_v40  ;;  %v3356_v36 = vperm.slane %v787_v11, 2  ;;  %v564_v37 = vadd.f32 %v3203_v52, %v528_v27 }
  0xbd   : > { %v549_v38 = vadd.f32 %v3203_v52, %v513_v28  ;;  %v557_v39 = vadd.f32 %v3203_v52, %v521_v29  ;;  %v954_v40 = vrot.slane %v856_v21, 1  ;;  %v1098_v41 = vmul.f32 %v3269_v17, %v733_v2 }
  0xbe   : > { %v620_v42 = vmin.f32 %v588_v33, 6.0  ;;  %v602_v43 = vmax.f32 %v570_v34, 0.0  ;;  %v596_v47 = vmax.f32 %v564_v37, 0.0  ;;  %v3374_v56 = vmul.f32 %v3266_v16, %v746_v35 }
  0xbf   : > { %v581_v48 = vmax.f32 %v549_v38, 0.0  ;;  %v589_v49 = vmax.f32 %v557_v39, 0.0  ;;  %v3378_v58 = vmul.f32 %v3269_v17, %v746_v35  ;;  %v3381_v63 = vmul.f32 %v3285_v22, %v746_v35 }
  0xc0   : > { %709 = vst.msk [vmem:[#allocation2 + $0x91] sm:$0xff] %vm642_vm2, %v620_v42  ;;  %v634_v57 = vmin.f32 %v602_v43, 6.0  ;;  %v628_v59 = vmin.f32 %v596_v47, 6.0  ;;  %v955_v15 = vsel %vm950_vm4, %v952_v54, %v954_v40  ;;  %v1196_v1 = vrot.slane %v1098_v41, 2 }
  0xc1   : > { %v613_v61 = vmin.f32 %v581_v48, 6.0  ;;  %v621_v62 = vmin.f32 %v589_v49, 6.0  ;;  %v1370_v2 = vadd.f32 %v1338_v32, %v1305_v20  ;;  %v3390_v3 = vmul.f32 %v3338_v9, %v746_v35  ;;  %v758_v20 = vld [vmem:[#allocation2 + $0xd8] sm:$0xff]  ;;  %v3447_v41 = vld [vmem:[#allocation2 + $0x30] sm:$0xff] }
  0xc2   : > { %723 = vst.msk [vmem:[#allocation2 + $0x139] sm:$0xff] %vm642_vm2, %v634_v57  ;;  %v3393_v4 = vmul.f32 %v3340_v10, %v746_v35  ;;  %v3396_v6 = vmul.f32 %v3352_v30, %v746_v35  ;;  %v1740_v54 = vrot.slane %v3371_v53, 2  ;;  %v976_v8 = vrot.slane %v3374_v56, 1 }
  0xc3   : > { %717 = vst.msk [vmem:[#allocation2 + $0xf1] sm:$0xff] %vm642_vm2, %v628_v59  ;;  %v3405_v11 = vmul.f32 %v3356_v36, %v746_v35  ;;  %v1218_v13 = vrot.slane %v3378_v58, 2  ;;  %v3412_v14 = vmul.f32 %v3335_v5, %v746_v35  ;;  %v1064_v21 = vadd.f32 %v955_v15, %v790_v31 }
  0xc4   : > { %702 = vst.msk [vmem:[#allocation2 + $0x39] sm:$0xff] %vm642_vm2, %v613_v61  ;;  %v1404_v23 = vmul.f32 %v3338_v9, %v3271_v18  ;;  %v3418_v24 = vmul.f32 %v3383_v0, %v746_v35  ;;  %v1197_v25 = vsel %vm1192_vm5, %v1194_v60, %v1196_v1  ;;  %v1405_v26 = vmul.f32 %v3338_v9, %v3273_v19 }
  0xc5   : > { %5439 = vst [vmem:[#allocation9_spill] sm:$0xff] %v3412_v14  ;;  %v870_v27 = vmul.f32 %v3266_v16, %v3398_v7  ;;  %v1519_v28 = vrot.slane %v3390_v3, 1  ;;  %v871_v33 = vmul.f32 %v3266_v16, %v3407_v12  ;;  %v3434_v55 = vmul.f32 %v3285_v22, %v758_v20 }
  0xc6   : > { %710 = vst.msk [vmem:[#allocation2 + $0x99] sm:$0xff] %vm642_vm2, %v621_v62  ;;  %v3437_v60 = vmul.f32 %v3266_v16, %v758_v20  ;;  %v3440_v35 = vmul.f32 %v3269_v17, %v758_v20  ;;  %v3443_v37 = vmul.f32 %v3335_v5, %v758_v20  ;;  %v1306_v38 = vadd.f32 %v1197_v25, %v1064_v21 }
  0xc7   : > { %5440 = vst [vmem:[#allocation10_spill] sm:$0xff] %v3418_v24  ;;  %v1339_v39 = vmul.f32 %v3335_v5, %v3271_v18  ;;  %v1500_v40 = vrot.slane %v1404_v23, 1  ;;  %v3450_v42 = vmul.f32 %v3338_v9, %v758_v20  ;;  %v1502_v43 = vrot.slane %v1405_v26, 1 }
  0xc8   : > { %5441 = vst [vmem:[#allocation11_spill] sm:$0xff] %v3443_v37  ;;  %v977_v32 = vrot.slane %v870_v27, 1  ;;  %v1112_v47 = vmul.f32 %v3269_v17, %v3398_v7  ;;  %v3455_v48 = vmul.f32 %v3340_v10, %v758_v20  ;;  %v1645_v49 = vmul.f32 %v3340_v10, %v3271_v18 }
  0xc9   : > { %v979_v50 = vrot.slane %v871_v33, 1  ;;  %v1113_v56 = vmul.f32 %v3269_v17, %v3407_v12  ;;  %v3463_v58 = vmul.f32 %v3383_v0, %v758_v20  ;;  %v1646_v59 = vmul.f32 %v3340_v10, %v3273_v19 }
  0xca   : > { %v1340_v61 = vmul.f32 %v3335_v5, %v3447_v41  ;;  %v1371_v62 = vadd.f32 %v1339_v39, %v1306_v38  ;;  %v1501_v15 = vsel %vm950_vm4, %v1499_v44, %v1500_v40  ;;  %v800_v18 = vmul.f32 %v3285_v22, %v3398_v7 }
  0xcb   : > { %5442 = vst [vmem:[#allocation12_spill] sm:$0xff] %v3463_v58  ;;  %v1416_v1 = vmul.f32 %v3338_v9, %v3398_v7  ;;  %v1503_v3 = vsel %vm950_vm4, %v1500_v40, %v1502_v43  ;;  %v978_v21 = vsel %vm950_vm4, %v976_v8, %v977_v32  ;;  %v1219_v23 = vrot.slane %v1112_v47, 2 }
  0xcc   : > { %v3477_v25 = vadd.f32 %v1340_v61, %v3311_v45  ;;  %v1741_v19 = vrot.slane %v1645_v49, 2  ;;  %v980_v26 = vsel %vm950_vm4, %v977_v32, %v979_v50  ;;  %v1221_v27 = vrot.slane %v1113_v56, 2  ;;  %v739_v32 = vld [vmem:[#allocation2 + $0x40] sm:$0x3] }
  0xcd   : > { %v1417_v44 = vmul.f32 %v3338_v9, %v3407_v12  ;;  %v3483_v33 = vmul.f32 %v3352_v30, %v758_v20  ;;  %v3486_v38 = vmul.f32 %v3356_v36, %v758_v20  ;;  %v1611_v39 = vadd.f32 %v1501_v15, %v1370_v2  ;;  %v738_v20 = vld [vmem:[#allocation2 + $0x38] sm:$0xff] }
  0xce   : > { %v1743_v40 = vrot.slane %v1646_v59, 2  ;;  %v1612_v43 = vadd.f32 %v1503_v3, %v1371_v62  ;;  %v1073_v45 = vadd.f32 %v978_v21, %v3381_v63  ;;  %v1520_v47 = vrot.slane %v1416_v1, 1 }
  0xcf   : > { %5443 = vst [vmem:[#allocation13_spill] sm:$0xff] %v3486_v38  ;;  %v1074_v49 = vadd.f32 %v980_v26, %v800_v18  ;;  %v1220_v50 = vsel %vm1192_vm5, %v1218_v13, %v1219_v23  ;;  %v3494_v56 = vmul.f32 %v3340_v10, %v3398_v7  ;;  %v1742_v2 = vsel %vm1192_vm5, %v1740_v54, %v1741_v19 }
  0xd0   : > { %v1222_v59 = vsel %vm1192_vm5, %v1219_v23, %v1221_v27  ;;  %v1522_v61 = vrot.slane %v1417_v44, 1  ;;  %v1744_v15 = vsel %vm1192_vm5, %v1741_v19, %v1743_v40  ;;  %v1852_v13 = vadd.f32 %v1742_v2, %v1611_v39  ;;  %v3533_v39 = vld [vmem:[#allocation2 + $0x90] sm:$0xff] }
  0xd1   : > { %v3504_v18 = vadd.f32 %v1744_v15, %v1612_v43  ;;  %v3506_v1 = vadd.f32 %v1220_v50, %v1073_v45  ;;  %v3509_v3 = vsel %vm950_vm4, %v1519_v28, %v1520_v47  ;;  %v3513_v53 = vmul.f32 %v3340_v10, %v3407_v12 }
  0xd2   : > { %5445 = vst [vmem:[#allocation15_spill] sm:$0xff] %v3509_v3  ;;  %v3515_v54 = vadd.f32 %v1222_v59, %v1074_v49  ;;  %v3520_v23 = vmul.f32 %v3352_v30, %v3398_v7  ;;  %v860_v19 = vmul.f32 %v3266_v16, %v3447_v41  ;;  %v3525_v26 = vsel %vm950_vm4, %v1520_v47, %v1522_v61 }
  0xd3   : > { %5444 = vst [vmem:[#allocation14_spill] sm:$0xff] %v3506_v1  ;;  %v1102_v28 = vmul.f32 %v3269_v17, %v3447_v41  ;;  %v1406_v27 = vmul.f32 %v3338_v9, %v3447_v41  ;;  %v1647_v44 = vmul.f32 %v3340_v10, %v3447_v41  ;;  %v1885_v40 = vmul.f32 %v3383_v0, %v3447_v41 }
  0xd4   : > { %5446 = vst [vmem:[#allocation16_spill] sm:$0xff] %v3515_v54  ;;  %v3539_v43 = vmul.f32 %v3352_v30, %v3447_v41  ;;  %v3543_v45 = vmul.f32 %v3356_v36, %v3447_v41  ;;  %v3547_v47 = vmul.f32 %v3266_v16, %v3533_v39  ;;  %v3552_v50 = vmul.f32 %v3352_v30, %v3407_v12 }
  0xd5   : > { %5447 = vst [vmem:[#allocation17_spill] sm:$0xff] %v3525_v26  ;;  %v3556_v2 = vmul.f32 %v3356_v36, %v3398_v7  ;;  %v3560_v59 = vmul.f32 %v3269_v17, %v3533_v39  ;;  %v3565_v15 = vmul.f32 %v3356_v36, %v3407_v12  ;;  %v793_v62 = vmul.f32 %v3285_v22, %v3447_v41 }
  0xd6   : > { %v961_v63 = vrot.slane %v860_v19, 1  ;;  %v1203_v8 = vrot.slane %v1102_v28, 2  ;;  %v1504_v57 = vrot.slane %v1406_v27, 1  ;;  %v1745_v7 = vrot.slane %v1647_v44, 2 }
  0xd7   : > { %v3571_v34 = vmul.f32 %v3285_v22, %v3533_v39  ;;  %v1917_v31 = vadd.f32 %v1885_v40, %v1852_v13  ;;  %v2046_v61 = vrot.slane %v3539_v43, 1  ;;  %v2287_v49 = vrot.slane %v3543_v45, 2 }
  0xd8   : > { %v861_v41 = vmul.f32 %v3266_v16, %v738_v20  ;;  %v862_v19 = vmul.f32 %v3266_v16, %v739_v32  ;;  %v1103_v28 = vmul.f32 %v3269_v17, %v738_v20  ;;  %v794_v27 = vmul.f32 %v3285_v22, %v738_v20 }
  0xd9   : > { %v1104_v44 = vmul.f32 %v3269_v17, %v739_v32  ;;  %v1341_v13 = vmul.f32 %v3335_v5, %v738_v20  ;;  %v1407_v40 = vmul.f32 %v3338_v9, %v738_v20  ;;  %v1408_v12 = vmul.f32 %v3338_v9, %v739_v32 }
  0xda   : > { %v962_v43 = vrot.slane %v861_v41, 1  ;;  %v964_v45 = vrot.slane %v862_v19, 1  ;;  %v1204_v21 = vrot.slane %v1103_v28, 2  ;;  %v1648_v24 = vmul.f32 %v3340_v10, %v738_v20 }
  0xdb   : > { %v1206_v29 = vrot.slane %v1104_v44, 2  ;;  %v1373_v58 = vadd.f32 %v1341_v13, %v3313_v46  ;;  %v1505_v37 = vrot.slane %v1407_v40, 1  ;;  %v1507_v54 = vrot.slane %v1408_v12, 1 }
  0xdc   : > { %v963_v26 = vsel %vm950_vm4, %v961_v63, %v962_v43  ;;  %v965_v3 = vsel %vm950_vm4, %v962_v43, %v964_v45  ;;  %v1205_v14 = vsel %vm1192_vm5, %v1203_v8, %v1204_v21  ;;  %v1649_v44 = vmul.f32 %v3340_v10, %v739_v32 }
  0xdd   : > { %v1067_v1 = vadd.f32 %v963_v26, %v793_v62  ;;  %v1068_v38 = vadd.f32 %v965_v3, %v794_v27  ;;  %v1207_v41 = vsel %vm1192_vm5, %v1204_v21, %v1206_v29  ;;  %v1506_v19 = vsel %vm950_vm4, %v1504_v57, %v1505_v37  ;;  %v3615_v27 = vld [vmem:[#allocation2 + $0xa0] sm:$0x3] }
  0xde   : > { %v1508_v28 = vsel %vm950_vm4, %v1505_v37, %v1507_v54  ;;  %v1613_v46 = vadd.f32 %v1506_v19, %v3477_v25  ;;  %v1746_v13 = vrot.slane %v1648_v24, 2  ;;  %v1886_v8 = vmul.f32 %v3383_v0, %v738_v20 }
  0xdf   : > { %v3595_v40 = vadd.f32 %v1205_v14, %v1067_v1  ;;  %v3597_v63 = vadd.f32 %v1207_v41, %v1068_v38  ;;  %v1614_v43 = vadd.f32 %v1508_v28, %v1373_v58  ;;  %v1748_v3 = vrot.slane %v1649_v44, 2  ;;  %v3608_v38 = vld [vmem:[#allocation2 + $0x98] sm:$0xff] }
  0xe0   : > { %v1747_v62 = vsel %vm1192_vm5, %v1745_v7, %v1746_v13  ;;  %v1951_v29 = vmul.f32 %v3352_v30, %v738_v20  ;;  %v1952_v57 = vmul.f32 %v3352_v30, %v739_v32  ;;  %v1918_v25 = vadd.f32 %v1886_v8, %v3504_v18 }
  0xe1   : > { %v3603_v37 = vadd.f32 %v1747_v62, %v1613_v46  ;;  %v2192_v24 = vmul.f32 %v3356_v36, %v738_v20  ;;  %v2193_v14 = vmul.f32 %v3356_v36, %v739_v32  ;;  %v1749_v58 = vsel %vm1192_vm5, %v1746_v13, %v1748_v3  ;;  %v3630_v13 = vld [vmem:[%s5416_s5] ss:$0 sm:$0xff] }
  0xe2   : > { %v2047_v1 = vrot.slane %v1951_v29, 1  ;;  %v2049_v54 = vrot.slane %v1952_v57, 1  ;;  %v802_v21 = vmul.f32 %v3285_v22, %v3608_v38  ;;  %v3613_v26 = vadd.f32 %v1749_v58, %v1614_v43 }
  0xe3   : > { %v2288_v7 = vrot.slane %v2192_v24, 2  ;;  %v2290_v12 = vrot.slane %v2193_v14, 2  ;;  %v873_v20 = vmul.f32 %v3266_v16, %v3608_v38  ;;  %v874_v45 = vmul.f32 %v3266_v16, %v3615_v27 }
  0xe4   : > { %v2048_v32 = vsel %vm950_vm4, %v2046_v61, %v2047_v1  ;;  %v2050_v18 = vsel %vm950_vm4, %v2047_v1, %v2049_v54  ;;  %v1115_v41 = vmul.f32 %v3269_v17, %v3608_v38  ;;  %v1116_v8 = vmul.f32 %v3269_v17, %v3615_v27 }
  0xe5   : > { %v2158_v19 = vadd.f32 %v2048_v32, %v1917_v31  ;;  %v2159_v28 = vadd.f32 %v2050_v18, %v1918_v25  ;;  %v2289_v46 = vsel %vm1192_vm5, %v2287_v49, %v2288_v7  ;;  %v2291_v44 = vsel %vm1192_vm5, %v2288_v7, %v2290_v12  ;;  %v3639_v49 = vld [vmem:[%s5417_s6] ss:$0 sm:$0xff] }
  0xe6   : > { %v982_v61 = vrot.slane %v873_v20, 1  ;;  %v984_v43 = vrot.slane %v874_v45, 1  ;;  %v1224_v62 = vrot.slane %v1115_v41, 2  ;;  %v2064_v3 = vrot.slane %v3552_v50, 1 }
  0xe7   : > { %v5421_v31 = vrot.slane %v3556_v2, 2  ;;  %v2399_v29 = vadd.f32 %v2289_v46, %v2158_v19  ;;  %v2400_v57 = vadd.f32 %v2291_v44, %v2159_v28  ;;  %v5448_v25 = vrot.slane %v3547_v47, 1  ;;  %v3673_v28 = vld [vmem:[#allocation2 + $0xe8] sm:$0x3] }
  0xe8   : > { %v985_v14 = vsel %vm950_vm4, %v982_v61, %v984_v43  ;;  %v5449_v50 = vrot.slane %v3560_v59, 2  ;;  %v1226_v1 = vrot.slane %v1116_v8, 2  ;;  %v5450_v32 = vrot.slane %v3494_v56, 2 }
  0xe9   : > { %v983_v24 = vsel %vm950_vm4, %v5448_v25, %v982_v61  ;;  %v2435_v54 = vmul.f32 %v3630_v13, %v2399_v29  ;;  %v2436_v7 = vmul.f32 %v3630_v13, %v2400_v57  ;;  %v1076_v20 = vadd.f32 %v985_v14, %v802_v21  ;;  %v3671_v21 = vld [vmem:[#allocation2 + $0xe0] sm:$0xff] }
  0xea   : > { %v1225_v58 = vsel %vm1192_vm5, %v5449_v50, %v1224_v62  ;;  %v1075_v12 = vadd.f32 %v983_v24, %v3571_v34  ;;  %v5451_v47 = vrot.slane %v3393_v4, 2  ;;  %v5453_v45 = vrot.slane %v3513_v53, 2  ;;  %v436_v24 = vpop.f32.mrf.mxu0 }
  0xeb   : > { %v5454_v59 = vmov %v5450_v32  ;;  %v1962_v19 = vmul.f32 %v3352_v30, %v3533_v39  ;;  %v1227_v34 = vsel %vm1192_vm5, %v1224_v62, %v1226_v1  ;;  %v2471_v4 = vadd.f32 %v3639_v49, %v2435_v54  ;;  %v473_v54 = vpop.f32.mrf.mxu2 }
  0xec   : > { %v3659_v18 = vsel %vm1192_vm5, %v5451_v47, %v5450_v32  ;;  %v3666_v41 = vsel %vm1192_vm5, %v5454_v59, %v5453_v45  ;;  %v2472_v46 = vadd.f32 %v3639_v49, %v2436_v7  ;;  %v3678_v53 = vadd.f32 %v1225_v58, %v1075_v12 }
  0xed   : > { %5452 = vst [vmem:[#allocation18_spill] sm:$0xff] %v3659_v18  ;;  %v3680_v56 = vadd.f32 %v1227_v34, %v1076_v20  ;;  %v5456_v44 = vrot.slane %v3520_v23, 1  ;;  %v5457_v61 = vrot.slane %v3396_v6, 1  ;;  %v5461_v29 = vrot.slane %v3405_v11, 2 }
  0xee   : > { %5455 = vst [vmem:[#allocation19_spill] sm:$0xff] %v3666_v41  ;;  %v3704_v6 = vmul.f32 %v3285_v22, %v3671_v21  ;;  %v2203_v23 = vmul.f32 %v3356_v36, %v3533_v39  ;;  %v2503_v14 = vmax.f32 %v2471_v4, 0.0  ;;  %v882_v50 = vmul.f32 %v3266_v16, %v3671_v21 }
  0xef   : > { %v3687_v43 = vsel %vm950_vm4, %v5457_v61, %v5456_v44  ;;  %v5459_v8 = vmov %v5456_v44  ;;  %v3699_v57 = vsel %vm1192_vm5, %v5461_v29, %v5421_v31  ;;  %v883_v11 = vmul.f32 %v3266_v16, %v3673_v28  ;;  %v456_v61 = vpop.f32.mrf.mxu1 }
  0xf0   : > { %5458 = vst [vmem:[#allocation20_spill] sm:$0xff] %v3687_v43  ;;  %v3692_v62 = vsel %vm950_vm4, %v5459_v8, %v2064_v3  ;;  %v2504_v3 = vmax.f32 %v2472_v46, 0.0  ;;  %v2066_v58 = vrot.slane %v1962_v19, 1  ;;  %v1963_v1 = vmul.f32 %v3352_v30, %v3608_v38 }
  0xf1   : > { %5460 = vst [vmem:[#allocation21_spill] sm:$0xff] %v3692_v62  ;;  %v3716_v7 = vmul.f32 %v3269_v17, %v3671_v21  ;;  %v2535_v12 = vmin.f32 %v2503_v14, 6.0  ;;  %v1964_v32 = vmul.f32 %v3352_v30, %v3615_v27  ;;  %v3722_v47 = vmul.f32 %v3269_v17, %v3673_v28 }
  0xf2   : > { %5462 = vst [vmem:[#allocation22_spill] sm:$0xff] %v3699_v57  ;;  %v2536_v20 = vmin.f32 %v2504_v3, 6.0  ;;  %v3726_v45 = vmul.f32 %v3338_v9, %v3671_v21  ;;  %v2067_v59 = vrot.slane %v1963_v1, 1  ;;  %v2204_v19 = vmul.f32 %v3356_v36, %v3608_v38  ;;  %v488_v3 = vpop.f32.mrf.mxu3 }
  0xf3   : > { %v3732_v34 = vmul.f32 %v3338_v9, %v3673_v28  ;;  %v2307_v4 = vrot.slane %v2203_v23, 2  ;;  %2567 = vst.msk [vmem:[%s3734_s10] sm:$0xff] %vm642_vm2, %v2535_v12  ;;  %v2599_v46 = vsel %vm642_vm2, %v2535_v12, 0.0  ;;  %v2069_v14 = vrot.slane %v1964_v32, 1 }
  0xf4   : > { %v2600_v44 = vsel %vm642_vm2, %v2536_v20, 0.0  ;;  %2568 = vst.msk [vmem:[%s3734_s10 + $0x8] sm:$0xff] %vm642_vm2, %v2536_v20  ;;  %v3745_v29 = vsel %vm950_vm4, %v2066_v58, %v2067_v59  ;;  %v2205_v23 = vmul.f32 %v3356_v36, %v3615_v27  ;;  %v2308_v1 = vrot.slane %v2204_v19, 2 }
  0xf5   : > { %v3742_v8 = vadd.f32 %v2600_v44, %v2599_v46  ;;  %5463 = vst [vmem:[#allocation23_spill] sm:$0xff] %v3745_v29  ;;  %v535_v31 = vmul.f32 %v3194_v51, %v488_v3  ;;  %v529_v12 = vmul.f32 %v3194_v51, %v473_v54  ;;  %v514_v25 = vmul.f32 %v3194_v51, %v436_v24 }
  0xf6   : > { %v3754_v20 = vmul.f32 %v3340_v10, %v3671_v21  ;;  %v3757_v46 = vsel %vm950_vm4, %v2067_v59, %v2069_v14  ;;  %v2310_v58 = vrot.slane %v2205_v23, 2  ;;  %v522_v32 = vmul.f32 %v3194_v51, %v456_v61  ;;  %v438_v14 = vpop.f32.mrf.mxu0 }
  0xf7   : > { %5464 = vst [vmem:[#allocation24_spill] sm:$0xff] %v3757_v46  ;;  %v3761_v44 = vsel %vm1192_vm5, %v2307_v4, %v2308_v1  ;;  %v571_v19 = vadd.f32 %v3203_v52, %v535_v31  ;;  %v565_v3 = vadd.f32 %v3203_v52, %v529_v12  ;;  %v550_v54 = vadd.f32 %v3203_v52, %v514_v25 }
  0xf8   : > { %5465 = vst [vmem:[#allocation25_spill] sm:$0xff] %v3761_v44  ;;  %v997_v24 = vrot.slane %v882_v50, 1  ;;  %v999_v57 = vrot.slane %v883_v11, 1  ;;  %v3767_v29 = vsel %vm1192_vm5, %v2308_v1, %v2310_v58  ;;  %v558_v59 = vadd.f32 %v3203_v52, %v522_v32  ;;  %v476_v11 = vpop.f32.mrf.mxu2 }
  0xf9   : > { %5466 = vst [vmem:[#allocation26_spill] sm:$0xff] %v3767_v29  ;;  %v603_v23 = vmax.f32 %v571_v19, 0.0  ;;  %v597_v46 = vmax.f32 %v565_v3, 0.0  ;;  %v582_v61 = vmax.f32 %v550_v54, 0.0  ;;  %v515_v4 = vmul.f32 %v3194_v51, %v438_v14 }
  0xfa   : > { %v1239_v44 = vrot.slane %v3716_v7, 2  ;;  %v1241_v31 = vrot.slane %v3722_v47, 2  ;;  %v1670_v25 = vmul.f32 %v3340_v10, %v3673_v28  ;;  %v590_v50 = vmax.f32 %v558_v59, 0.0 }
  0xfb   : > { %v635_v12 = vmin.f32 %v603_v23, 6.0  ;;  %v629_v1 = vmin.f32 %v597_v46, 6.0  ;;  %v614_v58 = vmin.f32 %v582_v61, 6.0  ;;  %v530_v32 = vmul.f32 %v3194_v51, %v476_v11 }
  0xfc   : > { %v5467_v19 = vrot.slane %v3437_v60, 1  ;;  %v1972_v54 = vmul.f32 %v3352_v30, %v3671_v21  ;;  %v622_v7 = vmin.f32 %v590_v50, 6.0  ;;  %v551_v47 = vadd.f32 %v3203_v52, %v515_v4 }
  0xfd   : > { %v1000_v14 = vsel %vm950_vm4, %v997_v24, %v999_v57  ;;  %v1973_v59 = vmul.f32 %v3352_v30, %v3673_v28  ;;  %v2213_v46 = vmul.f32 %v3356_v36, %v3671_v21  ;;  %724 = vst.msk [vmem:[#allocation2 + $0x141] sm:$0xff] %vm642_vm2, %v635_v12  ;;  %v566_v51 = vadd.f32 %v3203_v52, %v530_v32 }
  0xfe   : > { %v998_v3 = vsel %vm950_vm4, %v5467_v19, %v997_v24  ;;  %v1540_v60 = vrot.slane %v3726_v45, 1  ;;  %v1542_v23 = vrot.slane %v3732_v34, 1  ;;  %v2214_v61 = vmul.f32 %v3356_v36, %v3673_v28  ;;  %718 = vst.msk [vmem:[#allocation2 + $0xf9] sm:$0xff] %vm642_vm2, %v629_v1 }
  0xff   : > { %v583_v57 = vmax.f32 %v551_v47, 0.0  ;;  %v5468_v24 = vrot.slane %v3440_v35, 2  ;;  %v1781_v21 = vrot.slane %v3754_v20, 2  ;;  %v1783_v50 = vrot.slane %v1670_v25, 2  ;;  %703 = vst.msk [vmem:[#allocation2 + $0x49] sm:$0xff] %vm642_vm2, %v614_v58 }
 0x100   : > { %v598_v52 = vmax.f32 %v566_v51, 0.0  ;;  %v1081_v45 = vadd.f32 %v998_v3, %v3434_v55  ;;  %v1082_v34 = vadd.f32 %v1000_v14, %v3704_v6  ;;  %v2082_v11 = vrot.slane %v1972_v54, 1  ;;  %711 = vst.msk [vmem:[#allocation2 + $0xa9] sm:$0xff] %vm642_vm2, %v622_v7  ;;  %v5481_v51 = vld [vmem:[#allocation13_spill] sm:$0xff] }
 0x101   : > { %v1240_v4 = vsel %vm1192_vm5, %v5468_v24, %v1239_v44  ;;  %v615_v28 = vmin.f32 %v583_v57, 6.0  ;;  %v1242_v12 = vsel %vm1192_vm5, %v1239_v44, %v1241_v31  ;;  %v2084_v1 = vrot.slane %v1973_v59, 1  ;;  %v770_v44 = vld [vmem:[#allocation2 + $0x138] sm:$0xff] }
 0x102   : > { %v2323_v35 = vrot.slane %v2213_v46, 2  ;;  %v630_v32 = vmin.f32 %v598_v52, 6.0  ;;  %v5469_v19 = vrot.slane %v3565_v15, 2  ;;  %v5470_v20 = vrot.slane %v3556_v2, 2  ;;  %v5485_v24 = vld [vmem:[#allocation14_spill] sm:$0xff]  ;;  %v761_v52 = vld [vmem:[#allocation2 + $0xf0] sm:$0xff] }
 0x103   : > { %v5472_v55 = vrot.slane %v3450_v42, 1  ;;  %v2325_v58 = vrot.slane %v2214_v61, 2  ;;  %v1348_v3 = vmul.f32 %v3335_v5, %v3533_v39  ;;  %704 = vst.msk [vmem:[#allocation2 + $0x51] sm:$0xff] %vm642_vm2, %v615_v28  ;;  %v3819_v31 = vsel %vm950_vm4, %v1540_v60, %v1542_v23 }
 0x104   : > { %v3808_v25 = vsel %vm1192_vm5, %v5470_v20, %v5469_v19  ;;  %5474 = vst [vmem:[#allocation29_spill] sm:$0xff] %v3819_v31  ;;  %v5475_v2 = vrot.slane %v3455_v48, 2  ;;  %v3827_v42 = vsel %vm1192_vm5, %v1781_v21, %v1783_v50  ;;  %v3831_v54 = vmul.f32 %v3338_v9, %v3533_v39  ;;  %v3942_v43 = vld [vmem:[#allocation2 + $0x140] sm:$0xff] }
 0x105   : > { %5471 = vst [vmem:[#allocation27_spill] sm:$0xff] %v3808_v25  ;;  %v3813_v6 = vsel %vm950_vm4, %v5472_v55, %v1540_v60  ;;  %v1323_v7 = vadd.f32 %v1240_v4, %v1081_v45  ;;  %v3834_v47 = vadd.f32 %v1242_v12, %v1082_v34  ;;  %v5478_v14 = vrot.slane %v3483_v33, 1  ;;  %v3915_v19 = vld [vmem:[#allocation2 + $0xf8] sm:$0xff] }
 0x106   : > { %5473 = vst [vmem:[#allocation28_spill] sm:$0xff] %v3813_v6  ;;  %v3824_v15 = vsel %vm1192_vm5, %v5475_v2, %v1781_v21  ;;  %v3843_v48 = vmul.f32 %v3340_v10, %v3533_v39  ;;  %v3846_v46 = vsel %vm950_vm4, %v2082_v11, %v2084_v1  ;;  %v5482_v60 = vrot.slane %v5481_v51, 2  ;;  %v5490_v6 = vld [vmem:[#allocation16_spill] sm:$0xff] }
 0x107   : > { %5476 = vst [vmem:[#allocation30_spill] sm:$0xff] %v3824_v15  ;;  %v3839_v59 = vsel %vm950_vm4, %v5478_v14, %v2082_v11  ;;  %v3854_v61 = vmul.f32 %v3266_v16, %v770_v44  ;;  %v3857_v33 = vmul.f32 %v3269_v17, %v770_v44  ;;  %v3860_v57 = vsel %vm1192_vm5, %v2323_v35, %v2325_v58 }
 0x108   : > { %5477 = vst [vmem:[#allocation31_spill] sm:$0xff] %v3827_v42  ;;  %v3851_v23 = vsel %vm1192_vm5, %v5482_v60, %v2323_v35  ;;  %v3863_v4 = vadd.f32 %v1348_v3, %v5485_v24  ;;  %v3866_v21 = vmul.f32 %v3338_v9, %v770_v44  ;;  %v3869_v50 = vmul.f32 %v3340_v10, %v770_v44 }
 0x109   : > { %719 = vst.msk [vmem:[#allocation2 + $0x109] sm:$0xff] %vm642_vm2, %v630_v32  ;;  %v1524_v45 = vrot.slane %v3831_v54, 1  ;;  %v3874_v34 = vmul.f32 %v3383_v0, %v3533_v39  ;;  %v3877_v11 = vmul.f32 %v3352_v30, %v770_v44  ;;  %v3880_v28 = vmul.f32 %v3356_v36, %v770_v44 }
 0x10a   : > { %5479 = vst [vmem:[#allocation32_spill] sm:$0xff] %v3839_v59  ;;  %v3884_v1 = vmul.f32 %v3285_v22, %v770_v44  ;;  %v3887_v35 = vmul.f32 %v3335_v5, %v770_v44  ;;  %v884_v32 = vmul.f32 %v3266_v16, %v761_v52  ;;  %v1126_v20 = vmul.f32 %v3269_v17, %v761_v52 }
 0x10b   : > { %5480 = vst [vmem:[#allocation33_spill] sm:$0xff] %v3846_v46  ;;  %v1356_v55 = vmul.f32 %v3335_v5, %v761_v52  ;;  %v3897_v2 = vmul.f32 %v3383_v0, %v770_v44  ;;  %v1419_v54 = vmul.f32 %v3338_v9, %v3608_v38  ;;  %v809_v60 = vmul.f32 %v3285_v22, %v761_v52 }
 0x10c   : > { %5483 = vst [vmem:[#allocation13_spill] sm:$0xff] %v3851_v23  ;;  %v3905_v24 = vmul.f32 %v3338_v9, %v761_v52  ;;  %v1001_v39 = vrot.slane %v884_v32, 1  ;;  %v3908_v58 = vmul.f32 %v3340_v10, %v761_v52  ;;  %v3911_v3 = vmul.f32 %v3383_v0, %v761_v52 }
 0x10d   : > { %5484 = vst [vmem:[#allocation34_spill] sm:$0xff] %v3860_v57  ;;  %v1420_v44 = vmul.f32 %v3338_v9, %v3615_v27  ;;  %v1243_v14 = vrot.slane %v1126_v20, 2  ;;  %v3917_v12 = vadd.f32 %v1356_v55, %v1323_v7  ;;  %v1349_v51 = vmul.f32 %v3335_v5, %v3608_v38 }
 0x10e   : > { %5486 = vst [vmem:[#allocation14_spill] sm:$0xff] %v3874_v34  ;;  %v885_v32 = vmul.f32 %v3266_v16, %v3915_v19  ;;  %v1525_v57 = vrot.slane %v1419_v54, 1  ;;  %v1127_v46 = vmul.f32 %v3269_v17, %v3915_v19  ;;  %v1660_v7 = vmul.f32 %v3340_v10, %v3608_v38 }
 0x10f   : > { %5487 = vst [vmem:[#allocation35_spill] sm:$0xff] %v3887_v35  ;;  %v1974_v35 = vmul.f32 %v3352_v30, %v761_v52  ;;  %v810_v20 = vmul.f32 %v3285_v22, %v3915_v19  ;;  %v1527_v42 = vrot.slane %v1420_v44, 1  ;;  %v2215_v31 = vmul.f32 %v3356_v36, %v761_v52  ;;  %v3947_v44 = vld [vmem:[#allocation2 + $0x148] sm:$0x3] }
 0x110   : > { %5488 = vst [vmem:[#allocation36_spill] sm:$0xff] %v3897_v2  ;;  %v3921_v2 = vld [vmem:[#allocation2 + $0x100] sm:$0x3]  ;;  %v1002_v55 = vrot.slane %v885_v32, 1  ;;  %v1244_v15 = vrot.slane %v1127_v46, 2  ;;  %v1381_v29 = vadd.f32 %v1349_v51, %v5490_v6  ;;  %v1661_v34 = vmul.f32 %v3340_v10, %v3615_v27 }
 0x111   : > { %5489 = vst [vmem:[#allocation37_spill] sm:$0xff] %v3911_v3  ;;  %v886_v23 = vmul.f32 %v3266_v16, %v3921_v2  ;;  %v1128_v3 = vmul.f32 %v3269_v17, %v3921_v2  ;;  %v1766_v46 = vrot.slane %v1660_v7, 2  ;;  %v1528_v27 = vsel %vm950_vm4, %v1525_v57, %v1527_v42 }
 0x112   : > { %v1003_v25 = vsel %vm950_vm4, %v1001_v39, %v1002_v55  ;;  %v1245_v59 = vsel %vm1192_vm5, %v1243_v14, %v1244_v15  ;;  %v2327_v18 = vrot.slane %v2215_v31, 2  ;;  %v1768_v7 = vrot.slane %v1661_v34, 2 }
 0x113   : > { %v1004_v54 = vrot.slane %v886_v23, 1  ;;  %v1246_v62 = vrot.slane %v1128_v3, 2  ;;  %v1083_v41 = vadd.f32 %v1003_v25, %v809_v60  ;;  %v1526_v23 = vsel %vm950_vm4, %v1524_v45, %v1525_v57 }
 0x114   : > { %v2086_v3 = vrot.slane %v1974_v35, 1  ;;  %v894_v25 = vmul.f32 %v3266_v16, %v3942_v43  ;;  %v1975_v45 = vmul.f32 %v3352_v30, %v3915_v19  ;;  %v1621_v60 = vadd.f32 %v1526_v23, %v3863_v4 }
 0x115   : > { %v1005_v32 = vsel %vm950_vm4, %v1002_v55, %v1004_v54  ;;  %v1247_v6 = vsel %vm1192_vm5, %v1244_v15, %v1246_v62  ;;  %v3952_v51 = vadd.f32 %v1245_v59, %v1083_v41  ;;  %v895_v62 = vmul.f32 %v3266_v16, %v3947_v44  ;;  %v3976_v55 = vld [vmem:[#allocation2 + $0x48] sm:$0xff] }
 0x116   : > { %v1084_v52 = vadd.f32 %v1005_v32, %v810_v20  ;;  %v1976_v15 = vmul.f32 %v3352_v30, %v3921_v2  ;;  %v1622_v41 = vadd.f32 %v1528_v27, %v1381_v29  ;;  %v5492_v31 = vrot.slane %v3843_v48, 2 }
 0x117   : > { %v2087_v59 = vrot.slane %v1975_v45, 1  ;;  %v2216_v57 = vmul.f32 %v3356_v36, %v3915_v19  ;;  %v1136_v35 = vmul.f32 %v3269_v17, %v3942_v43  ;;  %v1137_v4 = vmul.f32 %v3269_v17, %v3947_v44 }
 0x118   : > { %v3956_v14 = vadd.f32 %v1247_v6, %v1084_v52  ;;  %v1767_v42 = vsel %vm1192_vm5, %v5492_v31, %v1766_v46  ;;  %v1440_v34 = vmul.f32 %v3338_v9, %v3942_v43  ;;  %v2089_v20 = vrot.slane %v1976_v15, 1 }
 0x119   : > { %v1017_v29 = vrot.slane %v894_v25, 1  ;;  %v3979_v48 = vsel %vm950_vm4, %v2086_v3, %v2087_v59  ;;  %v2217_v54 = vmul.f32 %v3356_v36, %v3921_v2  ;;  %v2328_v32 = vrot.slane %v2216_v57, 2 }
 0x11a   : > { %5491 = vst [vmem:[#allocation16_spill] sm:$0xff] %v3956_v14  ;;  %v1019_v23 = vrot.slane %v895_v62, 1  ;;  %v1441_v52 = vmul.f32 %v3338_v9, %v3947_v44  ;;  %v1681_v6 = vmul.f32 %v3340_v10, %v3942_v43  ;;  %v3988_v27 = vsel %vm950_vm4, %v2087_v59, %v2089_v20 }
 0x11b   : > { %5493 = vst [vmem:[#allocation38_spill] sm:$0xff] %v3979_v48  ;;  %v1682_v25 = vmul.f32 %v3340_v10, %v3947_v44  ;;  %v3993_v3 = vsel %vm1192_vm5, %v2327_v18, %v2328_v32  ;;  %v2330_v45 = vrot.slane %v2217_v54, 2  ;;  %v1342_v15 = vmul.f32 %v3335_v5, %v3976_v55 }
 0x11c   : > { %5494 = vst [vmem:[#allocation39_spill] sm:$0xff] %v3988_v27  ;;  %v1769_v62 = vsel %vm1192_vm5, %v1766_v46, %v1768_v7  ;;  %v816_v31 = vmul.f32 %v3285_v22, %v3942_v43  ;;  %v1259_v57 = vrot.slane %v1136_v35, 2  ;;  %v1261_v39 = vrot.slane %v1137_v4, 2 }
 0x11d   : > { %5495 = vst [vmem:[#allocation40_spill] sm:$0xff] %v3993_v3  ;;  %v5496_v59 = vrot.slane %v3854_v61, 1  ;;  %v1560_v27 = vrot.slane %v1440_v34, 1  ;;  %v4004_v48 = vsel %vm1192_vm5, %v2328_v32, %v2330_v45  ;;  %v4007_v18 = vadd.f32 %v1342_v15, %v3595_v40  ;;  %v491_v61 = vpop.f32.mrf.mxu3  ;;  %v4020_v45 = vld [vmem:[#allocation2 + $0xa8] sm:$0xff]  ;;  %v4025_v40 = vld [vmem:[%s5413_s2] ss:$0 sm:$0xff] }
 0x11e   : > { %5497 = vst [vmem:[#allocation41_spill] sm:$0xff] %v4004_v48  ;;  %v4011_v54 = vmul.f32 %v3383_v0, %v3608_v38  ;;  %v1020_v46 = vsel %vm950_vm4, %v1017_v29, %v1019_v23  ;;  %v1562_v7 = vrot.slane %v1441_v52, 1  ;;  %v4016_v35 = vmul.f32 %v3352_v30, %v3942_v43 }
 0x11f   : > { %v1018_v20 = vsel %vm950_vm4, %v5496_v59, %v1017_v29  ;;  %v4018_v4 = vadd.f32 %v1767_v42, %v1621_v60  ;;  %v1801_v34 = vrot.slane %v1681_v6, 2  ;;  %v1803_v32 = vrot.slane %v1682_v25, 2 }
 0x120   : > { %5498 = vst [vmem:[#allocation42_spill] sm:$0xff] %v4011_v54  ;;  %v536_v38 = vmul.f32 %v4025_v40, %v491_v61  ;;  %v4028_v29 = vadd.f32 %v1769_v62, %v1622_v41  ;;  %v1089_v23 = vadd.f32 %v1018_v20, %v3884_v1  ;;  %v5500_v52 = vrot.slane %v3857_v33, 2  ;;  %v4070_v20 = vld [vmem:[%s5414_s3] ss:$0 sm:$0xff] }
 0x121   : > { %v1350_v42 = vmul.f32 %v3335_v5, %v4020_v45  ;;  %v1090_v6 = vadd.f32 %v1020_v46, %v816_v31  ;;  %v1262_v25 = vsel %vm1192_vm5, %v1259_v57, %v1261_v39  ;;  %v5501_v15 = vrot.slane %v3866_v21, 1 }
 0x122   : > { %5499 = vst [vmem:[#allocation43_spill] sm:$0xff] %v4028_v29  ;;  %v1260_v60 = vsel %vm1192_vm5, %v5500_v52, %v1259_v57  ;;  %v4044_v41 = vmul.f32 %v3352_v30, %v3947_v44  ;;  %v4047_v1 = vsel %vm950_vm4, %v1560_v27, %v1562_v7  ;;  %v5422_v33 = vrot.slane %v4016_v35, 1 }
 0x123   : > { %v4040_v59 = vsel %vm950_vm4, %v5501_v15, %v1560_v27  ;;  %5503 = vst [vmem:[#allocation45_spill] sm:$0xff] %v4047_v1  ;;  %v4052_v62 = vmul.f32 %v3356_v36, %v3942_v43  ;;  %v4055_v39 = vadd.f32 %v1350_v42, %v3678_v53  ;;  %v5505_v21 = vrot.slane %v3869_v50, 2  ;;  %v4073_v53 = vld [vmem:[#allocation2 + $0x108] sm:$0xff] }
 0x124   : > { %5502 = vst [vmem:[#allocation44_spill] sm:$0xff] %v4040_v59  ;;  %v4063_v57 = vsel %vm1192_vm5, %v1801_v34, %v1803_v32  ;;  %v863_v27 = vmul.f32 %v3266_v16, %v3976_v55  ;;  %v572_v43 = vadd.f32 %v4070_v20, %v536_v38  ;;  %v4075_v46 = vadd.f32 %v1260_v60, %v1089_v23  ;;  %v4090_v23 = vld [vmem:[#allocation2 + $0x50] sm:$0xff] }
 0x125   : > { %5504 = vst [vmem:[#allocation46_spill] sm:$0xff] %v4055_v39  ;;  %v4060_v31 = vsel %vm1192_vm5, %v5505_v21, %v1801_v34  ;;  %v1105_v50 = vmul.f32 %v3269_v17, %v3976_v55  ;;  %v1409_v7 = vmul.f32 %v3338_v9, %v3976_v55  ;;  %v1358_v61 = vmul.f32 %v3335_v5, %v4073_v53 }
 0x126   : > { %5506 = vst [vmem:[#allocation47_spill] sm:$0xff] %v4060_v31  ;;  %v4083_v34 = vadd.f32 %v1262_v25, %v1090_v6  ;;  %v2104_v32 = vrot.slane %v4044_v41, 1  ;;  %v4088_v38 = vmul.f32 %v3356_v36, %v3947_v44  ;;  %v604_v52 = vmax.f32 %v572_v43, 0.0  ;;  %v4105_v44 = vld [vmem:[#allocation2 + $0x58] sm:$0x3] }
 0x127   : > { %5507 = vst [vmem:[#allocation48_spill] sm:$0xff] %v4063_v57  ;;  %v5510_v60 = vrot.slane %v3877_v11, 1  ;;  %v1357_v6 = vmul.f32 %v3335_v5, %v3915_v19  ;;  %v4103_v25 = vadd.f32 %v1358_v61, %v3952_v51  ;;  %v4109_v41 = vmul.f32 %v3338_v9, %v3915_v19 }
 0x128   : > { %5508 = vst [vmem:[#allocation49_spill] sm:$0xff] %v4075_v46  ;;  %v795_v11 = vmul.f32 %v3285_v22, %v3976_v55  ;;  %v966_v21 = vrot.slane %v863_v27, 1  ;;  %v636_v43 = vmin.f32 %v604_v52, 6.0  ;;  %v1650_v15 = vmul.f32 %v3340_v10, %v3976_v55 }
 0x129   : > { %5509 = vst [vmem:[#allocation50_spill] sm:$0xff] %v4083_v34  ;;  %v4097_v42 = vsel %vm950_vm4, %v5510_v60, %v5422_v33  ;;  %v1208_v60 = vrot.slane %v1105_v50, 2  ;;  %v1509_v33 = vrot.slane %v1409_v7, 1  ;;  %v864_v51 = vmul.f32 %v3266_v16, %v4090_v23 }
 0x12a   : > { %5511 = vst [vmem:[#allocation51_spill] sm:$0xff] %v4097_v42  ;;  %v865_v61 = vmul.f32 %v3266_v16, %v4105_v44  ;;  %v1106_v42 = vmul.f32 %v3269_v17, %v4090_v23  ;;  %v1107_v27 = vmul.f32 %v3269_v17, %v4105_v44  ;;  %v1343_v50 = vmul.f32 %v3335_v5, %v4090_v23 }
 0x12b   : > { %5512 = vst [vmem:[#allocation52_spill] sm:$0xff] %v4103_v25  ;;  %v796_v7 = vmul.f32 %v3285_v22, %v4090_v23  ;;  %v967_v52 = vrot.slane %v864_v51, 1  ;;  %v1410_v57 = vmul.f32 %v3338_v9, %v4090_v23  ;;  %v1651_v25 = vmul.f32 %v3340_v10, %v4090_v23 }
 0x12c   : > { %725 = vst.msk [vmem:[#allocation2 + $0x151] sm:$0xff] %vm642_vm2, %v636_v43  ;;  %v1411_v43 = vmul.f32 %v3338_v9, %v4105_v44  ;;  %v969_v31 = vrot.slane %v865_v61, 1  ;;  %v1209_v1 = vrot.slane %v1106_v42, 2  ;;  %v1211_v59 = vrot.slane %v1107_v27, 2 }
 0x12d   : > { %v1375_v48 = vadd.f32 %v1343_v50, %v3597_v63  ;;  %v968_v3 = vsel %vm950_vm4, %v966_v21, %v967_v52  ;;  %v1510_v54 = vrot.slane %v1410_v57, 1  ;;  %v1652_v63 = vmul.f32 %v3340_v10, %v4105_v44 }
 0x12e   : > { %v1512_v34 = vrot.slane %v1411_v43, 1  ;;  %v970_v51 = vsel %vm950_vm4, %v967_v52, %v969_v31  ;;  %v1069_v14 = vadd.f32 %v968_v3, %v795_v11  ;;  %v1210_v46 = vsel %vm1192_vm5, %v1208_v60, %v1209_v1  ;;  %v478_v43 = vpop.f32.mrf.mxu2 }
 0x12f   : > { %v1212_v29 = vsel %vm1192_vm5, %v1209_v1, %v1211_v59  ;;  %v1070_v39 = vadd.f32 %v970_v51, %v796_v7  ;;  %v1511_v42 = vsel %vm950_vm4, %v1509_v33, %v1510_v54  ;;  %v1432_v57 = vmul.f32 %v3338_v9, %v3921_v2 }
 0x130   : > { %v1513_v61 = vsel %vm950_vm4, %v1510_v54, %v1512_v34  ;;  %v4145_v21 = vadd.f32 %v1210_v46, %v1069_v14  ;;  %v1615_v31 = vadd.f32 %v1511_v42, %v4007_v18  ;;  %v1545_v11 = vrot.slane %v4109_v41, 1 }
 0x131   : > { %v1616_v3 = vadd.f32 %v1513_v61, %v1375_v48  ;;  %v1887_v59 = vmul.f32 %v3383_v0, %v3976_v55  ;;  %v4151_v1 = vadd.f32 %v1212_v29, %v1070_v39  ;;  %v1751_v33 = vrot.slane %v1651_v25, 2 }
 0x132   : > { %v2345_v54 = vrot.slane %v4088_v38, 2  ;;  %v1953_v34 = vmul.f32 %v3352_v30, %v3976_v55  ;;  %v1753_v60 = vrot.slane %v1652_v63, 2  ;;  %v1888_v14 = vmul.f32 %v3383_v0, %v4090_v23 }
 0x133   : > { %v5513_v18 = vrot.slane %v4016_v35, 1  ;;  %v5515_v46 = vrot.slane %v4052_v62, 2  ;;  %v5516_v29 = vrot.slane %v3880_v28, 2  ;;  %v1750_v25 = vrot.slane %v1650_v15, 2 }
 0x134   : > { %v1954_v41 = vmul.f32 %v3352_v30, %v4090_v23  ;;  %v4173_v27 = vadd.f32 %v1357_v6, %v3834_v47  ;;  %v1547_v50 = vrot.slane %v1432_v57, 1  ;;  %v4177_v35 = vmul.f32 %v3340_v10, %v3915_v19  ;;  %v458_v6 = vpop.f32.mrf.mxu1  ;;  %v493_v57 = vpop.f32.mrf.mxu3 }
 0x135   : > { %v4161_v48 = vsel %vm950_vm4, %v5513_v18, %v2104_v32  ;;  %v4168_v39 = vsel %vm1192_vm5, %v5516_v29, %v5515_v46  ;;  %v4181_v32 = vmul.f32 %v3340_v10, %v3921_v2  ;;  %v5518_v28 = vrot.slane %v3905_v24, 1 }
 0x136   : > { %5514 = vst [vmem:[#allocation53_spill] sm:$0xff] %v4161_v48  ;;  %v1919_v15 = vadd.f32 %v1887_v59, %v3603_v37  ;;  %v2194_v52 = vmul.f32 %v3356_v36, %v3976_v55  ;;  %v1752_v47 = vsel %vm1192_vm5, %v1750_v25, %v1751_v33  ;;  %v2051_v51 = vrot.slane %v1953_v34, 1 }
 0x137   : > { %5517 = vst [vmem:[#allocation54_spill] sm:$0xff] %v4168_v39  ;;  %v1546_v7 = vsel %vm950_vm4, %v5518_v28, %v1545_v11  ;;  %v1754_v42 = vsel %vm1192_vm5, %v1751_v33, %v1753_v60  ;;  %v4191_v61 = vadd.f32 %v1752_v47, %v1615_v31  ;;  %v1920_v2 = vadd.f32 %v1888_v14, %v3613_v26 }
 0x138   : > { %v4194_v63 = vadd.f32 %v1754_v42, %v1616_v3  ;;  %v1955_v24 = vmul.f32 %v3352_v30, %v4105_v44  ;;  %v2052_v37 = vrot.slane %v1954_v41, 1  ;;  %v2195_v55 = vmul.f32 %v3356_v36, %v4090_v23 }
 0x139   : > { %v2196_v59 = vmul.f32 %v3356_v36, %v4105_v44  ;;  %v523_v34 = vmul.f32 %v4025_v40, %v458_v6  ;;  %v537_v31 = vmul.f32 %v4025_v40, %v493_v57  ;;  %v531_v33 = vmul.f32 %v4025_v40, %v478_v43 }
 0x13a   : > { %5519 = vst [vmem:[#allocation55_spill] sm:$0xff] %v4194_v63  ;;  %v2292_v26 = vrot.slane %v2194_v52, 2  ;;  %v2053_v3 = vsel %vm950_vm4, %v2051_v51, %v2052_v37  ;;  %v2054_v60 = vrot.slane %v1955_v24, 1  ;;  %v2293_v14 = vrot.slane %v2195_v55, 2  ;;  %v441_v51 = vpop.f32.mrf.mxu0 }
 0x13b   : > { %v2160_v18 = vadd.f32 %v2053_v3, %v1919_v15  ;;  %v2295_v46 = vrot.slane %v2196_v59, 2  ;;  %v559_v29 = vadd.f32 %v4070_v20, %v523_v34  ;;  %v573_v23 = vadd.f32 %v4070_v20, %v537_v31 }
 0x13c   : > { %v1786_v25 = vrot.slane %v4177_v35, 2  ;;  %v2055_v44 = vsel %vm950_vm4, %v2052_v37, %v2054_v60  ;;  %v2294_v41 = vsel %vm1192_vm5, %v2292_v26, %v2293_v14  ;;  %v567_v28 = vadd.f32 %v4070_v20, %v531_v33 }
 0x13d   : > { %v1788_v52 = vrot.slane %v4181_v32, 2  ;;  %v2161_v47 = vadd.f32 %v2055_v44, %v1920_v2  ;;  %v2401_v6 = vadd.f32 %v2294_v41, %v2160_v18  ;;  %v591_v43 = vmax.f32 %v559_v29, 0.0 }
 0x13e   : > { %v2296_v15 = vsel %vm1192_vm5, %v2293_v14, %v2295_v46  ;;  %v605_v42 = vmax.f32 %v573_v23, 0.0  ;;  %v599_v24 = vmax.f32 %v567_v28, 0.0  ;;  %v516_v55 = vmul.f32 %v4025_v40, %v441_v51 }
 0x13f   : > { %v1548_v35 = vsel %vm950_vm4, %v1545_v11, %v1547_v50  ;;  %v2402_v57 = vadd.f32 %v2296_v15, %v2161_v47  ;;  %v2437_v37 = vmul.f32 %v3630_v13, %v2401_v6  ;;  %v623_v59 = vmin.f32 %v591_v43, 6.0 }
 0x140   : > { %v1629_v34 = vadd.f32 %v1546_v7, %v3917_v12  ;;  %v637_v31 = vmin.f32 %v605_v42, 6.0  ;;  %v631_v32 = vmin.f32 %v599_v24, 6.0  ;;  %v552_v2 = vadd.f32 %v4070_v20, %v516_v55 }
 0x141   : > { %v5520_v33 = vrot.slane %v3908_v58, 2  ;;  %v875_v3 = vmul.f32 %v3266_v16, %v4020_v45  ;;  %v2438_v60 = vmul.f32 %v3630_v13, %v2402_v57  ;;  %v2473_v11 = vadd.f32 %v3639_v49, %v2437_v37  ;;  %712 = vst.msk [vmem:[#allocation2 + $0xb1] sm:$0xff] %vm642_vm2, %v623_v59 }
 0x142   : > { %v1117_v12 = vmul.f32 %v3269_v17, %v4020_v45  ;;  %v1421_v50 = vmul.f32 %v3338_v9, %v4020_v45  ;;  %v4233_v58 = vmul.f32 %v3340_v10, %v4020_v45  ;;  %726 = vst.msk [vmem:[#allocation2 + $0x159] sm:$0xff] %vm642_vm2, %v637_v31  ;;  %v584_v7 = vmax.f32 %v552_v2, 0.0 }
 0x143   : > { %v1787_v26 = vsel %vm1192_vm5, %v5520_v33, %v1786_v25  ;;  %v1895_v14 = vmul.f32 %v3383_v0, %v4020_v45  ;;  %v4240_v18 = vmul.f32 %v3352_v30, %v4020_v45  ;;  %v2474_v46 = vadd.f32 %v3639_v49, %v2438_v60  ;;  %720 = vst.msk [vmem:[#allocation2 + $0x111] sm:$0xff] %vm642_vm2, %v631_v32 }
 0x144   : > { %v2505_v29 = vmax.f32 %v2473_v11, 0.0  ;;  %v4245_v23 = vadd.f32 %v1548_v35, %v4173_v27  ;;  %v4248_v44 = vsel %vm1192_vm5, %v1786_v25, %v1788_v52  ;;  %v4252_v41 = vmul.f32 %v3356_v36, %v4020_v45 }
 0x145   : > { %v616_v28 = vmin.f32 %v584_v7, 6.0  ;;  %v4254_v47 = vadd.f32 %v1787_v26, %v1629_v34  ;;  %v803_v6 = vmul.f32 %v3285_v22, %v4020_v45  ;;  %v2506_v43 = vmax.f32 %v2474_v46, 0.0 }
 0x146   : > { %v2537_v51 = vmin.f32 %v2505_v29, 6.0  ;;  %v986_v15 = vrot.slane %v875_v3, 1  ;;  %v1228_v27 = vrot.slane %v1117_v12, 2  ;;  %v1529_v42 = vrot.slane %v1421_v50, 1 }
 0x147   : > { %v1770_v24 = vrot.slane %v4233_v58, 2  ;;  %705 = vst.msk [vmem:[#allocation2 + $0x61] sm:$0xff] %vm642_vm2, %v616_v28  ;;  %v4261_v25 = vadd.f32 %v1895_v14, %v4018_v4  ;;  %v2071_v52 = vrot.slane %v4240_v18, 1  ;;  %v2538_v55 = vmin.f32 %v2506_v43, 6.0 }
 0x148   : > { %2569 = vst.msk [vmem:[%s3734_s10 + $0x10] sm:$0xff] %vm642_vm2, %v2537_v51  ;;  %v2602_v45 = vsel %vm642_vm2, %v2537_v51, 0.0  ;;  %v2312_v35 = vrot.slane %v4252_v41, 2  ;;  %v4270_v57 = vmul.f32 %v3266_v16, %v4073_v53  ;;  %v4274_v37 = vmul.f32 %v3269_v17, %v4073_v53  ;;  %v753_v59 = vld [vmem:[#allocation2 + $0xb0] sm:$0xff]  ;;  %v754_v34 = vld [vmem:[#allocation2 + $0xb8] sm:$0x3] }
 0x149   : > { %v2603_v4 = vadd.f32 %v2602_v45, %v3742_v8  ;;  %2570 = vst.msk [vmem:[%s3734_s10 + $0x18] sm:$0xff] %vm642_vm2, %v2538_v55  ;;  %v2604_v31 = vsel %vm642_vm2, %v2538_v55, 0.0  ;;  %v804_v32 = vmul.f32 %v3285_v22, %v753_v59  ;;  %v876_v2 = vmul.f32 %v3266_v16, %v753_v59 }
 0x14a   : > { %v877_v33 = vmul.f32 %v3266_v16, %v754_v34  ;;  %v1118_v3 = vmul.f32 %v3269_v17, %v753_v59  ;;  %v1119_v60 = vmul.f32 %v3269_v17, %v754_v34  ;;  %v1351_v8 = vmul.f32 %v3335_v5, %v753_v59 }
 0x14b   : > { %v4283_v26 = vadd.f32 %v2604_v31, %v2603_v4  ;;  %v987_v11 = vrot.slane %v876_v2, 1  ;;  %v1422_v50 = vmul.f32 %v3338_v9, %v753_v59  ;;  %v1423_v58 = vmul.f32 %v3338_v9, %v754_v34 }
 0x14c   : > { %v989_v12 = vrot.slane %v877_v33, 1  ;;  %v1229_v7 = vrot.slane %v1118_v3, 2  ;;  %v1231_v14 = vrot.slane %v1119_v60, 2  ;;  %v1383_v46 = vadd.f32 %v1351_v8, %v3680_v56  ;;  %v5523_v8 = vld [vmem:[#allocation46_spill] sm:$0xff] }
 0x14d   : > { %5521 = vst [vmem:[#allocation56_spill] sm:$0xff] %v4283_v26  ;;  %v1663_v29 = vmul.f32 %v3340_v10, %v753_v59  ;;  %v988_v41 = vsel %vm950_vm4, %v986_v15, %v987_v11  ;;  %v1530_v43 = vrot.slane %v1422_v50, 1  ;;  %v1532_v51 = vrot.slane %v1423_v58, 1 }
 0x14e   : > { %v990_v28 = vsel %vm950_vm4, %v987_v11, %v989_v12  ;;  %v1077_v55 = vadd.f32 %v988_v41, %v803_v6  ;;  %v1230_v4 = vsel %vm1192_vm5, %v1228_v27, %v1229_v7  ;;  %v1232_v31 = vsel %vm1192_vm5, %v1229_v7, %v1231_v14 }
 0x14f   : > { %v1078_v45 = vadd.f32 %v990_v28, %v804_v32  ;;  %v1531_v2 = vsel %vm950_vm4, %v1529_v42, %v1530_v43  ;;  %v1533_v33 = vsel %vm950_vm4, %v1530_v43, %v1532_v51  ;;  %v1664_v56 = vmul.f32 %v3340_v10, %v754_v34 }
 0x150   : > { %v1771_v3 = vrot.slane %v1663_v29, 2  ;;  %v4299_v60 = vadd.f32 %v1230_v4, %v1077_v55  ;;  %v1623_v11 = vadd.f32 %v1531_v2, %v5523_v8  ;;  %v1624_v12 = vadd.f32 %v1533_v33, %v1383_v46  ;;  %v461_v8 = vpop.f32.mrf.mxu1 }
 0x151   : > { %v4301_v15 = vadd.f32 %v1232_v31, %v1078_v45  ;;  %v1773_v32 = vrot.slane %v1664_v56, 2  ;;  %v1896_v27 = vmul.f32 %v3383_v0, %v753_v59  ;;  %v1966_v50 = vmul.f32 %v3352_v30, %v753_v59 }
 0x152   : > { %v1772_v6 = vsel %vm1192_vm5, %v1770_v24, %v1771_v3  ;;  %v1967_v58 = vmul.f32 %v3352_v30, %v754_v34  ;;  %v2207_v7 = vmul.f32 %v3356_v36, %v753_v59  ;;  %v2208_v14 = vmul.f32 %v3356_v36, %v754_v34  ;;  %v5524_v24 = vld [vmem:[#allocation43_spill] sm:$0xff] }
 0x153   : > { %5522 = vst [vmem:[#allocation57_spill] sm:$0xff] %v4301_v15  ;;  %v4307_v42 = vadd.f32 %v1772_v6, %v1623_v11  ;;  %v4314_v29 = vmul.f32 %v3338_v9, %v4073_v53  ;;  %v1774_v46 = vsel %vm1192_vm5, %v1771_v3, %v1773_v32  ;;  %v1928_v41 = vadd.f32 %v1896_v27, %v5524_v24  ;;  %v773_v6 = vld [vmem:[#allocation2 + $0x150] sm:$0xff] }
 0x154   : > { %v2072_v28 = vrot.slane %v1966_v50, 1  ;;  %v4318_v43 = vadd.f32 %v1774_v46, %v1624_v12  ;;  %v2074_v51 = vrot.slane %v1967_v58, 1  ;;  %v2313_v55 = vrot.slane %v2207_v7, 2  ;;  %v4370_v7 = vld [vmem:[#allocation2 + $0x158] sm:$0xff] }
 0x155   : > { %v2315_v45 = vrot.slane %v2208_v14, 2  ;;  %v4322_v4 = vmul.f32 %v3340_v10, %v4073_v53  ;;  %v1903_v59 = vmul.f32 %v3383_v0, %v4073_v53  ;;  %v4328_v34 = vmul.f32 %v3352_v30, %v4073_v53  ;;  %v4372_v14 = vld [vmem:[#allocation2 + $0x160] sm:$0x3] }
 0x156   : > { %5525 = vst [vmem:[#allocation46_spill] sm:$0xff] %v4318_v43  ;;  %v2073_v31 = vsel %vm950_vm4, %v2071_v52, %v2072_v28  ;;  %v2075_v2 = vsel %vm950_vm4, %v2072_v28, %v2074_v51  ;;  %v2314_v56 = vsel %vm1192_vm5, %v2312_v35, %v2313_v55  ;;  %v5526_v11 = vrot.slane %v4052_v62, 2 }
 0x157   : > { %v2168_v33 = vadd.f32 %v2073_v31, %v4261_v25  ;;  %v2316_v3 = vsel %vm1192_vm5, %v2313_v55, %v2315_v45  ;;  %v4346_v18 = vmul.f32 %v3383_v0, %v3915_v19  ;;  %v4350_v52 = vmul.f32 %v3356_v36, %v4073_v53 }
 0x158   : > { %v4342_v12 = vsel %vm1192_vm5, %v5526_v11, %v2345_v54  ;;  %v2169_v25 = vadd.f32 %v2075_v2, %v1928_v41  ;;  %v4354_v35 = vadd.f32 %v4248_v44, %v4245_v23  ;;  %v4358_v38 = vmul.f32 %v3285_v22, %v4073_v53 }
 0x159   : > { %5527 = vst [vmem:[#allocation43_spill] sm:$0xff] %v4342_v12  ;;  %v2409_v54 = vadd.f32 %v2314_v56, %v2168_v33  ;;  %v524_v50 = vmul.f32 %v4025_v40, %v461_v8  ;;  %v4366_v23 = vadd.f32 %v1903_v59, %v4254_v47  ;;  %v4378_v41 = vmul.f32 %v3266_v16, %v4370_v7 }
 0x15a   : > { %5528 = vst [vmem:[#allocation58_spill] sm:$0xff] %v4346_v18  ;;  %v2410_v27 = vadd.f32 %v2316_v3, %v2169_v25  ;;  %v898_v47 = vmul.f32 %v3266_v16, %v4372_v14  ;;  %v4383_v28 = vmul.f32 %v3285_v22, %v773_v6  ;;  %v4386_v51 = vmul.f32 %v3266_v16, %v773_v6 }
 0x15b   : > { %v2445_v53 = vmul.f32 %v3630_v13, %v2409_v54  ;;  %5529 = vst [vmem:[#allocation59_spill] sm:$0xff] %v4378_v41  ;;  %v1364_v55 = vmul.f32 %v3335_v5, %v773_v6  ;;  %v4391_v59 = vmul.f32 %v3269_v17, %v773_v6  ;;  %v4398_v2 = vadd.f32 %v4070_v20, %v524_v50  ;;  %v5535_v50 = vld [vmem:[#allocation49_spill] sm:$0xff] }
 0x15c   : > { %v2446_v24 = vmul.f32 %v3630_v13, %v2410_v27  ;;  %5530 = vst [vmem:[#allocation60_spill] sm:$0xff] %v4383_v28  ;;  %v4394_v13 = vmul.f32 %v3338_v9, %v773_v6  ;;  %v4401_v33 = vmul.f32 %v3340_v10, %v773_v6  ;;  %v4404_v56 = vmul.f32 %v3383_v0, %v773_v6 }
 0x15d   : > { %5531 = vst [vmem:[#allocation61_spill] sm:$0xff] %v4386_v51  ;;  %v2481_v45 = vadd.f32 %v3639_v49, %v2445_v53  ;;  %v4408_v8 = vmul.f32 %v3269_v17, %v4370_v7  ;;  %v4411_v11 = vmul.f32 %v3352_v30, %v773_v6  ;;  %v1024_v54 = vrot.slane %v898_v47, 1  ;;  %v765_v47 = vld [vmem:[#allocation2 + $0x110] sm:$0xff] }
 0x15e   : > { %5532 = vst [vmem:[#allocation62_spill] sm:$0xff] %v4391_v59  ;;  %v2482_v31 = vadd.f32 %v3639_v49, %v2446_v24  ;;  %v5425_v49 = vrot.slane %v4378_v41, 1  ;;  %v4416_v53 = vadd.f32 %v1364_v55, %v5535_v50  ;;  %v4419_v24 = vmul.f32 %v3356_v36, %v773_v6  ;;  %v5540_v41 = vld [vmem:[#allocation16_spill] sm:$0xff] }
 0x15f   : > { %5533 = vst [vmem:[#allocation63_spill] sm:$0xff] %v4404_v56  ;;  %v2513_v3 = vmax.f32 %v2481_v45, 0.0  ;;  %v4436_v6 = vmul.f32 %v3269_v17, %v4372_v14  ;;  %v888_v50 = vmul.f32 %v3266_v16, %v765_v47  ;;  %v1365_v58 = vmul.f32 %v3335_v5, %v4370_v7 }
 0x160   : > { %5534 = vst [vmem:[#allocation64_spill] sm:$0xff] %v4408_v8  ;;  %v2514_v25 = vmax.f32 %v2482_v31, 0.0  ;;  %v4428_v31 = vmul.f32 %v3285_v22, %v4370_v7  ;;  %v4450_v27 = vsel %vm950_vm4, %v5425_v49, %v1024_v54  ;;  %v1130_v46 = vmul.f32 %v3269_v17, %v765_v47 }
 0x161   : > { %v4421_v45 = vmin.f32 %v2513_v3, 6.0  ;;  %v4441_v3 = vmul.f32 %v3338_v9, %v4370_v7  ;;  %v1444_v32 = vmul.f32 %v3338_v9, %v4372_v14  ;;  %v812_v19 = vmul.f32 %v3285_v22, %v765_v47 }
 0x162   : > { %v4424_v44 = vmin.f32 %v2514_v25, 6.0  ;;  %v766_v25 = vld [vmem:[#allocation2 + $0x118] sm:$0x3]  ;;  %v1007_v62 = vrot.slane %v888_v50, 1  ;;  %v1249_v26 = vrot.slane %v1130_v46, 2  ;;  %v1359_v54 = vmul.f32 %v3335_v5, %v765_v47 }
 0x163   : > { %5536 = vst [vmem:[#allocation49_spill] sm:$0xff] %v4421_v45  ;;  %v889_v55 = vmul.f32 %v3266_v16, %v766_v25  ;;  %v1434_v49 = vmul.f32 %v3338_v9, %v765_v47  ;;  %v1565_v28 = vrot.slane %v4441_v3, 1  ;;  %v5538_v12 = vrot.slane %v4270_v57, 1 }
 0x164   : > { %5537 = vst [vmem:[#allocation65_spill] sm:$0xff] %v4424_v44  ;;  %v1435_v56 = vmul.f32 %v3338_v9, %v766_v25  ;;  %v1391_v18 = vadd.f32 %v1359_v54, %v5540_v41  ;;  %v1979_v54 = vmul.f32 %v3352_v30, %v766_v25 }
 0x165   : > { %2577 = vst.msk [vmem:[%s3734_s10 + $0x50] sm:$0xff] %vm642_vm2, %v4421_v45  ;;  %v1009_v45 = vrot.slane %v889_v55, 1  ;;  %v1008_v39 = vsel %vm950_vm4, %v5538_v12, %v1007_v62  ;;  %v5539_v55 = vrot.slane %v4274_v37, 2  ;;  %v1550_v15 = vrot.slane %v1434_v49, 1 }
 0x166   : > { %2578 = vst.msk [vmem:[%s3734_s10 + $0x58] sm:$0xff] %vm642_vm2, %v4424_v44  ;;  %v1131_v44 = vmul.f32 %v3269_v17, %v766_v25  ;;  %v1085_v50 = vadd.f32 %v1008_v39, %v4358_v38  ;;  %v1552_v57 = vrot.slane %v1435_v56, 1  ;;  %v1675_v12 = vmul.f32 %v3340_v10, %v765_v47 }
 0x167   : > { %v1010_v51 = vsel %vm950_vm4, %v1007_v62, %v1009_v45  ;;  %v1250_v46 = vsel %vm1192_vm5, %v5539_v55, %v1249_v26  ;;  %v1904_v62 = vmul.f32 %v3383_v0, %v765_v47  ;;  %v5543_v37 = vrot.slane %v4314_v29, 1 }
 0x168   : > { %v1251_v48 = vrot.slane %v1131_v44, 2  ;;  %v1086_v43 = vadd.f32 %v1010_v51, %v812_v19  ;;  %v4474_v63 = vadd.f32 %v1250_v46, %v1085_v50  ;;  %v1676_v44 = vmul.f32 %v3340_v10, %v766_v25 }
 0x169   : > { %v1551_v38 = vsel %vm950_vm4, %v5543_v37, %v1550_v15  ;;  %v1553_v19 = vsel %vm950_vm4, %v1550_v15, %v1552_v57  ;;  %v1791_v56 = vrot.slane %v1675_v12, 2  ;;  %v1567_v45 = vrot.slane %v1444_v32, 1 }
 0x16a   : > { %v1252_v3 = vsel %vm1192_vm5, %v1249_v26, %v1251_v48  ;;  %5541 = vst [vmem:[#allocation16_spill] sm:$0xff] %v4474_v63  ;;  %v1978_v48 = vmul.f32 %v3352_v30, %v765_v47  ;;  %v5544_v26 = vld [vmem:[#allocation52_spill] sm:$0xff]  ;;  %v1632_v51 = vadd.f32 %v1553_v19, %v1391_v18  ;;  %v1793_v49 = vrot.slane %v1676_v44, 2  ;;  %v5549_v19 = vld [vmem:[#allocation50_spill] sm:$0xff] }
 0x16b   : > { %v4479_v39 = vadd.f32 %v1252_v3, %v1086_v43  ;;  %v1631_v41 = vadd.f32 %v1551_v38, %v5544_v26  ;;  %v2219_v43 = vmul.f32 %v3356_v36, %v765_v47  ;;  %v5545_v55 = vrot.slane %v4322_v4, 2 }
 0x16c   : > { %v2092_v50 = vrot.slane %v1978_v48, 1  ;;  %v1794_v46 = vsel %vm1192_vm5, %v1791_v56, %v1793_v49  ;;  %v1936_v15 = vadd.f32 %v1904_v62, %v4354_v35  ;;  %v2220_v3 = vmul.f32 %v3356_v36, %v766_v25 }
 0x16d   : > { %5542 = vst [vmem:[#allocation66_spill] sm:$0xff] %v4479_v39  ;;  %v1792_v29 = vsel %vm1192_vm5, %v5545_v55, %v1791_v56  ;;  %v4497_v18 = vadd.f32 %v1794_v46, %v1632_v51  ;;  %v5548_v32 = vrot.slane %v4328_v34, 1  ;;  %v2094_v44 = vrot.slane %v1979_v54, 1 }
 0x16e   : > { %v4495_v57 = vadd.f32 %v1792_v29, %v1631_v41  ;;  %v1266_v47 = vrot.slane %v4436_v6, 2  ;;  %v2333_v37 = vrot.slane %v2219_v43, 2  ;;  %v2335_v38 = vrot.slane %v2220_v3, 2  ;;  %v496_v29 = vpop.f32.mrf.mxu3  ;;  %v463_v3 = vpop.f32.mrf.mxu1 }
 0x16f   : > { %5547 = vst [vmem:[#allocation67_spill] sm:$0xff] %v4497_v18  ;;  %v2093_v12 = vsel %vm950_vm4, %v5548_v32, %v2092_v50  ;;  %v1397_v48 = vadd.f32 %v1365_v58, %v5549_v19  ;;  %v5550_v35 = vrot.slane %v4394_v13, 1  ;;  %v1684_v62 = vmul.f32 %v3340_v10, %v4370_v7 }
 0x170   : > { %5546 = vst [vmem:[#allocation52_spill] sm:$0xff] %v4495_v57  ;;  %v2176_v4 = vadd.f32 %v2093_v12, %v4366_v23  ;;  %v2095_v34 = vsel %vm950_vm4, %v2092_v50, %v2094_v44  ;;  %v1685_v26 = vmul.f32 %v3340_v10, %v4372_v14  ;;  %v5551_v6 = vrot.slane %v4350_v52, 2 }
 0x171   : > { %v1566_v25 = vsel %vm950_vm4, %v5550_v35, %v1565_v28  ;;  %v2177_v41 = vadd.f32 %v2095_v34, %v1936_v15  ;;  %v2336_v51 = vsel %vm1192_vm5, %v2333_v37, %v2335_v38  ;;  %v1805_v58 = vrot.slane %v4401_v33, 2  ;;  %v4530_v33 = vld [vmem:[%s5416_s5] ss:$0 sm:$0xff] }
 0x172   : > { %v2334_v23 = vsel %vm1192_vm5, %v5551_v6, %v2333_v37  ;;  %v2106_v13 = vrot.slane %v4411_v11, 1  ;;  %v1568_v56 = vsel %vm950_vm4, %v1565_v28, %v1567_v45  ;;  %v2347_v54 = vrot.slane %v4419_v24, 2  ;;  %v4542_v37 = vld [vmem:[%s5417_s6] ss:$0 sm:$0xff] }
 0x173   : > { %v2417_v49 = vadd.f32 %v2334_v23, %v2176_v4  ;;  %v1092_v50 = vadd.f32 %v4450_v27, %v4428_v31  ;;  %v5552_v43 = vrot.slane %v4408_v8, 2  ;;  %v2418_v55 = vadd.f32 %v2336_v51, %v2177_v41  ;;  %v443_v31 = vpop.f32.mrf.mxu0 }
 0x174   : > { %v1637_v46 = vadd.f32 %v1566_v25, %v4416_v53  ;;  %v5553_v45 = vmax.f32 %v4398_v2, 0.0  ;;  %v538_v27 = vmul.f32 %v4025_v40, %v496_v29  ;;  %v1638_v32 = vadd.f32 %v1568_v56, %v1397_v48  ;;  %v481_v53 = vpop.f32.mrf.mxu2  ;;  %v743_v29 = vld [vmem:[#allocation2 + $0x60] sm:$0xff] }
 0x175   : > { %v1267_v52 = vsel %vm1192_vm5, %v5552_v43, %v1266_v47  ;;  %v2453_v28 = vmul.f32 %v4530_v33, %v2417_v49  ;;  %v1806_v12 = vrot.slane %v1684_v62, 2  ;;  %v1808_v44 = vrot.slane %v1685_v26, 2 }
 0x176   : > { %v624_v15 = vmin.f32 %v5553_v45, 6.0  ;;  %v2454_v47 = vmul.f32 %v4530_v33, %v2418_v55  ;;  %v1987_v4 = vmul.f32 %v3352_v30, %v4370_v7  ;;  %v574_v38 = vadd.f32 %v4070_v20, %v538_v27 }
 0x177   : > { %v2489_v2 = vadd.f32 %v4542_v37, %v2453_v28  ;;  %v532_v19 = vmul.f32 %v4025_v40, %v481_v53  ;;  %v1988_v48 = vmul.f32 %v3352_v30, %v4372_v14  ;;  %v517_v25 = vmul.f32 %v4025_v40, %v443_v31 }
 0x178   : > { %713 = vst.msk [vmem:[#allocation2 + $0xc1] sm:$0xff] %vm642_vm2, %v624_v15  ;;  %v2490_v35 = vadd.f32 %v4542_v37, %v2454_v47  ;;  %v525_v62 = vmul.f32 %v4025_v40, %v463_v3  ;;  %v2228_v34 = vmul.f32 %v3356_v36, %v4370_v7  ;;  %v606_v41 = vmax.f32 %v574_v38, 0.0 }
 0x179   : > { %v2521_v26 = vmax.f32 %v2489_v2, 0.0  ;;  %v568_v6 = vadd.f32 %v4070_v20, %v532_v19  ;;  %v2229_v23 = vmul.f32 %v3356_v36, %v4372_v14  ;;  %v553_v56 = vadd.f32 %v4070_v20, %v517_v25 }
 0x17a   : > { %v2522_v51 = vmax.f32 %v2490_v35, 0.0  ;;  %v561_v49 = vadd.f32 %v4070_v20, %v525_v62  ;;  %v1807_v43 = vsel %vm1192_vm5, %v1805_v58, %v1806_v12  ;;  %v638_v28 = vmin.f32 %v606_v41, 6.0 }
 0x17b   : > { %v4561_v55 = vmin.f32 %v2521_v26, 6.0  ;;  %v600_v45 = vmax.f32 %v568_v6, 0.0  ;;  %v1809_v15 = vsel %vm1192_vm5, %v1806_v12, %v1808_v44  ;;  %v585_v31 = vmax.f32 %v553_v56, 0.0 }
 0x17c   : > { %v4564_v27 = vmin.f32 %v2522_v51, 6.0  ;;  %v593_v14 = vmax.f32 %v561_v49, 0.0  ;;  %v2107_v3 = vrot.slane %v1987_v4, 1  ;;  %v2109_v47 = vrot.slane %v1988_v48, 1  ;;  %727 = vst.msk [vmem:[#allocation2 + $0x169] sm:$0xff] %vm642_vm2, %v638_v28  ;;  %v2882_v48 = vld [vmem:[#allocation2 + $0x80] sm:$0xff]  ;;  %v498_v49 = vpop.f32.mrf.mxu3 }
 0x17d   : > { %5554 = vst [vmem:[#allocation50_spill] sm:$0xff] %v4561_v55  ;;  %v2348_v53 = vrot.slane %v2228_v34, 2  ;;  %v632_v2 = vmin.f32 %v600_v45, 6.0  ;;  %v2350_v38 = vrot.slane %v2229_v23, 2  ;;  %v4573_v58 = vmul.f32 %v3266_v16, %v743_v29  ;;  %v2883_v28 = vld [vmem:[#allocation2 + $0xe0] sm:$0xff] }
 0x17e   : > { %5555 = vst [vmem:[#allocation68_spill] sm:$0xff] %v4564_v27  ;;  %v617_v19 = vmin.f32 %v585_v31, 6.0  ;;  %v625_v12 = vmin.f32 %v593_v14, 6.0  ;;  %v4576_v35 = vadd.f32 %v1267_v52, %v1092_v50  ;;  %v4579_v4 = vmul.f32 %v3269_v17, %v743_v29 }
 0x17f   : > { %2585 = vst.msk [vmem:[%s3734_s10 + $0x90] sm:$0xff] %vm642_vm2, %v4561_v55  ;;  %v4583_v25 = vmul.f32 %v2882_v48, %v3335_v5  ;;  %v4587_v62 = vmul.f32 %v3383_v0, %v4370_v7  ;;  %v1344_v34 = vmul.f32 %v3335_v5, %v743_v29  ;;  %v4591_v26 = vmul.f32 %v3338_v9, %v743_v29 }
 0x180   : > { %2586 = vst.msk [vmem:[%s3734_s10 + $0x98] sm:$0xff] %vm642_vm2, %v4564_v27  ;;  %v4594_v50 = vmul.f32 %v3340_v10, %v743_v29  ;;  %v4597_v52 = vadd.f32 %v1807_v43, %v1637_v46  ;;  %v4599_v41 = vadd.f32 %v1809_v15, %v1638_v32  ;;  %v4604_v6 = vsel %vm950_vm4, %v2106_v13, %v2107_v3 }
 0x181   : > { %5556 = vst [vmem:[#allocation69_spill] sm:$0xff] %v4576_v35  ;;  %v4607_v7 = vsel %vm950_vm4, %v2107_v3, %v2109_v47  ;;  %v4613_v23 = vsel %vm1192_vm5, %v2347_v54, %v2348_v53  ;;  %v4616_v46 = vsel %vm1192_vm5, %v2348_v53, %v2350_v38  ;;  %v4619_v32 = vmul.f32 %v3285_v22, %v743_v29  ;;  %v755_v54 = vld [vmem:[#allocation2 + $0xc0] sm:$0xff] }
 0x182   : > { %5557 = vst [vmem:[#allocation70_spill] sm:$0xff] %v4587_v62  ;;  %v971_v11 = vrot.slane %v4573_v58, 1  ;;  %v1889_v51 = vmul.f32 %v3383_v0, %v743_v29  ;;  %v4626_v56 = vmul.f32 %v3352_v30, %v743_v29  ;;  %v4629_v24 = vmul.f32 %v3356_v36, %v743_v29 }
 0x183   : > { %721 = vst.msk [vmem:[#allocation2 + $0x121] sm:$0xff] %vm642_vm2, %v632_v2  ;;  %v4632_v43 = vadd.f32 %v1344_v34, %v4145_v21  ;;  %v4637_v15 = vmul.f32 %v3266_v16, %v755_v54  ;;  %v4640_v31 = vmul.f32 %v3269_v17, %v755_v54  ;;  %v1352_v14 = vmul.f32 %v3335_v5, %v755_v54  ;;  %v4669_v45 = vld [vmem:[#allocation2 + $0x168] sm:$0xff] }
 0x184   : > { %5558 = vst [vmem:[#allocation71_spill] sm:$0xff] %v4599_v41  ;;  %v4644_v29 = vmul.f32 %v3338_v9, %v755_v54  ;;  %v4647_v3 = vmul.f32 %v3340_v10, %v755_v54  ;;  %v1897_v21 = vmul.f32 %v3383_v0, %v755_v54  ;;  %v4651_v47 = vmul.f32 %v3352_v30, %v755_v54 }
 0x185   : > { %5559 = vst [vmem:[#allocation72_spill] sm:$0xff] %v4604_v6  ;;  %v4654_v53 = vmul.f32 %v3356_v36, %v755_v54  ;;  %v539_v2 = vmul.f32 %v4025_v40, %v498_v49  ;;  %v4658_v38 = vadd.f32 %v1889_v51, %v4191_v61  ;;  %v4666_v34 = vmul.f32 %v3285_v22, %v755_v54 }
 0x186   : > { %5560 = vst [vmem:[#allocation73_spill] sm:$0xff] %v4607_v7  ;;  %v4672_v40 = vmul.f32 %v2883_v28, %v3335_v5  ;;  %v4675_v61 = vmul.f32 %v2883_v28, %v3383_v0  ;;  %v4679_v49 = vadd.f32 %v1352_v14, %v4299_v60  ;;  %v4684_v44 = vadd.f32 %v1897_v21, %v4307_v42 }
 0x187   : > { %706 = vst.msk [vmem:[#allocation2 + $0x69] sm:$0xff] %vm642_vm2, %v617_v19  ;;  %v4689_v28 = vadd.f32 %v4070_v20, %v539_v2  ;;  %v4693_v60 = vmul.f32 %v3266_v16, %v4669_v45  ;;  %v4697_v14 = vmul.f32 %v3338_v9, %v4669_v45  ;;  %v4701_v42 = vmul.f32 %v3383_v0, %v4669_v45 }
 0x188   : > { %5561 = vst [vmem:[#allocation74_spill] sm:$0xff] %v4613_v23  ;;  %v4705_v21 = vmul.f32 %v3352_v30, %v4669_v45  ;;  %v4711_v20 = vmul.f32 %v3356_v36, %v4669_v45  ;;  %v5569_v41 = vrot.slane %v4579_v4, 2 }
 0x189   : > { %5562 = vst [vmem:[#allocation75_spill] sm:$0xff] %v4616_v46 }
 0x18a   : > { %714 = vst.msk [vmem:[#allocation2 + $0xc9] sm:$0xff] %vm642_vm2, %v625_v12  ;;  %v4663_v12 = vmul.f32 %v2882_v48, %v3383_v0  ;;  %v4707_v13 = vld [vmem:[#allocation2 + $0x120] sm:$0xff] }
 0x18b   : > { %5563 = vst [vmem:[#allocation76_spill] sm:$0xff] %v4669_v45  ;;  %v4715_v2 = vmul.f32 %v3285_v22, %v4707_v13  ;;  %v4719_v58 = vmul.f32 %v3266_v16, %v4707_v13  ;;  %v4724_v48 = vmul.f32 %v3269_v17, %v4707_v13  ;;  %v4728_v51 = vmul.f32 %v3335_v5, %v4707_v13 }
 0x18c   : > { %5564 = vst [vmem:[#allocation77_spill] sm:$0xff] %v4693_v60 }
 0x18d   : > { %5565 = vst [vmem:[#allocation78_spill] sm:$0xff] %v4697_v14 }
 0x18e   : > { %v744_v19 = vld [vmem:[#allocation2 + $0x68] sm:$0xff]  ;;  %v745_v27 = vld [vmem:[#allocation2 + $0x70] sm:$0x3]  ;;  %5566 = vst [vmem:[#allocation79_spill] sm:$0xff] %v4715_v2 }
 0x18f   : > { %v867_v54 = vmul.f32 %v3266_v16, %v744_v19  ;;  %5567 = vst [vmem:[#allocation80_spill] sm:$0xff] %v4724_v48  ;;  %v868_v55 = vmul.f32 %v3266_v16, %v745_v27  ;;  %v1109_v35 = vmul.f32 %v3269_v17, %v744_v19  ;;  %v798_v14 = vmul.f32 %v3285_v22, %v744_v19 }
 0x190   : > { %5568 = vst [vmem:[#allocation81_spill] sm:$0xff] %v4728_v51  ;;  %v1110_v8 = vmul.f32 %v3269_v17, %v745_v27  ;;  %v1345_v60 = vmul.f32 %v3335_v5, %v744_v19  ;;  %v1413_v23 = vmul.f32 %v3338_v9, %v744_v19  ;;  %v1414_v7 = vmul.f32 %v3338_v9, %v745_v27 }
 0x191   : > { %v972_v59 = vrot.slane %v867_v54, 1  ;;  %v974_v45 = vrot.slane %v868_v55, 1  ;;  %v1214_v46 = vrot.slane %v1109_v35, 2  ;;  %v1654_v39 = vmul.f32 %v3340_v10, %v744_v19 }
 0x192   : > { %v1216_v62 = vrot.slane %v1110_v8, 2  ;;  %v1377_v18 = vadd.f32 %v1345_v60, %v4151_v1  ;;  %v1515_v35 = vrot.slane %v1413_v23, 1  ;;  %v1517_v63 = vrot.slane %v1414_v7, 1 }
 0x193   : > { %v973_v6 = vsel %vm950_vm4, %v971_v11, %v972_v59  ;;  %v975_v2 = vsel %vm950_vm4, %v972_v59, %v974_v45  ;;  %v1215_v55 = vsel %vm1192_vm5, %v5569_v41, %v1214_v46  ;;  %v1655_v11 = vmul.f32 %v3340_v10, %v745_v27 }
 0x194   : > { %v1071_v54 = vadd.f32 %v973_v6, %v4619_v32  ;;  %v1072_v57 = vadd.f32 %v975_v2, %v798_v14  ;;  %v1217_v51 = vsel %vm1192_vm5, %v1214_v46, %v1216_v62  ;;  %v5570_v1 = vrot.slane %v4591_v26, 1  ;;  %v5571_v32 = vld [vmem:[#allocation9_spill] sm:$0xff]  ;;  %v5573_v14 = vld [vmem:[#allocation55_spill] sm:$0xff] }
 0x195   : > { %v1756_v48 = vrot.slane %v1654_v39, 2  ;;  %v1890_v59 = vmul.f32 %v3383_v0, %v744_v19  ;;  %v1518_v4 = vsel %vm950_vm4, %v1515_v35, %v1517_v63  ;;  %v1758_v23 = vrot.slane %v1655_v11, 2  ;;  %v5574_v63 = vld [vmem:[#allocation15_spill] sm:$0xff]  ;;  %v5576_v11 = vld [vmem:[#allocation10_spill] sm:$0xff] }
 0x196   : > { %v1313_v8 = vadd.f32 %v1215_v55, %v1071_v54  ;;  %v1516_v60 = vsel %vm950_vm4, %v5570_v1, %v1515_v35  ;;  %v1314_v6 = vadd.f32 %v1217_v51, %v1072_v57  ;;  %v1618_v62 = vadd.f32 %v1518_v4, %v1377_v18  ;;  %v5575_v35 = vld [vmem:[#allocation17_spill] sm:$0xff] }
 0x197   : > { %v1617_v41 = vadd.f32 %v1516_v60, %v4632_v43  ;;  %v5572_v7 = vrot.slane %v4594_v50, 2  ;;  %v1922_v26 = vadd.f32 %v1890_v59, %v5573_v14  ;;  %v1759_v39 = vsel %vm1192_vm5, %v1756_v48, %v1758_v23 }
 0x198   : > { %v1378_v45 = vadd.f32 %v5571_v32, %v1313_v8  ;;  %v1379_v2 = vadd.f32 %v4583_v25, %v1314_v6  ;;  %v1957_v57 = vmul.f32 %v3352_v30, %v744_v19  ;;  %v1859_v43 = vadd.f32 %v1759_v39, %v1618_v62  ;;  %v5577_v25 = vld [vmem:[#allocation18_spill] sm:$0xff]  ;;  %v5582_v39 = vld [vmem:[#allocation21_spill] sm:$0xff] }
 0x199   : > { %v1757_v46 = vsel %vm1192_vm5, %v5572_v7, %v1756_v48  ;;  %v1958_v55 = vmul.f32 %v3352_v30, %v745_v27  ;;  %v2198_v18 = vmul.f32 %v3356_v36, %v744_v19  ;;  %v2199_v60 = vmul.f32 %v3356_v36, %v745_v27  ;;  %v5580_v19 = vld [vmem:[#allocation20_spill] sm:$0xff] }
 0x19a   : > { %v1858_v54 = vadd.f32 %v1757_v46, %v1617_v41  ;;  %v1619_v51 = vadd.f32 %v5574_v63, %v1378_v45  ;;  %v1620_v50 = vadd.f32 %v5575_v35, %v1379_v2  ;;  %v2057_v1 = vrot.slane %v1957_v57, 1  ;;  %v5578_v41 = vld [vmem:[#allocation19_spill] sm:$0xff]  ;;  %v5581_v46 = vld [vmem:[#allocation14_spill] sm:$0xff] }
 0x19b   : > { %v1924_v48 = vadd.f32 %v4663_v12, %v1859_v43  ;;  %v2059_v6 = vrot.slane %v1958_v55, 1  ;;  %v2298_v4 = vrot.slane %v2198_v18, 2  ;;  %v5579_v32 = vrot.slane %v4626_v56, 1  ;;  %v4778_v12 = vld [vmem:[#allocation2 + $0xc8] sm:$0xff]  ;;  %v5583_v57 = vld [vmem:[#allocation42_spill] sm:$0xff] }
 0x19c   : > { %v1923_v8 = vadd.f32 %v5576_v11, %v1858_v54  ;;  %v1860_v59 = vadd.f32 %v5577_v25, %v1619_v51  ;;  %v1861_v23 = vadd.f32 %v5578_v41, %v1620_v50  ;;  %v2300_v7 = vrot.slane %v2199_v60, 2  ;;  %v5585_v18 = vld [vmem:[#allocation23_spill] sm:$0xff]  ;;  %v5586_v11 = vld [vmem:[#allocation22_spill] sm:$0xff]  ;;  %v4788_v60 = vld [vmem:[#allocation2 + $0xd0] sm:$0x3] }
 0x19d   : > { %v2058_v45 = vsel %vm950_vm4, %v5579_v32, %v2057_v1  ;;  %v2060_v2 = vsel %vm950_vm4, %v2057_v1, %v2059_v6  ;;  %v2165_v54 = vadd.f32 %v5582_v39, %v1924_v48  ;;  %v5584_v56 = vrot.slane %v4629_v24, 2  ;;  %v5587_v1 = vld [vmem:[#allocation27_spill] sm:$0xff]  ;;  %v5589_v6 = vld [vmem:[#allocation25_spill] sm:$0xff] }
 0x19e   : > { %v2164_v62 = vadd.f32 %v5580_v19, %v1923_v8  ;;  %v1925_v14 = vadd.f32 %v5581_v46, %v1860_v59  ;;  %v2162_v27 = vadd.f32 %v2058_v45, %v4658_v38  ;;  %v1926_v63 = vadd.f32 %v5583_v57, %v1861_v23  ;;  %v5590_v45 = vld [vmem:[#allocation26_spill] sm:$0xff] }
 0x19f   : > { %v2163_v51 = vadd.f32 %v2060_v2, %v1922_v26  ;;  %v2299_v43 = vsel %vm1192_vm5, %v5584_v56, %v2298_v4  ;;  %v2301_v55 = vsel %vm1192_vm5, %v2298_v4, %v2300_v7  ;;  %v2406_v38 = vadd.f32 %v5587_v1, %v2165_v54  ;;  %v5588_v26 = vld [vmem:[#allocation24_spill] sm:$0xff] }
 0x1a0   : > { %v2166_v35 = vadd.f32 %v5585_v18, %v1925_v14  ;;  %v2403_v50 = vadd.f32 %v2299_v43, %v2162_v27  ;;  %v2405_v8 = vadd.f32 %v5586_v11, %v2164_v62  ;;  %v4792_v25 = vmul.f32 %v3338_v9, %v4707_v13 }
 0x1a1   : > { %v2167_v59 = vadd.f32 %v5588_v26, %v1926_v63  ;;  %v2404_v24 = vadd.f32 %v2301_v55, %v2163_v51  ;;  %v879_v48 = vmul.f32 %v3266_v16, %v4778_v12  ;;  %v2442_v32 = vmul.f32 %v4530_v33, %v2406_v38 }
 0x1a2   : > { %v2407_v4 = vadd.f32 %v5589_v6, %v2166_v35  ;;  %v2439_v41 = vmul.f32 %v4530_v33, %v2403_v50  ;;  %v2441_v23 = vmul.f32 %v4530_v33, %v2405_v8  ;;  %v880_v7 = vmul.f32 %v3266_v16, %v4788_v60 }
 0x1a3   : > { %v2408_v19 = vadd.f32 %v5590_v45, %v2167_v59  ;;  %v2440_v62 = vmul.f32 %v4530_v33, %v2404_v24  ;;  %v992_v46 = vrot.slane %v879_v48, 1  ;;  %v2478_v39 = vadd.f32 %v4542_v37, %v2442_v32 }
 0x1a4   : > { %v2443_v14 = vmul.f32 %v4530_v33, %v2407_v4  ;;  %v2475_v2 = vadd.f32 %v4542_v37, %v2439_v41  ;;  %v2477_v27 = vadd.f32 %v4542_v37, %v2441_v23  ;;  %v5591_v63 = vrot.slane %v4637_v15, 1 }
 0x1a5   : > { %v2444_v54 = vmul.f32 %v4530_v33, %v2408_v19  ;;  %v2476_v57 = vadd.f32 %v4542_v37, %v2440_v62  ;;  %v994_v56 = vrot.slane %v880_v7, 1  ;;  %v2510_v35 = vmax.f32 %v2478_v39, 0.0 }
 0x1a6   : > { %v993_v51 = vsel %vm950_vm4, %v5591_v63, %v992_v46  ;;  %v2479_v43 = vadd.f32 %v4542_v37, %v2443_v14  ;;  %v2507_v55 = vmax.f32 %v2475_v2, 0.0  ;;  %v2509_v18 = vmax.f32 %v2477_v27, 0.0  ;;  %v5592_v14 = vld [vmem:[#allocation57_spill] sm:$0xff] }
 0x1a7   : > { %v2480_v50 = vadd.f32 %v4542_v37, %v2444_v54  ;;  %v2508_v11 = vmax.f32 %v2476_v57, 0.0  ;;  %v806_v8 = vmul.f32 %v3285_v22, %v4778_v12  ;;  %v995_v1 = vsel %vm950_vm4, %v992_v46, %v994_v56 }
 0x1a8   : > { %v2511_v38 = vmax.f32 %v2479_v43, 0.0  ;;  %v4819_v15 = vmin.f32 %v2507_v55, 6.0  ;;  %v4821_v26 = vmin.f32 %v2509_v18, 6.0  ;;  %v1079_v59 = vadd.f32 %v993_v51, %v4666_v34 }
 0x1a9   : > { %v2512_v24 = vmax.f32 %v2480_v50, 0.0  ;;  %v4824_v48 = vmin.f32 %v2508_v11, 6.0  ;;  %v4826_v6 = vmin.f32 %v2510_v35, 6.0  ;;  %v1121_v4 = vmul.f32 %v3269_v17, %v4778_v12 }
 0x1aa   : > { %v4830_v41 = vmin.f32 %v2511_v38, 6.0  ;;  %2571 = vst.msk [vmem:[%s3734_s10 + $0x20] sm:$0xff] %vm642_vm2, %v4819_v15  ;;  %v1122_v23 = vmul.f32 %v3269_v17, %v4788_v60  ;;  %v1353_v34 = vmul.f32 %v3335_v5, %v4778_v12  ;;  %v1425_v32 = vmul.f32 %v3338_v9, %v4778_v12  ;;  %v5595_v38 = vld [vmem:[#allocation11_spill] sm:$0xff] }
 0x1ab   : > { %v4841_v45 = vmin.f32 %v2512_v24, 6.0  ;;  %2572 = vst.msk [vmem:[%s3734_s10 + $0x28] sm:$0xff] %vm642_vm2, %v4824_v48  ;;  %v1080_v19 = vadd.f32 %v995_v1, %v806_v8  ;;  %v1234_v62 = vrot.slane %v1121_v4, 2  ;;  %v1426_v7 = vmul.f32 %v3338_v9, %v4788_v60 }
 0x1ac   : > { %2573 = vst.msk [vmem:[%s3734_s10 + $0x30] sm:$0xff] %vm642_vm2, %v4821_v26  ;;  %v1236_v46 = vrot.slane %v1122_v23, 2  ;;  %v1385_v2 = vadd.f32 %v1353_v34, %v5592_v14  ;;  %v1535_v27 = vrot.slane %v1425_v32, 1  ;;  %v1666_v39 = vmul.f32 %v3340_v10, %v4778_v12 }
 0x1ad   : > { %2574 = vst.msk [vmem:[%s3734_s10 + $0x38] sm:$0xff] %vm642_vm2, %v4826_v6  ;;  %v5593_v54 = vrot.slane %v4640_v31, 2  ;;  %v1537_v63 = vrot.slane %v1426_v7, 1  ;;  %v1667_v51 = vmul.f32 %v3340_v10, %v4788_v60  ;;  %v1898_v56 = vmul.f32 %v3383_v0, %v4778_v12 }
 0x1ae   : > { %2575 = vst.msk [vmem:[%s3734_s10 + $0x40] sm:$0xff] %vm642_vm2, %v4830_v41  ;;  %v1237_v43 = vsel %vm1192_vm5, %v1234_v62, %v1236_v46  ;;  %v5594_v18 = vrot.slane %v4644_v29, 1  ;;  %v1776_v31 = vrot.slane %v1666_v39, 2  ;;  %v5596_v23 = vrot.slane %v4647_v3, 2  ;;  %v5597_v29 = vld [vmem:[#allocation46_spill] sm:$0xff]  ;;  %v5598_v46 = vld [vmem:[#allocation28_spill] sm:$0xff] }
 0x1af   : > { %v1235_v57 = vsel %vm1192_vm5, %v5593_v54, %v1234_v62  ;;  %2576 = vst.msk [vmem:[%s3734_s10 + $0x48] sm:$0xff] %vm642_vm2, %v4841_v45  ;;  %v1322_v50 = vadd.f32 %v1237_v43, %v1080_v19  ;;  %v1538_v11 = vsel %vm950_vm4, %v1535_v27, %v1537_v63  ;;  %v1778_v1 = vrot.slane %v1667_v51, 2  ;;  %v5600_v54 = vld [vmem:[#allocation12_spill] sm:$0xff]  ;;  %v5601_v51 = vld [vmem:[#allocation30_spill] sm:$0xff] }
 0x1b0   : > { %v1321_v55 = vadd.f32 %v1235_v57, %v1079_v59  ;;  %v1536_v35 = vsel %vm950_vm4, %v5594_v18, %v1535_v27  ;;  %v1626_v4 = vadd.f32 %v1538_v11, %v1385_v2  ;;  %v1777_v59 = vsel %vm1192_vm5, %v5596_v23, %v1776_v31  ;;  %v5599_v27 = vld [vmem:[#allocation29_spill] sm:$0xff]  ;;  %v5604_v11 = vld [vmem:[#allocation32_spill] sm:$0xff] }
 0x1b1   : > { %v1625_v8 = vadd.f32 %v1536_v35, %v4679_v49  ;;  %v1930_v34 = vadd.f32 %v1898_v56, %v5597_v29  ;;  %v1387_v32 = vadd.f32 %v4672_v40, %v1322_v50  ;;  %v1779_v62 = vsel %vm1192_vm5, %v1776_v31, %v1778_v1  ;;  %v5602_v35 = vld [vmem:[#allocation31_spill] sm:$0xff]  ;;  %v5606_v23 = vld [vmem:[#allocation33_spill] sm:$0xff]  ;;  %v501_v29 = vpop.f32.mrf.mxu3 }
 0x1b2   : > { %v1386_v24 = vadd.f32 %v5595_v38, %v1321_v55  ;;  %v1969_v19 = vmul.f32 %v3352_v30, %v4778_v12  ;;  %v1867_v14 = vadd.f32 %v1779_v62, %v1626_v4  ;;  %v1970_v2 = vmul.f32 %v3352_v30, %v4788_v60  ;;  %v5605_v38 = vld [vmem:[#allocation37_spill] sm:$0xff] }
 0x1b3   : > { %v1866_v7 = vadd.f32 %v1777_v59, %v1625_v8  ;;  %v2210_v3 = vmul.f32 %v3356_v36, %v4778_v12  ;;  %v1628_v39 = vadd.f32 %v5599_v27, %v1387_v32  ;;  %v2211_v63 = vmul.f32 %v3356_v36, %v4788_v60  ;;  %v5607_v32 = vld [vmem:[#allocation58_spill] sm:$0xff] }
 0x1b4   : > { %v1627_v49 = vadd.f32 %v5598_v46, %v1386_v24  ;;  %v2077_v40 = vrot.slane %v1969_v19, 1  ;;  %v1932_v43 = vadd.f32 %v4675_v61, %v1867_v14  ;;  %v2079_v55 = vrot.slane %v1970_v2, 1  ;;  %v483_v61 = vpop.f32.mrf.mxu2 }
 0x1b5   : > { %v1931_v57 = vadd.f32 %v5600_v54, %v1866_v7  ;;  %v2318_v18 = vrot.slane %v2210_v3, 2  ;;  %v1869_v31 = vadd.f32 %v5602_v35, %v1628_v39  ;;  %v5603_v50 = vrot.slane %v4651_v47, 1  ;;  %v5610_v3 = vld [vmem:[#allocation13_spill] sm:$0xff]  ;;  %v5611_v39 = vld [vmem:[#allocation34_spill] sm:$0xff]  ;;  %v5612_v54 = vld [vmem:[#allocation39_spill] sm:$0xff] }
 0x1b6   : > { %v1868_v56 = vadd.f32 %v5601_v51, %v1627_v49  ;;  %v2320_v1 = vrot.slane %v2211_v63, 2  ;;  %v2080_v4 = vsel %vm950_vm4, %v2077_v40, %v2079_v55  ;;  %v2173_v59 = vadd.f32 %v5606_v23, %v1932_v43  ;;  %v5609_v49 = vld [vmem:[#allocation38_spill] sm:$0xff]  ;;  %v5613_v51 = vld [vmem:[#allocation40_spill] sm:$0xff]  ;;  %v5614_v35 = vld [vmem:[#allocation41_spill] sm:$0xff] }
 0x1b7   : > { %v2078_v12 = vsel %vm950_vm4, %v5603_v50, %v2077_v40  ;;  %v2172_v8 = vadd.f32 %v5604_v11, %v1931_v57  ;;  %v1934_v62 = vadd.f32 %v5607_v32, %v1869_v31  ;;  %v2171_v7 = vadd.f32 %v2080_v4, %v1930_v34 }
 0x1b8   : > { %v1933_v24 = vadd.f32 %v5605_v38, %v1868_v56  ;;  %v2170_v60 = vadd.f32 %v2078_v12, %v4684_v44  ;;  %v5608_v47 = vrot.slane %v4654_v53, 2  ;;  %v2321_v46 = vsel %vm1192_vm5, %v2318_v18, %v2320_v1  ;;  %v2884_v53 = vld [vmem:[%s5413_s2] ss:$0 sm:$0xff] }
 0x1b9   : > { %v2413_v27 = vadd.f32 %v5610_v3, %v2172_v8  ;;  %v2414_v44 = vadd.f32 %v5611_v39, %v2173_v59  ;;  %v2175_v57 = vadd.f32 %v5612_v54, %v1934_v62  ;;  %v2412_v40 = vadd.f32 %v2321_v46, %v2171_v7  ;;  %v503_v39 = vpop.f32.mrf.mxu3 }
 0x1ba   : > { %v2319_v19 = vsel %vm1192_vm5, %v5608_v47, %v2318_v18  ;;  %v2174_v14 = vadd.f32 %v5609_v49, %v1933_v24  ;;  %v607_v63 = vmax.f32 %v4689_v28, 0.0  ;;  %v533_v34 = vmul.f32 %v2884_v53, %v483_v61  ;;  %v2885_v28 = vld [vmem:[%s5414_s3] ss:$0 sm:$0xff] }
 0x1bb   : > { %v2411_v2 = vadd.f32 %v2319_v19, %v2170_v60  ;;  %v2449_v55 = vmul.f32 %v4530_v33, %v2413_v27  ;;  %v2450_v18 = vmul.f32 %v4530_v33, %v2414_v44  ;;  %v2416_v31 = vadd.f32 %v5614_v35, %v2175_v57 }
 0x1bc   : > { %v2415_v56 = vadd.f32 %v5613_v51, %v2174_v14  ;;  %v2448_v50 = vmul.f32 %v4530_v33, %v2412_v40  ;;  %v639_v12 = vmin.f32 %v607_v63, 6.0  ;;  %v569_v11 = vadd.f32 %v2885_v28, %v533_v34 }
 0x1bd   : > { %v2447_v43 = vmul.f32 %v4530_v33, %v2411_v2  ;;  %v2485_v38 = vadd.f32 %v4542_v37, %v2449_v55  ;;  %v2486_v24 = vadd.f32 %v4542_v37, %v2450_v18  ;;  %v4933_v4 = vmul.f32 %v3340_v10, %v4707_v13  ;;  %v5619_v18 = vld [vmem:[#allocation16_spill] sm:$0xff] }
 0x1be   : > { %v2451_v8 = vmul.f32 %v4530_v33, %v2415_v56  ;;  %v2452_v60 = vmul.f32 %v4530_v33, %v2416_v31  ;;  %v2484_v23 = vadd.f32 %v4542_v37, %v2448_v50  ;;  %728 = vst.msk [vmem:[#allocation2 + $0x171] sm:$0xff] %vm642_vm2, %v639_v12  ;;  %v601_v59 = vmax.f32 %v569_v11, 0.0  ;;  %v5621_v12 = vld [vmem:[#allocation52_spill] sm:$0xff] }
 0x1bf   : > { %v2483_v1 = vadd.f32 %v4542_v37, %v2447_v43  ;;  %v2517_v62 = vmax.f32 %v2485_v38, 0.0  ;;  %v2518_v7 = vmax.f32 %v2486_v24, 0.0  ;;  %v1905_v47 = vmul.f32 %v3383_v0, %v4707_v13 }
 0x1c0   : > { %v2487_v61 = vadd.f32 %v4542_v37, %v2451_v8  ;;  %v2488_v19 = vadd.f32 %v4542_v37, %v2452_v60  ;;  %v2516_v46 = vmax.f32 %v2484_v23, 0.0  ;;  %v633_v49 = vmin.f32 %v601_v59, 6.0  ;;  %v2886_v23 = vld [vmem:[#allocation2 + $0x140] sm:$0xff] }
 0x1c1   : > { %v2515_v32 = vmax.f32 %v2483_v1, 0.0  ;;  %v4944_v14 = vmul.f32 %v3352_v30, %v4707_v13  ;;  %v4948_v27 = vmin.f32 %v2517_v62, 6.0  ;;  %v4952_v44 = vmul.f32 %v3356_v36, %v4707_v13  ;;  %v5622_v62 = vld [vmem:[#allocation59_spill] sm:$0xff] }
 0x1c2   : > { %v2519_v2 = vmax.f32 %v2487_v61, 0.0  ;;  %v2520_v54 = vmax.f32 %v2488_v19, 0.0  ;;  %v4954_v57 = vmin.f32 %v2516_v46, 6.0  ;;  %v4956_v40 = vmin.f32 %v2518_v7, 6.0  ;;  %722 = vst.msk [vmem:[#allocation2 + $0x129] sm:$0xff] %vm642_vm2, %v633_v49 }
 0x1c3   : > { %v4946_v3 = vmin.f32 %v2515_v32, 6.0  ;;  %v1943_v63 = vadd.f32 %v4701_v42, %v4597_v52  ;;  %v2111_v34 = vrot.slane %v4705_v21, 1  ;;  %v2352_v51 = vrot.slane %v4711_v20, 2  ;;  %v5618_v42 = vld [vmem:[#allocation80_spill] sm:$0xff]  ;;  %v5620_v20 = vld [vmem:[#allocation81_spill] sm:$0xff]  ;;  %2581 = vst.msk [vmem:[%s3734_s10 + $0x70] sm:$0xff] %vm642_vm2, %v4948_v27 }
 0x1c4   : > { %5615 = vst [vmem:[#allocation9_spill] sm:$0xff] %v4956_v40  ;;  %v4963_v56 = vmin.f32 %v2519_v2, 6.0  ;;  %v1011_v13 = vrot.slane %v4719_v58, 1  ;;  %v4969_v43 = vmin.f32 %v2520_v54, 6.0  ;;  %v540_v55 = vmul.f32 %v2884_v53, %v501_v29 }
 0x1c5   : > { %2579 = vst.msk [vmem:[%s3734_s10 + $0x60] sm:$0xff] %vm642_vm2, %v4946_v3  ;;  %v541_v52 = vmul.f32 %v2884_v53, %v503_v39  ;;  %v1253_v21 = vrot.slane %v5618_v42, 2  ;;  %v4977_v35 = vadd.f32 %v5620_v20, %v5619_v18  ;;  %v4984_v58 = vld [vmem:[#allocation2 + $0x170] sm:$0xff]  ;;  %v4987_v11 = vadd.f32 %v1905_v47, %v5621_v12  ;;  %v4994_v8 = vld [vmem:[#allocation2 + $0x178] sm:$0x3]  ;;  %v5626_v20 = vld [vmem:[#allocation71_spill] sm:$0xff] }
 0x1c6   : > { %5616 = vst [vmem:[#allocation55_spill] sm:$0xff] %v4963_v56  ;;  %v4998_v1 = vmul.f32 %v3266_v16, %v4984_v58  ;;  %v5005_v38 = vmul.f32 %v3338_v9, %v4984_v58  ;;  %v1912_v24 = vmul.f32 %v3383_v0, %v4984_v58  ;;  %v1990_v60 = vmul.f32 %v3352_v30, %v4984_v58  ;;  %v5624_v47 = vld [vmem:[#allocation61_spill] sm:$0xff] }
 0x1c7   : > { %5617 = vst [vmem:[#allocation15_spill] sm:$0xff] %v4969_v43  ;;  %v1363_v59 = vmul.f32 %v2886_v23, %v3335_v5  ;;  %v5016_v61 = vmul.f32 %v2886_v23, %v3383_v0  ;;  %v5018_v32 = vadd.f32 %v2885_v28, %v540_v55  ;;  %v5623_v7 = vrot.slane %v5622_v62, 1 }
 0x1c8   : > { %2580 = vst.msk [vmem:[%s3734_s10 + $0x68] sm:$0xff] %vm642_vm2, %v4954_v57  ;;  %v5625_v19 = vrot.slane %v5624_v47, 1  ;;  %v5027_v49 = vadd.f32 %v2885_v28, %v541_v52  ;;  %v5031_v2 = vmul.f32 %v3266_v16, %v4994_v8  ;;  %v5036_v54 = vmul.f32 %v3338_v9, %v4994_v8 }
 0x1c9   : > { %2582 = vst.msk [vmem:[%s3734_s10 + $0x78] sm:$0xff] %vm642_vm2, %v4956_v40  ;;  %v1991_v55 = vmul.f32 %v3352_v30, %v4994_v8  ;;  %v5040_v42 = vld [vmem:[#allocation2 + $0x128] sm:$0xff]  ;;  %v5042_v18 = vld [vmem:[#allocation2 + $0x130] sm:$0x3]  ;;  %v1944_v28 = vadd.f32 %v1912_v24, %v5626_v20  ;;  %v2112_v52 = vrot.slane %v1990_v60, 1  ;;  %v2231_v12 = vmul.f32 %v3356_v36, %v4984_v58 }
 0x1ca   : > { %2583 = vst.msk [vmem:[%s3734_s10 + $0x80] sm:$0xff] %vm642_vm2, %v4963_v56  ;;  %v5025_v46 = vsel %vm950_vm4, %v5625_v19, %v5623_v7  ;;  %v2232_v23 = vmul.f32 %v3356_v36, %v4994_v8  ;;  %v814_v47 = vmul.f32 %v3285_v22, %v5040_v42  ;;  %v891_v19 = vmul.f32 %v3266_v16, %v5040_v42 }
 0x1cb   : > { %2584 = vst.msk [vmem:[%s3734_s10 + $0x88] sm:$0xff] %vm642_vm2, %v4969_v43  ;;  %v2114_v7 = vrot.slane %v1991_v55, 1  ;;  %v2113_v39 = vsel %vm950_vm4, %v2111_v34, %v2112_v52  ;;  %v2353_v53 = vrot.slane %v2231_v12, 2  ;;  %v892_v60 = vmul.f32 %v3266_v16, %v5042_v18 }
 0x1cc   : > { %v2355_v24 = vrot.slane %v2232_v23, 2  ;;  %v2184_v29 = vadd.f32 %v2113_v39, %v1943_v63  ;;  %v1012_v50 = vrot.slane %v891_v19, 1  ;;  %v1133_v55 = vmul.f32 %v3269_v17, %v5040_v42  ;;  %v5627_v39 = vld [vmem:[#allocation79_spill] sm:$0xff]  ;;  %v5628_v19 = vld [vmem:[#allocation66_spill] sm:$0xff] }
 0x1cd   : > { %v2115_v20 = vsel %vm950_vm4, %v2112_v52, %v2114_v7  ;;  %v2354_v31 = vsel %vm1192_vm5, %v2352_v51, %v2353_v53  ;;  %v1014_v56 = vrot.slane %v892_v60, 1  ;;  %v1134_v12 = vmul.f32 %v3269_v17, %v5042_v18  ;;  %v5629_v60 = vld [vmem:[#allocation35_spill] sm:$0xff] }
 0x1ce   : > { %v2185_v62 = vadd.f32 %v2115_v20, %v1944_v28  ;;  %v2356_v43 = vsel %vm1192_vm5, %v2353_v53, %v2355_v24  ;;  %v2425_v40 = vadd.f32 %v2354_v31, %v2184_v29  ;;  %v1013_v34 = vsel %vm950_vm4, %v1011_v13, %v1012_v50 }
 0x1cf   : > { %v1254_v16 = vrot.slane %v1133_v55, 2  ;;  %v1015_v63 = vsel %vm950_vm4, %v1012_v50, %v1014_v56  ;;  %v1087_v52 = vadd.f32 %v1013_v34, %v5627_v39  ;;  %v1361_v28 = vmul.f32 %v3335_v5, %v5040_v42 }
 0x1d0   : > { %v2426_v23 = vadd.f32 %v2356_v43, %v2185_v62  ;;  %v2461_v51 = vmul.f32 %v4530_v33, %v2425_v40  ;;  %v1088_v7 = vadd.f32 %v1015_v63, %v814_v47  ;;  %v1256_v31 = vrot.slane %v1134_v12, 2 }
 0x1d1   : > { %v1255_v53 = vsel %vm1192_vm5, %v1253_v21, %v1254_v16  ;;  %v1393_v24 = vadd.f32 %v1361_v28, %v5628_v19  ;;  %v1437_v43 = vmul.f32 %v3338_v9, %v5040_v42  ;;  %v1438_v62 = vmul.f32 %v3338_v9, %v5042_v18 }
 0x1d2   : > { %v2462_v13 = vmul.f32 %v4530_v33, %v2426_v23  ;;  %v1329_v29 = vadd.f32 %v1255_v53, %v1087_v52  ;;  %v2497_v56 = vadd.f32 %v4542_v37, %v2461_v51  ;;  %v1257_v50 = vsel %vm1192_vm5, %v1254_v16, %v1256_v31  ;;  %v5631_v51 = vld [vmem:[#allocation44_spill] sm:$0xff] }
 0x1d3   : > { %v1678_v40 = vmul.f32 %v3340_v10, %v5040_v42  ;;  %v1330_v47 = vadd.f32 %v1257_v50, %v1088_v7  ;;  %v1555_v55 = vrot.slane %v1437_v43, 1  ;;  %v1557_v12 = vrot.slane %v1438_v62, 1 }
 0x1d4   : > { %v2498_v21 = vadd.f32 %v4542_v37, %v2462_v13  ;;  %v1394_v20 = vadd.f32 %v5629_v60, %v1329_v29  ;;  %v2529_v34 = vmax.f32 %v2497_v56, 0.0  ;;  %v1679_v23 = vmul.f32 %v3340_v10, %v5042_v18  ;;  %v5633_v56 = vld [vmem:[#allocation45_spill] sm:$0xff] }
 0x1d5   : > { %v1796_v63 = vrot.slane %v1678_v40, 2  ;;  %v1395_v39 = vadd.f32 %v1363_v59, %v1330_v47  ;;  %v5630_v52 = vrot.slane %v4792_v25, 1  ;;  %v1558_v31 = vsel %vm950_vm4, %v1555_v55, %v1557_v12  ;;  %v5634_v40 = vld [vmem:[#allocation47_spill] sm:$0xff] }
 0x1d6   : > { %v2530_v16 = vmax.f32 %v2498_v21, 0.0  ;;  %v1635_v53 = vadd.f32 %v5631_v51, %v1394_v20  ;;  %v5089_v7 = vmin.f32 %v2529_v34, 6.0  ;;  %v5632_v29 = vrot.slane %v4933_v4, 2  ;;  %v5636_v12 = vld [vmem:[#allocation67_spill] sm:$0xff]  ;;  %v5639_v51 = vld [vmem:[#allocation70_spill] sm:$0xff] }
 0x1d7   : > { %v1556_v28 = vsel %vm950_vm4, %v5630_v52, %v1555_v55  ;;  %v1634_v59 = vadd.f32 %v1558_v31, %v1393_v24  ;;  %v1636_v25 = vadd.f32 %v5633_v56, %v1395_v39  ;;  %v1798_v50 = vrot.slane %v1679_v23, 2  ;;  %v5635_v24 = vld [vmem:[#allocation48_spill] sm:$0xff]  ;;  %v5638_v52 = vld [vmem:[#allocation63_spill] sm:$0xff] }
 0x1d8   : > { %v1633_v13 = vadd.f32 %v1556_v28, %v4977_v35  ;;  %v1797_v19 = vsel %vm1192_vm5, %v5632_v29, %v1796_v63  ;;  %v5096_v43 = vmin.f32 %v2530_v16, 6.0  ;;  %2593 = vst.msk [vmem:[%s3734_s10 + $0xd0] sm:$0xff] %vm642_vm2, %v5089_v7  ;;  %v1876_v21 = vadd.f32 %v5634_v40, %v1635_v53  ;;  %v5637_v16 = vld [vmem:[#allocation36_spill] sm:$0xff] }
 0x1d9   : > { %v1906_v47 = vmul.f32 %v3383_v0, %v5040_v42  ;;  %v1981_v4 = vmul.f32 %v3352_v30, %v5040_v42  ;;  %v1799_v35 = vsel %vm1192_vm5, %v1796_v63, %v1798_v50  ;;  %v1877_v60 = vadd.f32 %v5635_v24, %v1636_v25  ;;  %v5641_v25 = vld [vmem:[#allocation72_spill] sm:$0xff] }
 0x1da   : > { %v1874_v62 = vadd.f32 %v1797_v19, %v1633_v13  ;;  %2594 = vst.msk [vmem:[%s3734_s10 + $0xd8] sm:$0xff] %vm642_vm2, %v5096_v43  ;;  %v1982_v20 = vmul.f32 %v3352_v30, %v5042_v18  ;;  %v2222_v55 = vmul.f32 %v3356_v36, %v5040_v42  ;;  %v1875_v34 = vadd.f32 %v1799_v35, %v1634_v59  ;;  %v5640_v19 = vld [vmem:[#allocation51_spill] sm:$0xff] }
 0x1db   : > { %v1938_v23 = vadd.f32 %v1906_v47, %v5636_v12  ;;  %v1941_v28 = vadd.f32 %v5638_v52, %v1876_v21  ;;  %v1942_v53 = vadd.f32 %v5639_v51, %v1877_v60  ;;  %v2097_v31 = vrot.slane %v1981_v4, 1  ;;  %v5643_v21 = vld [vmem:[#allocation73_spill] sm:$0xff]  ;;  %v5647_v12 = vld [vmem:[#allocation74_spill] sm:$0xff] }
 0x1dc   : > { %v1939_v39 = vadd.f32 %v5637_v16, %v1874_v62  ;;  %v2099_v13 = vrot.slane %v1982_v20, 1  ;;  %v2223_v63 = vmul.f32 %v3356_v36, %v5042_v18  ;;  %v1940_v29 = vadd.f32 %v5016_v61, %v1875_v34  ;;  %v5644_v18 = vld [vmem:[#allocation53_spill] sm:$0xff]  ;;  %v5646_v34 = vld [vmem:[#allocation54_spill] sm:$0xff] }
 0x1dd   : > { %v2182_v42 = vadd.f32 %v5641_v25, %v1941_v28  ;;  %v2338_v59 = vrot.slane %v2222_v55, 2  ;;  %v5642_v50 = vrot.slane %v4944_v14, 1  ;;  %v2183_v47 = vadd.f32 %v5643_v21, %v1942_v53  ;;  %v5649_v53 = vld [vmem:[#allocation43_spill] sm:$0xff] }
 0x1de   : > { %v2180_v56 = vadd.f32 %v5640_v19, %v1939_v39  ;;  %v2100_v40 = vsel %vm950_vm4, %v2097_v31, %v2099_v13  ;;  %v2340_v4 = vrot.slane %v2223_v63, 2  ;;  %v2181_v60 = vadd.f32 %v5644_v18, %v1940_v29  ;;  %v5648_v39 = vld [vmem:[#allocation75_spill] sm:$0xff]  ;;  %v5650_v63 = vld [vmem:[#allocation76_spill] sm:$0xff] }
 0x1df   : > { %v2098_v62 = vsel %vm950_vm4, %v5642_v50, %v2097_v31  ;;  %v2179_v24 = vadd.f32 %v2100_v40, %v1938_v23  ;;  %v5645_v61 = vrot.slane %v4952_v44, 2  ;;  %v2423_v16 = vadd.f32 %v5647_v12, %v2182_v42 }
 0x1e0   : > { %v2178_v35 = vadd.f32 %v2098_v62, %v4987_v11  ;;  %v2341_v55 = vsel %vm1192_vm5, %v2338_v59, %v2340_v4  ;;  %v2421_v14 = vadd.f32 %v5646_v34, %v2180_v56  ;;  %v2424_v52 = vadd.f32 %v5648_v39, %v2183_v47  ;;  %v5651_v62 = vld [vmem:[#allocation77_spill] sm:$0xff] }
 0x1e1   : > { %v2339_v20 = vsel %vm1192_vm5, %v5645_v61, %v2338_v59  ;;  %v2420_v51 = vadd.f32 %v2341_v55, %v2179_v24  ;;  %v2422_v31 = vadd.f32 %v5649_v53, %v2181_v60  ;;  %v608_v11 = vmax.f32 %v5018_v32, 0.0 }
 0x1e2   : > { %v2419_v28 = vadd.f32 %v2339_v20, %v2178_v35  ;;  %v2457_v23 = vmul.f32 %v4530_v33, %v2421_v14  ;;  %v2459_v44 = vmul.f32 %v4530_v33, %v2423_v16  ;;  %v2460_v13 = vmul.f32 %v4530_v33, %v2424_v52  ;;  %v5652_v35 = vld [vmem:[#allocation60_spill] sm:$0xff] }
 0x1e3   : > { %v819_v29 = vmul.f32 %v3285_v22, %v5650_v63  ;;  %v2456_v56 = vmul.f32 %v4530_v33, %v2420_v51  ;;  %v2458_v25 = vmul.f32 %v4530_v33, %v2422_v31  ;;  %v640_v42 = vmin.f32 %v608_v11, 6.0  ;;  %v5654_v31 = vld [vmem:[#allocation64_spill] sm:$0xff] }
 0x1e4   : > { %v2455_v19 = vmul.f32 %v4530_v33, %v2419_v28  ;;  %v2493_v59 = vadd.f32 %v4542_v37, %v2457_v23  ;;  %v2495_v32 = vadd.f32 %v4542_v37, %v2459_v44  ;;  %v2496_v50 = vadd.f32 %v4542_v37, %v2460_v13  ;;  %v5656_v23 = vld [vmem:[#allocation62_spill] sm:$0xff] }
 0x1e5   : > { %v1026_v40 = vrot.slane %v5651_v62, 1  ;;  %v2492_v47 = vadd.f32 %v4542_v37, %v2456_v56  ;;  %v2494_v4 = vadd.f32 %v4542_v37, %v2458_v25  ;;  %729 = vst.msk [vmem:[#allocation2 + $0x181] sm:$0xff] %vm642_vm2, %v640_v42  ;;  %v1091_v33 = vadd.f32 %v5025_v46, %v5652_v35  ;;  %v5658_v56 = vld [vmem:[#allocation78_spill] sm:$0xff] }
 0x1e6   : > { %v2491_v21 = vadd.f32 %v4542_v37, %v2455_v19  ;;  %v2525_v24 = vmax.f32 %v2493_v59, 0.0  ;;  %v2527_v18 = vmax.f32 %v2495_v32, 0.0  ;;  %v2528_v60 = vmax.f32 %v2496_v50, 0.0 }
 0x1e7   : > { %v5653_v61 = vrot.slane %v4998_v1, 1  ;;  %v2524_v34 = vmax.f32 %v2492_v47, 0.0  ;;  %v2526_v14 = vmax.f32 %v2494_v4, 0.0  ;;  %v1141_v46 = vmul.f32 %v3269_v17, %v5650_v63 }
 0x1e8   : > { %v2523_v55 = vmax.f32 %v2491_v21, 0.0  ;;  %v5162_v16 = vmin.f32 %v2525_v24, 6.0  ;;  %v5164_v37 = vmin.f32 %v2527_v18, 6.0  ;;  %v5166_v39 = vmin.f32 %v2528_v60, 6.0 }
 0x1e9   : > { %v1028_v20 = vsel %vm950_vm4, %v1026_v40, %v5653_v61  ;;  %v5172_v28 = vmin.f32 %v2524_v34, 6.0  ;;  %v5174_v51 = vmin.f32 %v2526_v14, 6.0  ;;  %v1142_v53 = vmul.f32 %v3269_v17, %v4984_v58 }
 0x1ea   : > { %v1093_v12 = vadd.f32 %v1028_v20, %v819_v29  ;;  %v5170_v52 = vmin.f32 %v2523_v55, 6.0  ;;  %2589 = vst.msk [vmem:[%s3734_s10 + $0xb0] sm:$0xff] %vm642_vm2, %v5162_v16  ;;  %v5655_v11 = vrot.slane %v5654_v31, 2  ;;  %v5657_v44 = vrot.slane %v5656_v23, 2 }
 0x1eb   : > { %v1268_v29 = vrot.slane %v1141_v46, 2  ;;  %v1366_v19 = vmul.f32 %v3335_v5, %v5650_v63  ;;  %v1569_v25 = vrot.slane %v5658_v56, 1  ;;  %v1269_v42 = vrot.slane %v1142_v53, 2  ;;  %2588 = vst.msk [vmem:[%s3734_s10 + $0xa8] sm:$0xff] %vm642_vm2, %v5172_v28  ;;  %v5662_v56 = vld [vmem:[#allocation69_spill] sm:$0xff] }
 0x1ec   : > { %v1265_v13 = vsel %vm1192_vm5, %v5657_v44, %v5655_v11  ;;  %2587 = vst.msk [vmem:[%s3734_s10 + $0xa0] sm:$0xff] %vm642_vm2, %v5170_v52  ;;  %v1686_v32 = vmul.f32 %v3340_v10, %v5650_v63  ;;  %v1687_v50 = vmul.f32 %v3340_v10, %v4984_v58  ;;  %v1029_v62 = vrot.slane %v5031_v2, 1  ;;  %v779_v2 = vld [vmem:[#allocation2 + $0x180] sm:$0xff] }
 0x1ed   : > { %v1333_v59 = vadd.f32 %v1265_v13, %v1091_v33  ;;  %v1143_v40 = vmul.f32 %v3269_v17, %v4994_v8  ;;  %v1688_v21 = vmul.f32 %v3340_v10, %v4994_v8  ;;  %v5659_v47 = vrot.slane %v5005_v38, 1  ;;  %2590 = vst.msk [vmem:[%s3734_s10 + $0xb8] sm:$0xff] %vm642_vm2, %v5174_v51 }
 0x1ee   : > { %v1572_v63 = vrot.slane %v5036_v54, 1  ;;  %v1270_v35 = vsel %vm1192_vm5, %v1268_v29, %v1269_v42  ;;  %v609_v17 = vmax.f32 %v5027_v49, 0.0  ;;  %2591 = vst.msk [vmem:[%s3734_s10 + $0xc0] sm:$0xff] %vm642_vm2, %v5164_v37  ;;  %v5217_v8 = vmul.f32 %v3338_v9, %v779_v2 }
 0x1ef   : > { %v1571_v4 = vsel %vm950_vm4, %v1569_v25, %v5659_v47  ;;  %v1398_v33 = vadd.f32 %v1366_v19, %v1333_v59  ;;  %v1810_v24 = vrot.slane %v1686_v32, 2  ;;  %v1811_v18 = vrot.slane %v1687_v50, 2  ;;  %2592 = vst.msk [vmem:[%s3734_s10 + $0xc8] sm:$0xff] %vm642_vm2, %v5166_v39  ;;  %v784_v19 = vld [vmem:[#allocation2 + $0x1a8] sm:$0x3] }
 0x1f0   : > { %v1367_v54 = vmul.f32 %v3335_v5, %v4984_v58  ;;  %v1335_v60 = vadd.f32 %v1270_v35, %v1093_v12  ;;  %v1368_v61 = vmul.f32 %v3335_v5, %v779_v2  ;;  %v820_v49 = vmul.f32 %v3285_v22, %v4984_v58  ;;  %v782_v22 = vld [vmem:[#allocation2 + $0x198] sm:$0xff]  ;;  %v783_v58 = vld [vmem:[#allocation2 + $0x1a0] sm:$0xff] }
 0x1f1   : > { %v1639_v20 = vadd.f32 %v1571_v4, %v1398_v33  ;;  %v5660_v55 = vrot.slane %v4998_v1, 1  ;;  %v1271_v14 = vrot.slane %v1143_v40, 2  ;;  %v1813_v46 = vrot.slane %v1688_v21, 2 }
 0x1f2   : > { %v1812_v53 = vsel %vm1192_vm5, %v1810_v24, %v1811_v18  ;;  %v2608_v31 = vsel %vm642_vm2, %v4824_v48, 0.0  ;;  %v5661_v11 = vmov %v5659_v47  ;;  %v5237_v23 = vmul.f32 %v3340_v10, %v779_v2 }
 0x1f3   : > { %v1030_v34 = vsel %vm950_vm4, %v5660_v55, %v1029_v62  ;;  %v1573_v12 = vsel %vm950_vm4, %v5661_v11, %v1572_v63  ;;  %v641_v44 = vmin.f32 %v609_v17, 6.0  ;;  %v1574_v1 = vrot.slane %v5217_v8, 1 }
 0x1f4   : > { %v1913_v13 = vmul.f32 %v3383_v0, %v779_v2  ;;  %v5242_v29 = vmul.f32 %v3352_v30, %v779_v2  ;;  %v1399_v48 = vadd.f32 %v1367_v54, %v5662_v56  ;;  %v1400_v25 = vadd.f32 %v1368_v61, %v1335_v60  ;;  %v5663_v54 = vld [vmem:[#allocation56_spill] sm:$0xff] }
 0x1f5   : > { %v1880_v38 = vadd.f32 %v1812_v53, %v1639_v20  ;;  %v5246_v59 = vmul.f32 %v3356_v36, %v779_v2  ;;  %730 = vst.msk [vmem:[#allocation2 + $0x189] sm:$0xff] %vm642_vm2, %v641_v44  ;;  %v1094_v32 = vadd.f32 %v1030_v34, %v820_v49  ;;  %v1272_v50 = vsel %vm1192_vm5, %v1269_v42, %v1271_v14 }
 0x1f6   : > { %v1814_v62 = vsel %vm1192_vm5, %v1811_v18, %v1813_v46  ;;  %v1995_v40 = vmul.f32 %v3352_v30, %v782_v22  ;;  %v1996_v21 = vmul.f32 %v3352_v30, %v783_v58  ;;  %v1640_v47 = vadd.f32 %v1573_v12, %v1399_v48 }
 0x1f7   : > { %v1997_v4 = vmul.f32 %v3352_v30, %v784_v19  ;;  %v5255_v63 = vmul.f32 %v3356_v36, %v782_v22  ;;  %v2606_v2 = vsel %vm642_vm2, %v4819_v15, 0.0  ;;  %v5260_v17 = vmul.f32 %v3356_v36, %v783_v58 }
 0x1f8   : > { %v2121_v35 = vrot.slane %v1995_v40, 1  ;;  %v2122_v33 = vrot.slane %v1996_v21, 1  ;;  %v5263_v42 = vmul.f32 %v3356_v36, %v784_v19  ;;  %v1815_v8 = vrot.slane %v5237_v23, 2 }
 0x1f9   : > { %v2116_v24 = vrot.slane %v5242_v29, 1  ;;  %v2357_v18 = vrot.slane %v5246_v59, 2  ;;  %v2607_v60 = vadd.f32 %v2606_v2, %v5663_v54  ;;  %v1945_v61 = vadd.f32 %v1913_v13, %v1880_v38 }
 0x1fa   : > { %v1336_v20 = vadd.f32 %v1272_v50, %v1094_v32  ;;  %v1915_v15 = vmul.f32 %v3383_v0, %v782_v22  ;;  %v1916_v49 = vmul.f32 %v3383_v0, %v783_v58  ;;  %v1881_v55 = vadd.f32 %v1814_v62, %v1640_v47 }
 0x1fb   : > { %v2124_v34 = vrot.slane %v1997_v4, 1  ;;  %v2362_v14 = vrot.slane %v5255_v63, 2  ;;  %v2609_v46 = vadd.f32 %v2608_v31, %v2607_v60  ;;  %v2123_v12 = vsel %vm950_vm4, %v2121_v35, %v2122_v33 }
 0x1fc   : > { %v780_v53 = vld [vmem:[#allocation2 + $0x188] sm:$0xff]  ;;  %v781_v11 = vld [vmem:[#allocation2 + $0x190] sm:$0x3]  ;;  %v2363_v23 = vrot.slane %v5260_v17, 2  ;;  %v2365_v44 = vrot.slane %v5263_v42, 2  ;;  %v2610_v13 = vsel %vm642_vm2, %v4821_v26, 0.0 }
 0x1fd   : > { %v1369_v22 = vmul.f32 %v3335_v5, %v780_v53  ;;  %v1449_v58 = vmul.f32 %v3338_v9, %v780_v53  ;;  %v1450_v29 = vmul.f32 %v3338_v9, %v781_v11  ;;  %v1690_v19 = vmul.f32 %v3340_v10, %v780_v53 }
 0x1fe   : > { %v1691_v31 = vmul.f32 %v3340_v10, %v781_v11  ;;  %v1914_v56 = vmul.f32 %v3383_v0, %v780_v53  ;;  %v1993_v48 = vmul.f32 %v3352_v30, %v780_v53  ;;  %v1994_v38 = vmul.f32 %v3352_v30, %v781_v11 }
 0x1ff   : > { %v1401_v59 = vadd.f32 %v1369_v22, %v1336_v20  ;;  %v1575_v32 = vrot.slane %v1449_v58, 1  ;;  %v1577_v50 = vrot.slane %v1450_v29, 1  ;;  %v1816_v26 = vrot.slane %v1690_v19, 2 }
 0x200   : > { %v1818_v62 = vrot.slane %v1691_v31, 2  ;;  %v1946_v5 = vadd.f32 %v1914_v56, %v1881_v55  ;;  %v2117_v40 = vrot.slane %v1993_v48, 1  ;;  %v2119_v21 = vrot.slane %v1994_v38, 1 }
 0x201   : > { %v1576_v9 = vsel %vm950_vm4, %v1574_v1, %v1575_v32  ;;  %v1578_v47 = vsel %vm950_vm4, %v1575_v32, %v1577_v50  ;;  %v1817_v10 = vsel %vm1192_vm5, %v1815_v8, %v1816_v26  ;;  %v2234_v0 = vmul.f32 %v3356_v36, %v780_v53 }
 0x202   : > { %v1641_v4 = vadd.f32 %v1576_v9, %v1400_v25  ;;  %v1642_v63 = vadd.f32 %v1578_v47, %v1401_v59  ;;  %v1819_v30 = vsel %vm1192_vm5, %v1816_v26, %v1818_v62  ;;  %v2118_v2 = vsel %vm950_vm4, %v2116_v24, %v2117_v40  ;;  %v5665_v26 = vld [vmem:[#allocation65_spill] sm:$0xff] }
 0x203   : > { %v2120_v35 = vsel %vm950_vm4, %v2117_v40, %v2119_v21  ;;  %v2186_v17 = vadd.f32 %v2118_v2, %v1945_v61  ;;  %v2235_v42 = vmul.f32 %v3356_v36, %v781_v11  ;;  %v2358_v54 = vrot.slane %v2234_v0, 2 }
 0x204   : > { %v1882_v60 = vadd.f32 %v1817_v10, %v1641_v4  ;;  %v1883_v1 = vadd.f32 %v1819_v30, %v1642_v63  ;;  %v2187_v20 = vadd.f32 %v2120_v35, %v1946_v5  ;;  %v2611_v55 = vadd.f32 %v2610_v13, %v2609_v46 }
 0x205   : > { %v2125_v8 = vsel %vm950_vm4, %v2122_v33, %v2124_v34  ;;  %v2359_v53 = vsel %vm1192_vm5, %v2357_v18, %v2358_v54  ;;  %v2360_v25 = vrot.slane %v2235_v42, 2  ;;  %v2612_v22 = vsel %vm642_vm2, %v4826_v6, 0.0  ;;  %v2887_v6 = vld [vmem:[%s5416_s5] ss:$0 sm:$0xff] }
 0x206   : > { %v1947_v24 = vadd.f32 %v1915_v15, %v1882_v60  ;;  %v1948_v58 = vadd.f32 %v1916_v49, %v1883_v1  ;;  %v2427_v29 = vadd.f32 %v2359_v53, %v2186_v17  ;;  %v2614_v36 = vsel %vm642_vm2, %v4830_v41, 0.0 }
 0x207   : > { %v2361_v61 = vsel %vm1192_vm5, %v2358_v54, %v2360_v25  ;;  %v2364_v11 = vsel %vm1192_vm5, %v2362_v14, %v2363_v23  ;;  %v2366_v46 = vsel %vm1192_vm5, %v2363_v23, %v2365_v44  ;;  %v2613_v33 = vadd.f32 %v2612_v22, %v2611_v55  ;;  %v2888_v14 = vld [vmem:[%s5417_s6] ss:$0 sm:$0xff]  ;;  %v5664_v44 = vld [vmem:[#allocation49_spill] sm:$0xff] }
 0x208   : > { %v2188_v34 = vadd.f32 %v2123_v12, %v1947_v24  ;;  %v2189_v18 = vadd.f32 %v2125_v8, %v1948_v58  ;;  %v2428_v13 = vadd.f32 %v2361_v61, %v2187_v20  ;;  %v2463_v15 = vmul.f32 %v2887_v6, %v2427_v29 }
 0x209   : > { %v2615_v49 = vadd.f32 %v2614_v36, %v2613_v33  ;;  %v2616_v41 = vsel %vm642_vm2, %v4841_v45, 0.0  ;;  %v2618_v48 = vsel %vm642_vm2, %v5664_v44, 0.0  ;;  %v2620_v62 = vsel %vm642_vm2, %v5665_v26, 0.0 }
 0x20a   : > { %v2429_v19 = vadd.f32 %v2364_v11, %v2188_v34  ;;  %v2430_v31 = vadd.f32 %v2366_v46, %v2189_v18  ;;  %v2464_v56 = vmul.f32 %v2887_v6, %v2428_v13  ;;  %v2499_v12 = vadd.f32 %v2888_v14, %v2463_v15 }
 0x20b   : > { %v2617_v23 = vadd.f32 %v2616_v41, %v2615_v49  ;;  %v2622_v63 = vsel %vm642_vm2, %v4946_v3, 0.0  ;;  %v2624_v17 = vsel %vm642_vm2, %v4954_v57, 0.0  ;;  %v2626_v54 = vsel %vm642_vm2, %v4948_v27, 0.0 }
 0x20c   : > { %v2465_v38 = vmul.f32 %v2887_v6, %v2429_v19  ;;  %v2466_v59 = vmul.f32 %v2887_v6, %v2430_v31  ;;  %v2500_v32 = vadd.f32 %v2888_v14, %v2464_v56  ;;  %v2531_v50 = vmax.f32 %v2499_v12, 0.0 }
 0x20d   : > { %v2619_v45 = vadd.f32 %v2618_v48, %v2617_v23 }
 0x20e   : > { %v2501_v5 = vadd.f32 %v2888_v14, %v2465_v38  ;;  %v2502_v40 = vadd.f32 %v2888_v14, %v2466_v59  ;;  %v2532_v21 = vmax.f32 %v2500_v32, 0.0  ;;  %v5318_v9 = vmin.f32 %v2531_v50, 6.0 }
 0x20f   : > { %v2621_v47 = vadd.f32 %v2620_v62, %v2619_v45 }
 0x210   : > { %v2533_v10 = vmax.f32 %v2501_v5, 0.0  ;;  %v2534_v0 = vmax.f32 %v2502_v40, 0.0  ;;  %v2564_v4 = vmin.f32 %v2532_v21, 6.0  ;;  %2595 = vst.msk [vmem:[%s3734_s10 + $0xe0] sm:$0xff] %vm642_vm2, %v5318_v9 }
 0x211   : > { %v2623_v30 = vadd.f32 %v2622_v63, %v2621_v47 }
 0x212   : > { %v2565_v2 = vmin.f32 %v2533_v10, 6.0  ;;  %v2566_v35 = vmin.f32 %v2534_v0, 6.0  ;;  %2596 = vst.msk [vmem:[%s3734_s10 + $0xe8] sm:$0xff] %vm642_vm2, %v2564_v4 }
 0x213   : > { %v2625_v42 = vadd.f32 %v2624_v17, %v2623_v30 }
 0x214   : > { %2597 = vst.msk [vmem:[%s3734_s10 + $0xf0] sm:$0xff] %vm642_vm2, %v2565_v2 }
 0x215   : > { %2598 = vst.msk [vmem:[%s3734_s10 + $0xf8] sm:$0xff] %vm642_vm2, %v2566_v35  ;;  %v2627_v3 = vadd.f32 %v2626_v54, %v2625_v42 }
 0x216   : > { %2916 = shalt.err (!%p2913_p3)
}
 0x217   : > { %s2986_s10 = smov 128   ;;  %s2987_s23 = smov 8   ;;  %v5666_v27 = vld [vmem:[#allocation9_spill] sm:$0xff]  ;;  %v5667_v1 = vld [vmem:[#allocation55_spill] sm:$0xff]  ;;  %v5669_v22 = vld [vmem:[#allocation50_spill] sm:$0xff]  ;;  %v2638_v11 = vsel %vm642_vm2, %v5170_v52, 0.0 }
 0x218   : > { %2827 = dma.vmem_to_hbm [thread:$0]  (%p3071_p5), %s2689_s24, 4096, %s2691_s26, %s2672_s12, %s2986_s10, %s2986_s10, %s2987_s23   ;;  %v2628_v57 = vsel %vm642_vm2, %v5666_v27, 0.0  ;;  %v2630_v20 = vsel %vm642_vm2, %v5667_v1, 0.0  ;;  %v5668_v8 = vld [vmem:[#allocation15_spill] sm:$0xff]  ;;  %v2634_v24 = vsel %vm642_vm2, %v5669_v22, 0.0  ;;  %v5670_v29 = vld [vmem:[#allocation68_spill] sm:$0xff] }
 0x219   : > { %v2629_v60 = vadd.f32 %v2628_v57, %v2627_v3  ;;  %v2632_v53 = vsel %vm642_vm2, %v5668_v8, 0.0  ;;  %v2636_v36 = vsel %vm642_vm2, %v5670_v29, 0.0  ;;  %v2640_v33 = vsel %vm642_vm2, %v5172_v28, 0.0  ;;  %s2702_s12 = scalar_lea.hbm %s5419_s8, %s3054_s9  ;;  %s308_s13 = scalar_lea.vmem [#allocation5], %s3642_s25 }
 0x21a   : > { %v2642_v18 = vsel %vm642_vm2, %v5162_v16, 0.0  ;;  %v2644_v6 = vsel %vm642_vm2, %v5174_v51, 0.0  ;;  %v2646_v49 = vsel %vm642_vm2, %v5164_v37, 0.0  ;;  %v2648_v52 = vsel %vm642_vm2, %v5166_v39, 0.0  ;;  %s2704_s17 = sshll.u32 %s308_s13, 4  ;;  %s2706_s18 = sshll.u32 %s2702_s12, 4  ;;  %s2705_s17 = int_to_ptr.vmem [resolvable:$true] %s2704_s17  ;;  %s2707_s18 = int_to_ptr.hbm [resolvable:$true] %s2706_s18 }
 0x21b   : > { %v2631_v55 = vadd.f32 %v2630_v20, %v2629_v60  ;;  %v2650_v28 = vsel %vm642_vm2, %v5089_v7, 0.0  ;;  %v2652_v16 = vsel %vm642_vm2, %v5096_v43, 0.0  ;;  %v2654_v51 = vsel %vm642_vm2, %v5318_v9, 0.0  ;;  %s2677_s19 = scalar_lea.sflag [#allocation6], %s3642_s25  ;;  %s2931_s20 = sshra.s32 %s2707_s18, 4  ;;  %s2932_s20 = int_to_ptr.hbm [resolvable:$true] %s2931_s20 }
 0x21c   : > { %v2656_v37 = vsel %vm642_vm2, %v2564_v4, 0.0  ;;  %v2658_v39 = vsel %vm642_vm2, %v2565_v2, 0.0  ;;  %v2660_v44 = vsel %vm642_vm2, %v2566_v35, 0.0  ;;  %vm2669_vm6 = vcmask 253952   ;;  %s2933_s21 = scalar_lea.hbm %s2932_s20, 1  ;;  %s2937_s10 = scalar_lea.hbm %s5419_s8, 2 }
 0x21d   : > { %v2633_v25 = vadd.f32 %v2632_v53, %v2631_v55  ;;  %p2934_p4 = scmp.ne.s32.totalorder %s2932_s20, %s2933_s21  ;;  %p2938_p9 = scmp.lt.s32.totalorder %s2932_s20, %s5419_s8 }
 0x21e   : > { %p2939_p10 = scmp.lt.s32.totalorder %s2937_s10, %s2933_s21 }
 0x21f   : > { %v2635_v58 = vadd.f32 %v2634_v24, %v2633_v25  ;;  %p2935_p7 = pnand %p2934_p4, %p3071_p5 }
 0x220   : > { %p2940_p11 = por %p2939_p10, %p2938_p9 }
 0x221   : > { %v2637_v61 = vadd.f32 %v2636_v36, %v2635_v58  ;;  %p2936_p8 = pneg %p2935_p7 }
 0x223   : > { %v2639_v46 = vadd.f32 %v2638_v11, %v2637_v61  ;;  %p2941_p12 = pnand %p2940_p11, %p2936_p8 }
 0x225   : > { %v2641_v34 = vadd.f32 %v2640_v33, %v2639_v46 }
 0x227   : > { %v2643_v13 = vadd.f32 %v2642_v18, %v2641_v34 }
 0x229   : > { %v2645_v15 = vadd.f32 %v2644_v6, %v2643_v13 }
 0x22b   : > { %v2647_v41 = vadd.f32 %v2646_v49, %v2645_v15 }
 0x22d   : > { %v2649_v19 = vadd.f32 %v2648_v52, %v2647_v41 }
 0x22f   : > { %v2651_v31 = vadd.f32 %v2650_v28, %v2649_v19 }
 0x231   : > { %v2653_v56 = vadd.f32 %v2652_v16, %v2651_v31 }
 0x233   : > { %v2655_v14 = vadd.f32 %v2654_v51, %v2653_v56 }
 0x235   : > { %v2657_v12 = vadd.f32 %v2656_v37, %v2655_v14 }
 0x237   : > { %v2659_v23 = vadd.f32 %v2658_v39, %v2657_v12 }
 0x239   : > { %v2661_v7 = vadd.f32 %v2660_v44, %v2659_v23 }
 0x23b   : > { %v2662_v48 = vrot.slane %v2661_v7, 4 }
 0x23d   : > { %v2663_v38 = vadd.f32 %v2662_v48, %v2661_v7 }
 0x23f   : > { %v2664_v59 = vrot.slane %v2663_v38, 2 }
 0x241   : > { %v2665_v43 = vadd.f32 %v2664_v59, %v2663_v38 }
 0x243   : > { %v2666_v32 = vrot.slane %v2665_v43, 1 }
 0x245   : > { %v2667_v50 = vadd.f32 %v2666_v32, %v2665_v43 }
 0x247   : > { %v2668_v45 = vmul.f32 0.00390625, %v2667_v50 }
 0x249   : > { %2670 = vst.msk [vmem:[%s308_s13] sm:$0x1] %vm2669_vm6, %v2668_v45 }
 0x24a   : > { %2944 = shalt.err (!%p2941_p12)
}
 0x24b   : > { %2828 = dma.vmem_to_hbm [thread:$0]  (%p3071_p5), %s2705_s17, 16, %s2707_s18, %s2677_s19  }
 0x24c PF: > { %p2838_p13 = scmp.ge.s32.totalorder %s2983_s30, 2  ;;  %s2718_s25 = sand.u32 1, %s2971_s27  }
 0x24d   : > { %s2719_s26 = scalar_lea.sflag [#allocation4], %s2718_s25 }
 0x24e   : > { %p2832_p0 = pnand %p2838_p13, %p3075_p6 }
 0x250   : > { %p2833_p1 = pneg %p2832_p0 }
 0x252   : > { %2962 = dma.done.wait (%p2833_p1), %s2719_s26, 4096  }
 0x253   : > { %2964 = vsyncadd (%p2833_p1), %s2719_s26, 4294963200  ;;  %s2729_s12 = scalar_lea.sflag [#allocation6], %s2718_s25 }
 0x254   : > { %2966 = dma.done.wait (%p2833_p1), %s2729_s12, 16  }
 0x255   : > { %2968 = vsyncadd (%p2833_p1), %s2729_s12, 4294967280  ;;  %p22_p5 = scmp.ge.s32.totalorder %s3058_s11, 4   ;;  %s5671_s27 = smov %s2975_s28 }
 0x256   : > { %s5672_s28 = smov %s2979_s29  ;;  %s5673_s29 = smov %s3069_s14 }
 0x257   : > { %s5674_s30 = smov %s3058_s11  ;;  %24 = sbr.rel (!%p22_p5) target bundleno = 5 (0x5), region = 101 }
 0x25c   :  { %2734 = vsyncpa [#allocation4], 1 }
 0x25d   :  { %2736 = vsyncpa [#allocation4 + $0x1], 1 }
 0x25e   :  { %2737 = vsyncpa [#allocation6], 1 }
 0x25f   :  { %2739 = vsyncpa [#allocation6 + $0x1], 1 }

</bundles_post_ra>
